<compile_context>
chip_gen: v5e
topology: v5e:2x2
jax: 0.10.0
libtpu: 0.0.40
codegen_flags: <defaults>
</compile_context>

<pallas_src>
import functools

import jax
import jax.numpy as jnp
import numpy as np
from jax import lax
from jax.experimental import pallas as pl
from jax.experimental.pallas import tpu as pltpu

K_SIZE = 4          # all convs use 4x4 kernels
STRIDE = 2
PAD = 1
_ROW_PAD = 8        # extra zero rows on flattened inputs (tap wrap-around slack)


# ----------------------------------------------------------------------------
# Pallas kernel:  out = act( bias + sum_t  x[off_t : off_t + M, :] @ W[t] )
# Shared by the strided conv (4 taps) and the phase-decomposed transposed conv
# (9 taps).  `offsets` and `relu` are static Python values (taps unrolled).
# ----------------------------------------------------------------------------
def _taps_matmul_kernel(x_ref, w_ref, b_ref, o_ref, *, offsets, relu):
    m = o_ref.shape[1]
    n = o_ref.shape[2]
    # Start the accumulator at the broadcast bias (saves a separate add pass).
    acc = jnp.broadcast_to(b_ref[...], (m, n)).astype(jnp.float32)
    for t, off in enumerate(offsets):
        lhs = x_ref[0, pl.ds(off, m), :]            # contiguous (m, K) VMEM slice
        acc = acc + jnp.dot(lhs, w_ref[t], preferred_element_type=jnp.float32)
    if relu:
        acc = jnp.maximum(acc, 0.0)
    o_ref[0] = acc.astype(o_ref.dtype)


def taps_matmul(x_flat, w_packed, bias_row, offsets, m_out, relu):
    """x_flat: (B, L, K), w_packed: (T, K, N), bias_row: (1, N) -> (B, m_out, N)."""
    B, L, K = x_flat.shape
    T, K2, N = w_packed.shape
    assert K == K2 and T == len(offsets)
    kernel = functools.partial(_taps_matmul_kernel, offsets=tuple(offsets),
                               relu=relu)
    return pl.pallas_call(
        kernel,
        out_shape=jax.ShapeDtypeStruct((B, m_out, N), jnp.float32),
        grid=(B,),
        in_specs=[
            pl.BlockSpec((1, L, K), lambda b: (b, 0, 0)),      # per-batch block
            pl.BlockSpec((T, K, N), lambda b: (0, 0, 0)),      # packed weights
            pl.BlockSpec((1, N), lambda b: (0, 0)),            # bias row
        ],
        out_specs=pl.BlockSpec((1, m_out, N), lambda b: (b, 0, 0)),
        compiler_params=pltpu.CompilerParams(
            dimension_semantics=("parallel",)),                # megacore-shardable
    )(x_flat, w_packed, bias_row)


# ----------------------------------------------------------------------------
# Layer wrappers (XLA side: only 1x-sized pad / space-to-depth re-layouts)
# ----------------------------------------------------------------------------
def conv2d_s2(x_nhwc, w_packed, bias_row):
    """Conv2d(k=4, s=2, p=1) + bias + ReLU, fused in one Pallas kernel."""
    B, H, W, C = x_nhwc.shape
    ho, wo = H // 2, W // 2
    hs, ws = ho + 1, wo + 1
    # pad by 1, fold the 2x2 stride phases into channels, flatten rows
    xp = jnp.pad(x_nhwc, ((0, 0), (1, 1), (1, 1), (0, 0)))          # (B,H+2,W+2,C)
    s2d = xp.reshape(B, hs, 2, ws, 2, C)                            # [b,u,sa,v,sb,c]
    s2d = jnp.transpose(s2d, (0, 1, 3, 2, 4, 5)).reshape(B, hs * ws, 4 * C)
    s2d = jnp.pad(s2d, ((0, 0), (0, _ROW_PAD), (0, 0)))
    offsets = tuple(da * ws + db for da in range(2) for db in range(2))
    y = taps_matmul(s2d, w_packed, bias_row, offsets, ho * ws, relu=True)
    # drop the junk column produced by the wrapped flat indexing
    return y.reshape(B, ho, ws, -1)[:, :, :wo, :]


def conv_transpose2d_s2(x_nhwc, w_packed, bias_row, relu):
    """ConvTranspose2d(k=4, s=2, p=1) + bias (+ ReLU), phase-decomposed."""
    B, H, W, C = x_nhwc.shape
    hp, wp = H + 2, W + 2
    O = w_packed.shape[-1] // 4
    xp = jnp.pad(x_nhwc, ((0, 0), (1, 1), (1, 1), (0, 0)))
    flat = xp.reshape(B, hp * wp, C)
    flat = jnp.pad(flat, ((0, 0), (0, _ROW_PAD), (0, 0)))
    offsets = tuple(oy * wp + ox for oy in range(3) for ox in range(3))
    y = taps_matmul(flat, w_packed, bias_row, offsets, H * wp, relu=relu)
    # (B, H*wp, 4O) -> interleave the 4 parity phases back into 2H x 2W
    y = y.reshape(B, H, wp, 2, 2, O)[:, :, :W]          # [b, m, n, r, c, o]
    y = jnp.transpose(y, (0, 1, 3, 2, 4, 5))            # [b, m, r, n, c, o]
    return y.reshape(B, 2 * H, 2 * W, O)


# ----------------------------------------------------------------------------
# Weight packing (done once, outside the forward path)
# ----------------------------------------------------------------------------
def pack_enc_weight(w_oihw):
    """Conv2d weight (O,I,4,4) -> (4 taps, 4*I, O); rows ordered (2*sa+sb)*I+i."""
    blocks = []
    for da in range(2):
        for db in range(2):
            rows = [jnp.transpose(w_oihw[:, :, 2 * da + sa, 2 * db + sb])  # (I,O)
                    for sa in range(2) for sb in range(2)]
            blocks.append(jnp.concatenate(rows, axis=0))                   # (4I,O)
    return jnp.stack(blocks, axis=0)


def pack_dec_weight(w_iohw):
    """ConvT weight (I,O,4,4) -> (9 taps, I, 4*O); cols ordered (2*r+c)*O+o."""
    I, O = w_iohw.shape[:2]
    mats = []
    for oy in range(3):
        for ox in range(3):
            m = jnp.zeros((I, 4 * O), w_iohw.dtype)
            for r in range(2):
                for c in range(2):
                    da, db = oy - r, ox - c
                    if 0 <= da <= 1 and 0 <= db <= 1:
                        ph = 2 * r + c
                        m = m.at[:, ph * O:(ph + 1) * O].set(
                            w_iohw[:, :, 3 - 2 * da - r, 3 - 2 * db - c])
            mats.append(m)
    return jnp.stack(mats, axis=0)


def pack_params(params):
    packed = {"enc": [], "dec": []}
    for w, b in params["enc"]:
        packed["enc"].append((pack_enc_weight(w), b.reshape(1, -1)))
    for w, b in params["dec"]:
        packed["dec"].append((pack_dec_weight(w), jnp.tile(b, 4).reshape(1, -1)))
    return packed


# ----------------------------------------------------------------------------
# CNNAE forward (Pallas) and pure-lax reference
# ----------------------------------------------------------------------------
def init_params(key, in_channels=3, hidden_channels=16, latent_channels=4):
    """Deterministic init mirroring the module's parameter shapes."""
    k = K_SIZE
    enc_shapes = [  # Conv2d weight (O, I, kh, kw)
        (hidden_channels, in_channels, k, k),
        (hidden_channels, hidden_channels, k, k),
        (latent_channels, hidden_channels, k, k),
    ]
    dec_shapes = [  # ConvTranspose2d weight (I, O, kh, kw)
        (latent_channels, hidden_channels, k, k),
        (hidden_channels, hidden_channels, k, k),
        (hidden_channels, in_channels, k, k),
    ]
    params = {"enc": [], "dec": []}
    for shapes, tag, bias_dim in ((enc_shapes, "enc", 0), (dec_shapes, "dec", 1)):
        for shp in shapes:
            key, kw_, kb_ = jax.random.split(key, 3)
            fan_in = shp[1] * k * k
            bound = 1.0 / np.sqrt(fan_in)
            w = jax.random.uniform(kw_, shp, jnp.float32, -bound, bound)
            b = jax.random.uniform(kb_, (shp[bias_dim],), jnp.float32, -bound, bound)
            params[tag].append((w, b))
    return params


@jax.jit
def cnnae_forward(x_nchw, packed):
    x = jnp.transpose(x_nchw, (0, 2, 3, 1))              # NCHW -> NHWC
    for w, b in packed["enc"]:                           # conv + ReLU (+Drop(0)=id)
        x = conv2d_s2(x, w, b)
    n_dec = len(packed["dec"])
    for li, (w, b) in enumerate(packed["dec"]):          # convT (+ReLU except last)
        x = conv_transpose2d_s2(x, w, b, relu=(li < n_dec - 1))
    return jnp.transpose(x, (0, 3, 1, 2))                # NHWC -> NCHW


def cnnae_forward_ref(x_nchw, params):
    """Pure jax.lax reference (no Pallas) for correctness checking."""
    x = jnp.transpose(x_nchw, (0, 2, 3, 1))
    dn = ("NHWC", "HWIO", "NHWC")
    for w, b in params["enc"]:
        y = lax.conv_general_dilated(
            x, jnp.transpose(w, (2, 3, 1, 0)), window_strides=(2, 2),
            padding=((1, 1), (1, 1)), dimension_numbers=dn) + b
        x = jnp.maximum(y, 0.0)
    for li, (w, b) in enumerate(params["dec"]):
        w_hwio = jnp.transpose(w[:, :, ::-1, ::-1], (2, 3, 0, 1))
        y = lax.conv_general_dilated(
            x, w_hwio, window_strides=(1, 1), padding=((2, 2), (2, 2)),
            lhs_dilation=(2, 2), dimension_numbers=dn) + b
        x = y if li == len(params["dec"]) - 1 else jnp.maximum(y, 0.0)
    return jnp.transpose(x, (0, 3, 1, 2))


if __name__ == "__main__":
    key = jax.random.PRNGKey(0)
    kx, kp = jax.random.split(key)
    # images of size (in_channels, 32, 32), small batch
    x = jax.random.normal(kx, (2, 3, 32, 32), jnp.float32)
    params = init_params(kp, in_channels=3, hidden_channels=16, latent_channels=4)
    packed = pack_params(params)     # one-time weight packing (outside forward)

    out = jax.block_until_ready(cnnae_forward(x, packed))
    assert out.shape == (2, 3, 32, 32), out.shape

    ref = jax.block_until_ready(cnnae_forward_ref(x, params))
    np.testing.assert_allclose(np.asarray(out), np.asarray(ref),
                               rtol=1e-4, atol=1e-4)
    print("KERNEL_OK")
</pallas_src>

<mosaic_0001>
module attributes {stable_mosaic.version = 11 : i64} {
  func.func @_taps_matmul_kernel(%arg0: i32, %arg1: memref<1x297x12xf32, #tpu.memory_space<vmem>>, %arg2: memref<4x12x16xf32, #tpu.memory_space<vmem>>, %arg3: memref<1x16xf32, #tpu.memory_space<vmem>>, %arg4: memref<1x272x16xf32, #tpu.memory_space<vmem>>) attributes {dimension_semantics = [#tpu.dimension_semantics<parallel>], iteration_bounds = array<i64: 2>, scalar_prefetch = 0 : i64, scratch_operands = 0 : i64, tpu.core_type = #tpu.core_type<tc>, window_params = [{transform_indices = @transform_0, window_bounds = array<i64: 1, 297, 12>}, {pipeline_mode = #tpu.pipeline_mode<synchronous>, transform_indices = @transform_1, window_bounds = array<i64: 4, 12, 16>}, {pipeline_mode = #tpu.pipeline_mode<synchronous>, transform_indices = @transform_2, window_bounds = array<i64: 1, 16>}, {transform_indices = @transform_3, window_bounds = array<i64: 1, 272, 16>}]} {
    %c0 = arith.constant 0 : index
    %c0_0 = arith.constant 0 : index
    %0 = vector.load %arg3[%c0, %c0_0] : memref<1x16xf32, #tpu.memory_space<vmem>>, vector<1x16xf32>
    %1 = vector.shape_cast %0 : vector<1x16xf32> to vector<1x16xf32>
    %2 = vector.broadcast %1 : vector<1x16xf32> to vector<272x16xf32>
    %c0_1 = arith.constant 0 : index
    %c0_2 = arith.constant 0 : index
    %c0_3 = arith.constant 0 : index
    %3 = vector.load %arg1[%c0_1, %c0_2, %c0_3] : memref<1x297x12xf32, #tpu.memory_space<vmem>>, vector<1x272x12xf32>
    %4 = vector.shape_cast %3 : vector<1x272x12xf32> to vector<272x12xf32>
    %c0_4 = arith.constant 0 : index
    %c0_5 = arith.constant 0 : index
    %c0_6 = arith.constant 0 : index
    %5 = vector.load %arg2[%c0_4, %c0_5, %c0_6] : memref<4x12x16xf32, #tpu.memory_space<vmem>>, vector<1x12x16xf32>
    %6 = vector.shape_cast %5 : vector<1x12x16xf32> to vector<12x16xf32>
    %cst = arith.constant dense<0.000000e+00> : vector<272x16xf32>
    %7 = tpu.matmul %4, %6, %cst {dimension_numbers = #tpu.dot_dimension_numbers<[1], [0], [0], [1], [0, 0, 1, 1], [], []>} : vector<272x12xf32>, vector<12x16xf32>, vector<272x16xf32> -> vector<272x16xf32>
    %8 = arith.addf %2, %7 : vector<272x16xf32>
    %c0_7 = arith.constant 0 : index
    %c1 = arith.constant 1 : index
    %c0_8 = arith.constant 0 : index
    %9 = vector.load %arg1[%c0_7, %c1, %c0_8] : memref<1x297x12xf32, #tpu.memory_space<vmem>>, vector<1x272x12xf32>
    %10 = vector.shape_cast %9 : vector<1x272x12xf32> to vector<272x12xf32>
    %c1_9 = arith.constant 1 : index
    %c0_10 = arith.constant 0 : index
    %c0_11 = arith.constant 0 : index
    %11 = vector.load %arg2[%c1_9, %c0_10, %c0_11] : memref<4x12x16xf32, #tpu.memory_space<vmem>>, vector<1x12x16xf32>
    %12 = vector.shape_cast %11 : vector<1x12x16xf32> to vector<12x16xf32>
    %cst_12 = arith.constant dense<0.000000e+00> : vector<272x16xf32>
    %13 = tpu.matmul %10, %12, %cst_12 {dimension_numbers = #tpu.dot_dimension_numbers<[1], [0], [0], [1], [0, 0, 1, 1], [], []>} : vector<272x12xf32>, vector<12x16xf32>, vector<272x16xf32> -> vector<272x16xf32>
    %14 = arith.addf %8, %13 : vector<272x16xf32>
    %c0_13 = arith.constant 0 : index
    %c17 = arith.constant 17 : index
    %c0_14 = arith.constant 0 : index
    %15 = vector.load %arg1[%c0_13, %c17, %c0_14] : memref<1x297x12xf32, #tpu.memory_space<vmem>>, vector<1x272x12xf32>
    %16 = vector.shape_cast %15 : vector<1x272x12xf32> to vector<272x12xf32>
    %c2 = arith.constant 2 : index
    %c0_15 = arith.constant 0 : index
    %c0_16 = arith.constant 0 : index
    %17 = vector.load %arg2[%c2, %c0_15, %c0_16] : memref<4x12x16xf32, #tpu.memory_space<vmem>>, vector<1x12x16xf32>
    %18 = vector.shape_cast %17 : vector<1x12x16xf32> to vector<12x16xf32>
    %cst_17 = arith.constant dense<0.000000e+00> : vector<272x16xf32>
    %19 = tpu.matmul %16, %18, %cst_17 {dimension_numbers = #tpu.dot_dimension_numbers<[1], [0], [0], [1], [0, 0, 1, 1], [], []>} : vector<272x12xf32>, vector<12x16xf32>, vector<272x16xf32> -> vector<272x16xf32>
    %20 = arith.addf %14, %19 : vector<272x16xf32>
    %c0_18 = arith.constant 0 : index
    %c18 = arith.constant 18 : index
    %c0_19 = arith.constant 0 : index
    %21 = vector.load %arg1[%c0_18, %c18, %c0_19] : memref<1x297x12xf32, #tpu.memory_space<vmem>>, vector<1x272x12xf32>
    %22 = vector.shape_cast %21 : vector<1x272x12xf32> to vector<272x12xf32>
    %c3 = arith.constant 3 : index
    %c0_20 = arith.constant 0 : index
    %c0_21 = arith.constant 0 : index
    %23 = vector.load %arg2[%c3, %c0_20, %c0_21] : memref<4x12x16xf32, #tpu.memory_space<vmem>>, vector<1x12x16xf32>
    %24 = vector.shape_cast %23 : vector<1x12x16xf32> to vector<12x16xf32>
    %cst_22 = arith.constant dense<0.000000e+00> : vector<272x16xf32>
    %25 = tpu.matmul %22, %24, %cst_22 {dimension_numbers = #tpu.dot_dimension_numbers<[1], [0], [0], [1], [0, 0, 1, 1], [], []>} : vector<272x12xf32>, vector<12x16xf32>, vector<272x16xf32> -> vector<272x16xf32>
    %26 = arith.addf %20, %25 : vector<272x16xf32>
    %cst_23 = arith.constant 0.000000e+00 : f32
    %27 = vector.broadcast %cst_23 : f32 to vector<272x16xf32>
    %28 = arith.maximumf %26, %27 : vector<272x16xf32>
    %c0_24 = arith.constant 0 : index
    %c0_25 = arith.constant 0 : index
    %c0_26 = arith.constant 0 : index
    %29 = vector.load %arg4[%c0_24, %c0_25, %c0_26] : memref<1x272x16xf32, #tpu.memory_space<vmem>>, vector<1x272x16xf32>
    %30 = vector.shape_cast %29 : vector<1x272x16xf32> to vector<272x16xf32>
    %31 = vector.shape_cast %28 : vector<272x16xf32> to vector<1x272x16xf32>
    tpu.vector_store %arg4[%c0_24, %c0_25, %c0_26], %31 {strides = array<i32>} : memref<1x272x16xf32, #tpu.memory_space<vmem>>, vector<1x272x16xf32>,
    return
  }
  func.func @transform_0(%arg0: i32) -> (i32, i32, i32) {
    %c0_i32 = arith.constant 0 : i32
    %c0_i32_0 = arith.constant 0 : i32
    %c0_i32_1 = arith.constant 0 : i32
    return %arg0, %c0_i32, %c0_i32_0 : i32, i32, i32
  }
  func.func @transform_1(%arg0: i32) -> (i32, i32, i32) {
    %c0_i32 = arith.constant 0 : i32
    %c0_i32_0 = arith.constant 0 : i32
    %c0_i32_1 = arith.constant 0 : i32
    %c0_i32_2 = arith.constant 0 : i32
    return %c0_i32, %c0_i32_0, %c0_i32_1 : i32, i32, i32
  }
  func.func @transform_2(%arg0: i32) -> (i32, i32) {
    %c0_i32 = arith.constant 0 : i32
    %c0_i32_0 = arith.constant 0 : i32
    %c0_i32_1 = arith.constant 0 : i32
    return %c0_i32, %c0_i32_0 : i32, i32
  }
  func.func @transform_3(%arg0: i32) -> (i32, i32, i32) {
    %c0_i32 = arith.constant 0 : i32
    %c0_i32_0 = arith.constant 0 : i32
    %c0_i32_1 = arith.constant 0 : i32
    return %arg0, %c0_i32, %c0_i32_0 : i32, i32, i32
  }
}

module attributes {stable_mosaic.version = 11 : i64} {
  func.func @_taps_matmul_kernel(%arg0: i32, %arg1: memref<1x89x64xf32, #tpu.memory_space<vmem>>, %arg2: memref<4x64x16xf32, #tpu.memory_space<vmem>>, %arg3: memref<1x16xf32, #tpu.memory_space<vmem>>, %arg4: memref<1x72x16xf32, #tpu.memory_space<vmem>>) attributes {dimension_semantics = [#tpu.dimension_semantics<parallel>], iteration_bounds = array<i64: 2>, scalar_prefetch = 0 : i64, scratch_operands = 0 : i64, tpu.core_type = #tpu.core_type<tc>, window_params = [{transform_indices = @transform_0, window_bounds = array<i64: 1, 89, 64>}, {pipeline_mode = #tpu.pipeline_mode<synchronous>, transform_indices = @transform_1, window_bounds = array<i64: 4, 64, 16>}, {pipeline_mode = #tpu.pipeline_mode<synchronous>, transform_indices = @transform_2, window_bounds = array<i64: 1, 16>}, {transform_indices = @transform_3, window_bounds = array<i64: 1, 72, 16>}]} {
    %c0 = arith.constant 0 : index
    %c0_0 = arith.constant 0 : index
    %0 = vector.load %arg3[%c0, %c0_0] : memref<1x16xf32, #tpu.memory_space<vmem>>, vector<1x16xf32>
    %1 = vector.shape_cast %0 : vector<1x16xf32> to vector<1x16xf32>
    %2 = vector.broadcast %1 : vector<1x16xf32> to vector<72x16xf32>
    %c0_1 = arith.constant 0 : index
    %c0_2 = arith.constant 0 : index
    %c0_3 = arith.constant 0 : index
    %3 = vector.load %arg1[%c0_1, %c0_2, %c0_3] : memref<1x89x64xf32, #tpu.memory_space<vmem>>, vector<1x72x64xf32>
    %4 = vector.shape_cast %3 : vector<1x72x64xf32> to vector<72x64xf32>
    %c0_4 = arith.constant 0 : index
    %c0_5 = arith.constant 0 : index
    %c0_6 = arith.constant 0 : index
    %5 = vector.load %arg2[%c0_4, %c0_5, %c0_6] : memref<4x64x16xf32, #tpu.memory_space<vmem>>, vector<1x64x16xf32>
    %6 = vector.shape_cast %5 : vector<1x64x16xf32> to vector<64x16xf32>
    %cst = arith.constant dense<0.000000e+00> : vector<72x16xf32>
    %7 = tpu.matmul %4, %6, %cst {dimension_numbers = #tpu.dot_dimension_numbers<[1], [0], [0], [1], [0, 0, 1, 1], [], []>} : vector<72x64xf32>, vector<64x16xf32>, vector<72x16xf32> -> vector<72x16xf32>
    %8 = arith.addf %2, %7 : vector<72x16xf32>
    %c0_7 = arith.constant 0 : index
    %c1 = arith.constant 1 : index
    %c0_8 = arith.constant 0 : index
    %9 = vector.load %arg1[%c0_7, %c1, %c0_8] : memref<1x89x64xf32, #tpu.memory_space<vmem>>, vector<1x72x64xf32>
    %10 = vector.shape_cast %9 : vector<1x72x64xf32> to vector<72x64xf32>
    %c1_9 = arith.constant 1 : index
    %c0_10 = arith.constant 0 : index
    %c0_11 = arith.constant 0 : index
    %11 = vector.load %arg2[%c1_9, %c0_10, %c0_11] : memref<4x64x16xf32, #tpu.memory_space<vmem>>, vector<1x64x16xf32>
    %12 = vector.shape_cast %11 : vector<1x64x16xf32> to vector<64x16xf32>
    %cst_12 = arith.constant dense<0.000000e+00> : vector<72x16xf32>
    %13 = tpu.matmul %10, %12, %cst_12 {dimension_numbers = #tpu.dot_dimension_numbers<[1], [0], [0], [1], [0, 0, 1, 1], [], []>} : vector<72x64xf32>, vector<64x16xf32>, vector<72x16xf32> -> vector<72x16xf32>
    %14 = arith.addf %8, %13 : vector<72x16xf32>
    %c0_13 = arith.constant 0 : index
    %c9 = arith.constant 9 : index
    %c0_14 = arith.constant 0 : index
    %15 = vector.load %arg1[%c0_13, %c9, %c0_14] : memref<1x89x64xf32, #tpu.memory_space<vmem>>, vector<1x72x64xf32>
    %16 = vector.shape_cast %15 : vector<1x72x64xf32> to vector<72x64xf32>
    %c2 = arith.constant 2 : index
    %c0_15 = arith.constant 0 : index
    %c0_16 = arith.constant 0 : index
    %17 = vector.load %arg2[%c2, %c0_15, %c0_16] : memref<4x64x16xf32, #tpu.memory_space<vmem>>, vector<1x64x16xf32>
    %18 = vector.shape_cast %17 : vector<1x64x16xf32> to vector<64x16xf32>
    %cst_17 = arith.constant dense<0.000000e+00> : vector<72x16xf32>
    %19 = tpu.matmul %16, %18, %cst_17 {dimension_numbers = #tpu.dot_dimension_numbers<[1], [0], [0], [1], [0, 0, 1, 1], [], []>} : vector<72x64xf32>, vector<64x16xf32>, vector<72x16xf32> -> vector<72x16xf32>
    %20 = arith.addf %14, %19 : vector<72x16xf32>
    %c0_18 = arith.constant 0 : index
    %c10 = arith.constant 10 : index
    %c0_19 = arith.constant 0 : index
    %21 = vector.load %arg1[%c0_18, %c10, %c0_19] : memref<1x89x64xf32, #tpu.memory_space<vmem>>, vector<1x72x64xf32>
    %22 = vector.shape_cast %21 : vector<1x72x64xf32> to vector<72x64xf32>
    %c3 = arith.constant 3 : index
    %c0_20 = arith.constant 0 : index
    %c0_21 = arith.constant 0 : index
    %23 = vector.load %arg2[%c3, %c0_20, %c0_21] : memref<4x64x16xf32, #tpu.memory_space<vmem>>, vector<1x64x16xf32>
    %24 = vector.shape_cast %23 : vector<1x64x16xf32> to vector<64x16xf32>
    %cst_22 = arith.constant dense<0.000000e+00> : vector<72x16xf32>
    %25 = tpu.matmul %22, %24, %cst_22 {dimension_numbers = #tpu.dot_dimension_numbers<[1], [0], [0], [1], [0, 0, 1, 1], [], []>} : vector<72x64xf32>, vector<64x16xf32>, vector<72x16xf32> -> vector<72x16xf32>
    %26 = arith.addf %20, %25 : vector<72x16xf32>
    %cst_23 = arith.constant 0.000000e+00 : f32
    %27 = vector.broadcast %cst_23 : f32 to vector<72x16xf32>
    %28 = arith.maximumf %26, %27 : vector<72x16xf32>
    %c0_24 = arith.constant 0 : index
    %c0_25 = arith.constant 0 : index
    %c0_26 = arith.constant 0 : index
    %29 = vector.load %arg4[%c0_24, %c0_25, %c0_26] : memref<1x72x16xf32, #tpu.memory_space<vmem>>, vector<1x72x16xf32>
    %30 = vector.shape_cast %29 : vector<1x72x16xf32> to vector<72x16xf32>
    %31 = vector.shape_cast %28 : vector<72x16xf32> to vector<1x72x16xf32>
    tpu.vector_store %arg4[%c0_24, %c0_25, %c0_26], %31 {strides = array<i32>} : memref<1x72x16xf32, #tpu.memory_space<vmem>>, vector<1x72x16xf32>,
    return
  }
  func.func @transform_0(%arg0: i32) -> (i32, i32, i32) {
    %c0_i32 = arith.constant 0 : i32
    %c0_i32_0 = arith.constant 0 : i32
    %c0_i32_1 = arith.constant 0 : i32
    return %arg0, %c0_i32, %c0_i32_0 : i32, i32, i32
  }
  func.func @transform_1(%arg0: i32) -> (i32, i32, i32) {
    %c0_i32 = arith.constant 0 : i32
    %c0_i32_0 = arith.constant 0 : i32
    %c0_i32_1 = arith.constant 0 : i32
    %c0_i32_2 = arith.constant 0 : i32
    return %c0_i32, %c0_i32_0, %c0_i32_1 : i32, i32, i32
  }
  func.func @transform_2(%arg0: i32) -> (i32, i32) {
    %c0_i32 = arith.constant 0 : i32
    %c0_i32_0 = arith.constant 0 : i32
    %c0_i32_1 = arith.constant 0 : i32
    return %c0_i32, %c0_i32_0 : i32, i32
  }
  func.func @transform_3(%arg0: i32) -> (i32, i32, i32) {
    %c0_i32 = arith.constant 0 : i32
    %c0_i32_0 = arith.constant 0 : i32
    %c0_i32_1 = arith.constant 0 : i32
    return %arg0, %c0_i32, %c0_i32_0 : i32, i32, i32
  }
}

module attributes {stable_mosaic.version = 11 : i64} {
  func.func @_taps_matmul_kernel(%arg0: i32, %arg1: memref<1x33x64xf32, #tpu.memory_space<vmem>>, %arg2: memref<4x64x4xf32, #tpu.memory_space<vmem>>, %arg3: memref<1x4xf32, #tpu.memory_space<vmem>>, %arg4: memref<1x20x4xf32, #tpu.memory_space<vmem>>) attributes {dimension_semantics = [#tpu.dimension_semantics<parallel>], iteration_bounds = array<i64: 2>, scalar_prefetch = 0 : i64, scratch_operands = 0 : i64, tpu.core_type = #tpu.core_type<tc>, window_params = [{transform_indices = @transform_0, window_bounds = array<i64: 1, 33, 64>}, {pipeline_mode = #tpu.pipeline_mode<synchronous>, transform_indices = @transform_1, window_bounds = array<i64: 4, 64, 4>}, {pipeline_mode = #tpu.pipeline_mode<synchronous>, transform_indices = @transform_2, window_bounds = array<i64: 1, 4>}, {transform_indices = @transform_3, window_bounds = array<i64: 1, 20, 4>}]} {
    %c0 = arith.constant 0 : index
    %c0_0 = arith.constant 0 : index
    %0 = vector.load %arg3[%c0, %c0_0] : memref<1x4xf32, #tpu.memory_space<vmem>>, vector<1x4xf32>
    %1 = vector.shape_cast %0 : vector<1x4xf32> to vector<1x4xf32>
    %2 = vector.broadcast %1 : vector<1x4xf32> to vector<20x4xf32>
    %c0_1 = arith.constant 0 : index
    %c0_2 = arith.constant 0 : index
    %c0_3 = arith.constant 0 : index
    %3 = vector.load %arg1[%c0_1, %c0_2, %c0_3] : memref<1x33x64xf32, #tpu.memory_space<vmem>>, vector<1x20x64xf32>
    %4 = vector.shape_cast %3 : vector<1x20x64xf32> to vector<20x64xf32>
    %c0_4 = arith.constant 0 : index
    %c0_5 = arith.constant 0 : index
    %c0_6 = arith.constant 0 : index
    %5 = vector.load %arg2[%c0_4, %c0_5, %c0_6] : memref<4x64x4xf32, #tpu.memory_space<vmem>>, vector<1x64x4xf32>
    %6 = vector.shape_cast %5 : vector<1x64x4xf32> to vector<64x4xf32>
    %cst = arith.constant dense<0.000000e+00> : vector<20x4xf32>
    %7 = tpu.matmul %4, %6, %cst {dimension_numbers = #tpu.dot_dimension_numbers<[1], [0], [0], [1], [0, 0, 1, 1], [], []>} : vector<20x64xf32>, vector<64x4xf32>, vector<20x4xf32> -> vector<20x4xf32>
    %8 = arith.addf %2, %7 : vector<20x4xf32>
    %c0_7 = arith.constant 0 : index
    %c1 = arith.constant 1 : index
    %c0_8 = arith.constant 0 : index
    %9 = vector.load %arg1[%c0_7, %c1, %c0_8] : memref<1x33x64xf32, #tpu.memory_space<vmem>>, vector<1x20x64xf32>
    %10 = vector.shape_cast %9 : vector<1x20x64xf32> to vector<20x64xf32>
    %c1_9 = arith.constant 1 : index
    %c0_10 = arith.constant 0 : index
    %c0_11 = arith.constant 0 : index
    %11 = vector.load %arg2[%c1_9, %c0_10, %c0_11] : memref<4x64x4xf32, #tpu.memory_space<vmem>>, vector<1x64x4xf32>
    %12 = vector.shape_cast %11 : vector<1x64x4xf32> to vector<64x4xf32>
    %cst_12 = arith.constant dense<0.000000e+00> : vector<20x4xf32>
    %13 = tpu.matmul %10, %12, %cst_12 {dimension_numbers = #tpu.dot_dimension_numbers<[1], [0], [0], [1], [0, 0, 1, 1], [], []>} : vector<20x64xf32>, vector<64x4xf32>, vector<20x4xf32> -> vector<20x4xf32>
    %14 = arith.addf %8, %13 : vector<20x4xf32>
    %c0_13 = arith.constant 0 : index
    %c5 = arith.constant 5 : index
    %c0_14 = arith.constant 0 : index
    %15 = vector.load %arg1[%c0_13, %c5, %c0_14] : memref<1x33x64xf32, #tpu.memory_space<vmem>>, vector<1x20x64xf32>
    %16 = vector.shape_cast %15 : vector<1x20x64xf32> to vector<20x64xf32>
    %c2 = arith.constant 2 : index
    %c0_15 = arith.constant 0 : index
    %c0_16 = arith.constant 0 : index
    %17 = vector.load %arg2[%c2, %c0_15, %c0_16] : memref<4x64x4xf32, #tpu.memory_space<vmem>>, vector<1x64x4xf32>
    %18 = vector.shape_cast %17 : vector<1x64x4xf32> to vector<64x4xf32>
    %cst_17 = arith.constant dense<0.000000e+00> : vector<20x4xf32>
    %19 = tpu.matmul %16, %18, %cst_17 {dimension_numbers = #tpu.dot_dimension_numbers<[1], [0], [0], [1], [0, 0, 1, 1], [], []>} : vector<20x64xf32>, vector<64x4xf32>, vector<20x4xf32> -> vector<20x4xf32>
    %20 = arith.addf %14, %19 : vector<20x4xf32>
    %c0_18 = arith.constant 0 : index
    %c6 = arith.constant 6 : index
    %c0_19 = arith.constant 0 : index
    %21 = vector.load %arg1[%c0_18, %c6, %c0_19] : memref<1x33x64xf32, #tpu.memory_space<vmem>>, vector<1x20x64xf32>
    %22 = vector.shape_cast %21 : vector<1x20x64xf32> to vector<20x64xf32>
    %c3 = arith.constant 3 : index
    %c0_20 = arith.constant 0 : index
    %c0_21 = arith.constant 0 : index
    %23 = vector.load %arg2[%c3, %c0_20, %c0_21] : memref<4x64x4xf32, #tpu.memory_space<vmem>>, vector<1x64x4xf32>
    %24 = vector.shape_cast %23 : vector<1x64x4xf32> to vector<64x4xf32>
    %cst_22 = arith.constant dense<0.000000e+00> : vector<20x4xf32>
    %25 = tpu.matmul %22, %24, %cst_22 {dimension_numbers = #tpu.dot_dimension_numbers<[1], [0], [0], [1], [0, 0, 1, 1], [], []>} : vector<20x64xf32>, vector<64x4xf32>, vector<20x4xf32> -> vector<20x4xf32>
    %26 = arith.addf %20, %25 : vector<20x4xf32>
    %cst_23 = arith.constant 0.000000e+00 : f32
    %27 = vector.broadcast %cst_23 : f32 to vector<20x4xf32>
    %28 = arith.maximumf %26, %27 : vector<20x4xf32>
    %c0_24 = arith.constant 0 : index
    %c0_25 = arith.constant 0 : index
    %c0_26 = arith.constant 0 : index
    %29 = vector.load %arg4[%c0_24, %c0_25, %c0_26] : memref<1x20x4xf32, #tpu.memory_space<vmem>>, vector<1x20x4xf32>
    %30 = vector.shape_cast %29 : vector<1x20x4xf32> to vector<20x4xf32>
    %31 = vector.shape_cast %28 : vector<20x4xf32> to vector<1x20x4xf32>
    tpu.vector_store %arg4[%c0_24, %c0_25, %c0_26], %31 {strides = array<i32>} : memref<1x20x4xf32, #tpu.memory_space<vmem>>, vector<1x20x4xf32>,
    return
  }
  func.func @transform_0(%arg0: i32) -> (i32, i32, i32) {
    %c0_i32 = arith.constant 0 : i32
    %c0_i32_0 = arith.constant 0 : i32
    %c0_i32_1 = arith.constant 0 : i32
    return %arg0, %c0_i32, %c0_i32_0 : i32, i32, i32
  }
  func.func @transform_1(%arg0: i32) -> (i32, i32, i32) {
    %c0_i32 = arith.constant 0 : i32
    %c0_i32_0 = arith.constant 0 : i32
    %c0_i32_1 = arith.constant 0 : i32
    %c0_i32_2 = arith.constant 0 : i32
    return %c0_i32, %c0_i32_0, %c0_i32_1 : i32, i32, i32
  }
  func.func @transform_2(%arg0: i32) -> (i32, i32) {
    %c0_i32 = arith.constant 0 : i32
    %c0_i32_0 = arith.constant 0 : i32
    %c0_i32_1 = arith.constant 0 : i32
    return %c0_i32, %c0_i32_0 : i32, i32
  }
  func.func @transform_3(%arg0: i32) -> (i32, i32, i32) {
    %c0_i32 = arith.constant 0 : i32
    %c0_i32_0 = arith.constant 0 : i32
    %c0_i32_1 = arith.constant 0 : i32
    return %arg0, %c0_i32, %c0_i32_0 : i32, i32, i32
  }
}

module attributes {stable_mosaic.version = 11 : i64} {
  func.func @_taps_matmul_kernel(%arg0: i32, %arg1: memref<1x44x4xf32, #tpu.memory_space<vmem>>, %arg2: memref<9x4x64xf32, #tpu.memory_space<vmem>>, %arg3: memref<1x64xf32, #tpu.memory_space<vmem>>, %arg4: memref<1x24x64xf32, #tpu.memory_space<vmem>>) attributes {dimension_semantics = [#tpu.dimension_semantics<parallel>], iteration_bounds = array<i64: 2>, scalar_prefetch = 0 : i64, scratch_operands = 0 : i64, tpu.core_type = #tpu.core_type<tc>, window_params = [{transform_indices = @transform_0, window_bounds = array<i64: 1, 44, 4>}, {pipeline_mode = #tpu.pipeline_mode<synchronous>, transform_indices = @transform_1, window_bounds = array<i64: 9, 4, 64>}, {pipeline_mode = #tpu.pipeline_mode<synchronous>, transform_indices = @transform_2, window_bounds = array<i64: 1, 64>}, {transform_indices = @transform_3, window_bounds = array<i64: 1, 24, 64>}]} {
    %c0 = arith.constant 0 : index
    %c0_0 = arith.constant 0 : index
    %0 = vector.load %arg3[%c0, %c0_0] : memref<1x64xf32, #tpu.memory_space<vmem>>, vector<1x64xf32>
    %1 = vector.shape_cast %0 : vector<1x64xf32> to vector<1x64xf32>
    %2 = vector.broadcast %1 : vector<1x64xf32> to vector<24x64xf32>
    %c0_1 = arith.constant 0 : index
    %c0_2 = arith.constant 0 : index
    %c0_3 = arith.constant 0 : index
    %3 = vector.load %arg1[%c0_1, %c0_2, %c0_3] : memref<1x44x4xf32, #tpu.memory_space<vmem>>, vector<1x24x4xf32>
    %4 = vector.shape_cast %3 : vector<1x24x4xf32> to vector<24x4xf32>
    %c0_4 = arith.constant 0 : index
    %c0_5 = arith.constant 0 : index
    %c0_6 = arith.constant 0 : index
    %5 = vector.load %arg2[%c0_4, %c0_5, %c0_6] : memref<9x4x64xf32, #tpu.memory_space<vmem>>, vector<1x4x64xf32>
    %6 = vector.shape_cast %5 : vector<1x4x64xf32> to vector<4x64xf32>
    %cst = arith.constant dense<0.000000e+00> : vector<24x64xf32>
    %7 = tpu.matmul %4, %6, %cst {dimension_numbers = #tpu.dot_dimension_numbers<[1], [0], [0], [1], [0, 0, 1, 1], [], []>} : vector<24x4xf32>, vector<4x64xf32>, vector<24x64xf32> -> vector<24x64xf32>
    %8 = arith.addf %2, %7 : vector<24x64xf32>
    %c0_7 = arith.constant 0 : index
    %c1 = arith.constant 1 : index
    %c0_8 = arith.constant 0 : index
    %9 = vector.load %arg1[%c0_7, %c1, %c0_8] : memref<1x44x4xf32, #tpu.memory_space<vmem>>, vector<1x24x4xf32>
    %10 = vector.shape_cast %9 : vector<1x24x4xf32> to vector<24x4xf32>
    %c1_9 = arith.constant 1 : index
    %c0_10 = arith.constant 0 : index
    %c0_11 = arith.constant 0 : index
    %11 = vector.load %arg2[%c1_9, %c0_10, %c0_11] : memref<9x4x64xf32, #tpu.memory_space<vmem>>, vector<1x4x64xf32>
    %12 = vector.shape_cast %11 : vector<1x4x64xf32> to vector<4x64xf32>
    %cst_12 = arith.constant dense<0.000000e+00> : vector<24x64xf32>
    %13 = tpu.matmul %10, %12, %cst_12 {dimension_numbers = #tpu.dot_dimension_numbers<[1], [0], [0], [1], [0, 0, 1, 1], [], []>} : vector<24x4xf32>, vector<4x64xf32>, vector<24x64xf32> -> vector<24x64xf32>
    %14 = arith.addf %8, %13 : vector<24x64xf32>
    %c0_13 = arith.constant 0 : index
    %c2 = arith.constant 2 : index
    %c0_14 = arith.constant 0 : index
    %15 = vector.load %arg1[%c0_13, %c2, %c0_14] : memref<1x44x4xf32, #tpu.memory_space<vmem>>, vector<1x24x4xf32>
    %16 = vector.shape_cast %15 : vector<1x24x4xf32> to vector<24x4xf32>
    %c2_15 = arith.constant 2 : index
    %c0_16 = arith.constant 0 : index
    %c0_17 = arith.constant 0 : index
    %17 = vector.load %arg2[%c2_15, %c0_16, %c0_17] : memref<9x4x64xf32, #tpu.memory_space<vmem>>, vector<1x4x64xf32>
    %18 = vector.shape_cast %17 : vector<1x4x64xf32> to vector<4x64xf32>
    %cst_18 = arith.constant dense<0.000000e+00> : vector<24x64xf32>
    %19 = tpu.matmul %16, %18, %cst_18 {dimension_numbers = #tpu.dot_dimension_numbers<[1], [0], [0], [1], [0, 0, 1, 1], [], []>} : vector<24x4xf32>, vector<4x64xf32>, vector<24x64xf32> -> vector<24x64xf32>
    %20 = arith.addf %14, %19 : vector<24x64xf32>
    %c0_19 = arith.constant 0 : index
    %c6 = arith.constant 6 : index
    %c0_20 = arith.constant 0 : index
    %21 = vector.load %arg1[%c0_19, %c6, %c0_20] : memref<1x44x4xf32, #tpu.memory_space<vmem>>, vector<1x24x4xf32>
    %22 = vector.shape_cast %21 : vector<1x24x4xf32> to vector<24x4xf32>
    %c3 = arith.constant 3 : index
    %c0_21 = arith.constant 0 : index
    %c0_22 = arith.constant 0 : index
    %23 = vector.load %arg2[%c3, %c0_21, %c0_22] : memref<9x4x64xf32, #tpu.memory_space<vmem>>, vector<1x4x64xf32>
    %24 = vector.shape_cast %23 : vector<1x4x64xf32> to vector<4x64xf32>
    %cst_23 = arith.constant dense<0.000000e+00> : vector<24x64xf32>
    %25 = tpu.matmul %22, %24, %cst_23 {dimension_numbers = #tpu.dot_dimension_numbers<[1], [0], [0], [1], [0, 0, 1, 1], [], []>} : vector<24x4xf32>, vector<4x64xf32>, vector<24x64xf32> -> vector<24x64xf32>
    %26 = arith.addf %20, %25 : vector<24x64xf32>
    %c0_24 = arith.constant 0 : index
    %c7 = arith.constant 7 : index
    %c0_25 = arith.constant 0 : index
    %27 = vector.load %arg1[%c0_24, %c7, %c0_25] : memref<1x44x4xf32, #tpu.memory_space<vmem>>, vector<1x24x4xf32>
    %28 = vector.shape_cast %27 : vector<1x24x4xf32> to vector<24x4xf32>
    %c4 = arith.constant 4 : index
    %c0_26 = arith.constant 0 : index
    %c0_27 = arith.constant 0 : index
    %29 = vector.load %arg2[%c4, %c0_26, %c0_27] : memref<9x4x64xf32, #tpu.memory_space<vmem>>, vector<1x4x64xf32>
    %30 = vector.shape_cast %29 : vector<1x4x64xf32> to vector<4x64xf32>
    %cst_28 = arith.constant dense<0.000000e+00> : vector<24x64xf32>
    %31 = tpu.matmul %28, %30, %cst_28 {dimension_numbers = #tpu.dot_dimension_numbers<[1], [0], [0], [1], [0, 0, 1, 1], [], []>} : vector<24x4xf32>, vector<4x64xf32>, vector<24x64xf32> -> vector<24x64xf32>
    %32 = arith.addf %26, %31 : vector<24x64xf32>
    %c0_29 = arith.constant 0 : index
    %c8 = arith.constant 8 : index
    %c0_30 = arith.constant 0 : index
    %33 = vector.load %arg1[%c0_29, %c8, %c0_30] : memref<1x44x4xf32, #tpu.memory_space<vmem>>, vector<1x24x4xf32>
    %34 = vector.shape_cast %33 : vector<1x24x4xf32> to vector<24x4xf32>
    %c5 = arith.constant 5 : index
    %c0_31 = arith.constant 0 : index
    %c0_32 = arith.constant 0 : index
    %35 = vector.load %arg2[%c5, %c0_31, %c0_32] : memref<9x4x64xf32, #tpu.memory_space<vmem>>, vector<1x4x64xf32>
    %36 = vector.shape_cast %35 : vector<1x4x64xf32> to vector<4x64xf32>
    %cst_33 = arith.constant dense<0.000000e+00> : vector<24x64xf32>
    %37 = tpu.matmul %34, %36, %cst_33 {dimension_numbers = #tpu.dot_dimension_numbers<[1], [0], [0], [1], [0, 0, 1, 1], [], []>} : vector<24x4xf32>, vector<4x64xf32>, vector<24x64xf32> -> vector<24x64xf32>
    %38 = arith.addf %32, %37 : vector<24x64xf32>
    %c0_34 = arith.constant 0 : index
    %c12 = arith.constant 12 : index
    %c0_35 = arith.constant 0 : index
    %39 = vector.load %arg1[%c0_34, %c12, %c0_35] : memref<1x44x4xf32, #tpu.memory_space<vmem>>, vector<1x24x4xf32>
    %40 = vector.shape_cast %39 : vector<1x24x4xf32> to vector<24x4xf32>
    %c6_36 = arith.constant 6 : index
    %c0_37 = arith.constant 0 : index
    %c0_38 = arith.constant 0 : index
    %41 = vector.load %arg2[%c6_36, %c0_37, %c0_38] : memref<9x4x64xf32, #tpu.memory_space<vmem>>, vector<1x4x64xf32>
    %42 = vector.shape_cast %41 : vector<1x4x64xf32> to vector<4x64xf32>
    %cst_39 = arith.constant dense<0.000000e+00> : vector<24x64xf32>
    %43 = tpu.matmul %40, %42, %cst_39 {dimension_numbers = #tpu.dot_dimension_numbers<[1], [0], [0], [1], [0, 0, 1, 1], [], []>} : vector<24x4xf32>, vector<4x64xf32>, vector<24x64xf32> -> vector<24x64xf32>
    %44 = arith.addf %38, %43 : vector<24x64xf32>
    %c0_40 = arith.constant 0 : index
    %c13 = arith.constant 13 : index
    %c0_41 = arith.constant 0 : index
    %45 = vector.load %arg1[%c0_40, %c13, %c0_41] : memref<1x44x4xf32, #tpu.memory_space<vmem>>, vector<1x24x4xf32>
    %46 = vector.shape_cast %45 : vector<1x24x4xf32> to vector<24x4xf32>
    %c7_42 = arith.constant 7 : index
    %c0_43 = arith.constant 0 : index
    %c0_44 = arith.constant 0 : index
    %47 = vector.load %arg2[%c7_42, %c0_43, %c0_44] : memref<9x4x64xf32, #tpu.memory_space<vmem>>, vector<1x4x64xf32>
    %48 = vector.shape_cast %47 : vector<1x4x64xf32> to vector<4x64xf32>
    %cst_45 = arith.constant dense<0.000000e+00> : vector<24x64xf32>
    %49 = tpu.matmul %46, %48, %cst_45 {dimension_numbers = #tpu.dot_dimension_numbers<[1], [0], [0], [1], [0, 0, 1, 1], [], []>} : vector<24x4xf32>, vector<4x64xf32>, vector<24x64xf32> -> vector<24x64xf32>
    %50 = arith.addf %44, %49 : vector<24x64xf32>
    %c0_46 = arith.constant 0 : index
    %c14 = arith.constant 14 : index
    %c0_47 = arith.constant 0 : index
    %51 = vector.load %arg1[%c0_46, %c14, %c0_47] : memref<1x44x4xf32, #tpu.memory_space<vmem>>, vector<1x24x4xf32>
    %52 = vector.shape_cast %51 : vector<1x24x4xf32> to vector<24x4xf32>
    %c8_48 = arith.constant 8 : index
    %c0_49 = arith.constant 0 : index
    %c0_50 = arith.constant 0 : index
    %53 = vector.load %arg2[%c8_48, %c0_49, %c0_50] : memref<9x4x64xf32, #tpu.memory_space<vmem>>, vector<1x4x64xf32>
    %54 = vector.shape_cast %53 : vector<1x4x64xf32> to vector<4x64xf32>
    %cst_51 = arith.constant dense<0.000000e+00> : vector<24x64xf32>
    %55 = tpu.matmul %52, %54, %cst_51 {dimension_numbers = #tpu.dot_dimension_numbers<[1], [0], [0], [1], [0, 0, 1, 1], [], []>} : vector<24x4xf32>, vector<4x64xf32>, vector<24x64xf32> -> vector<24x64xf32>
    %56 = arith.addf %50, %55 : vector<24x64xf32>
    %cst_52 = arith.constant 0.000000e+00 : f32
    %57 = vector.broadcast %cst_52 : f32 to vector<24x64xf32>
    %58 = arith.maximumf %56, %57 : vector<24x64xf32>
    %c0_53 = arith.constant 0 : index
    %c0_54 = arith.constant 0 : index
    %c0_55 = arith.constant 0 : index
    %59 = vector.load %arg4[%c0_53, %c0_54, %c0_55] : memref<1x24x64xf32, #tpu.memory_space<vmem>>, vector<1x24x64xf32>
    %60 = vector.shape_cast %59 : vector<1x24x64xf32> to vector<24x64xf32>
    %61 = vector.shape_cast %58 : vector<24x64xf32> to vector<1x24x64xf32>
    tpu.vector_store %arg4[%c0_53, %c0_54, %c0_55], %61 {strides = array<i32>} : memref<1x24x64xf32, #tpu.memory_space<vmem>>, vector<1x24x64xf32>,
    return
  }
  func.func @transform_0(%arg0: i32) -> (i32, i32, i32) {
    %c0_i32 = arith.constant 0 : i32
    %c0_i32_0 = arith.constant 0 : i32
    %c0_i32_1 = arith.constant 0 : i32
    return %arg0, %c0_i32, %c0_i32_0 : i32, i32, i32
  }
  func.func @transform_1(%arg0: i32) -> (i32, i32, i32) {
    %c0_i32 = arith.constant 0 : i32
    %c0_i32_0 = arith.constant 0 : i32
    %c0_i32_1 = arith.constant 0 : i32
    %c0_i32_2 = arith.constant 0 : i32
    return %c0_i32, %c0_i32_0, %c0_i32_1 : i32, i32, i32
  }
  func.func @transform_2(%arg0: i32) -> (i32, i32) {
    %c0_i32 = arith.constant 0 : i32
    %c0_i32_0 = arith.constant 0 : i32
    %c0_i32_1 = arith.constant 0 : i32
    return %c0_i32, %c0_i32_0 : i32, i32
  }
  func.func @transform_3(%arg0: i32) -> (i32, i32, i32) {
    %c0_i32 = arith.constant 0 : i32
    %c0_i32_0 = arith.constant 0 : i32
    %c0_i32_1 = arith.constant 0 : i32
    return %arg0, %c0_i32, %c0_i32_0 : i32, i32, i32
  }
}

module attributes {stable_mosaic.version = 11 : i64} {
  func.func @_taps_matmul_kernel(%arg0: i32, %arg1: memref<1x108x16xf32, #tpu.memory_space<vmem>>, %arg2: memref<9x16x64xf32, #tpu.memory_space<vmem>>, %arg3: memref<1x64xf32, #tpu.memory_space<vmem>>, %arg4: memref<1x80x64xf32, #tpu.memory_space<vmem>>) attributes {dimension_semantics = [#tpu.dimension_semantics<parallel>], iteration_bounds = array<i64: 2>, scalar_prefetch = 0 : i64, scratch_operands = 0 : i64, tpu.core_type = #tpu.core_type<tc>, window_params = [{transform_indices = @transform_0, window_bounds = array<i64: 1, 108, 16>}, {pipeline_mode = #tpu.pipeline_mode<synchronous>, transform_indices = @transform_1, window_bounds = array<i64: 9, 16, 64>}, {pipeline_mode = #tpu.pipeline_mode<synchronous>, transform_indices = @transform_2, window_bounds = array<i64: 1, 64>}, {transform_indices = @transform_3, window_bounds = array<i64: 1, 80, 64>}]} {
    %c0 = arith.constant 0 : index
    %c0_0 = arith.constant 0 : index
    %0 = vector.load %arg3[%c0, %c0_0] : memref<1x64xf32, #tpu.memory_space<vmem>>, vector<1x64xf32>
    %1 = vector.shape_cast %0 : vector<1x64xf32> to vector<1x64xf32>
    %2 = vector.broadcast %1 : vector<1x64xf32> to vector<80x64xf32>
    %c0_1 = arith.constant 0 : index
    %c0_2 = arith.constant 0 : index
    %c0_3 = arith.constant 0 : index
    %3 = vector.load %arg1[%c0_1, %c0_2, %c0_3] : memref<1x108x16xf32, #tpu.memory_space<vmem>>, vector<1x80x16xf32>
    %4 = vector.shape_cast %3 : vector<1x80x16xf32> to vector<80x16xf32>
    %c0_4 = arith.constant 0 : index
    %c0_5 = arith.constant 0 : index
    %c0_6 = arith.constant 0 : index
    %5 = vector.load %arg2[%c0_4, %c0_5, %c0_6] : memref<9x16x64xf32, #tpu.memory_space<vmem>>, vector<1x16x64xf32>
    %6 = vector.shape_cast %5 : vector<1x16x64xf32> to vector<16x64xf32>
    %cst = arith.constant dense<0.000000e+00> : vector<80x64xf32>
    %7 = tpu.matmul %4, %6, %cst {dimension_numbers = #tpu.dot_dimension_numbers<[1], [0], [0], [1], [0, 0, 1, 1], [], []>} : vector<80x16xf32>, vector<16x64xf32>, vector<80x64xf32> -> vector<80x64xf32>
    %8 = arith.addf %2, %7 : vector<80x64xf32>
    %c0_7 = arith.constant 0 : index
    %c1 = arith.constant 1 : index
    %c0_8 = arith.constant 0 : index
    %9 = vector.load %arg1[%c0_7, %c1, %c0_8] : memref<1x108x16xf32, #tpu.memory_space<vmem>>, vector<1x80x16xf32>
    %10 = vector.shape_cast %9 : vector<1x80x16xf32> to vector<80x16xf32>
    %c1_9 = arith.constant 1 : index
    %c0_10 = arith.constant 0 : index
    %c0_11 = arith.constant 0 : index
    %11 = vector.load %arg2[%c1_9, %c0_10, %c0_11] : memref<9x16x64xf32, #tpu.memory_space<vmem>>, vector<1x16x64xf32>
    %12 = vector.shape_cast %11 : vector<1x16x64xf32> to vector<16x64xf32>
    %cst_12 = arith.constant dense<0.000000e+00> : vector<80x64xf32>
    %13 = tpu.matmul %10, %12, %cst_12 {dimension_numbers = #tpu.dot_dimension_numbers<[1], [0], [0], [1], [0, 0, 1, 1], [], []>} : vector<80x16xf32>, vector<16x64xf32>, vector<80x64xf32> -> vector<80x64xf32>
    %14 = arith.addf %8, %13 : vector<80x64xf32>
    %c0_13 = arith.constant 0 : index
    %c2 = arith.constant 2 : index
    %c0_14 = arith.constant 0 : index
    %15 = vector.load %arg1[%c0_13, %c2, %c0_14] : memref<1x108x16xf32, #tpu.memory_space<vmem>>, vector<1x80x16xf32>
    %16 = vector.shape_cast %15 : vector<1x80x16xf32> to vector<80x16xf32>
    %c2_15 = arith.constant 2 : index
    %c0_16 = arith.constant 0 : index
    %c0_17 = arith.constant 0 : index
    %17 = vector.load %arg2[%c2_15, %c0_16, %c0_17] : memref<9x16x64xf32, #tpu.memory_space<vmem>>, vector<1x16x64xf32>
    %18 = vector.shape_cast %17 : vector<1x16x64xf32> to vector<16x64xf32>
    %cst_18 = arith.constant dense<0.000000e+00> : vector<80x64xf32>
    %19 = tpu.matmul %16, %18, %cst_18 {dimension_numbers = #tpu.dot_dimension_numbers<[1], [0], [0], [1], [0, 0, 1, 1], [], []>} : vector<80x16xf32>, vector<16x64xf32>, vector<80x64xf32> -> vector<80x64xf32>
    %20 = arith.addf %14, %19 : vector<80x64xf32>
    %c0_19 = arith.constant 0 : index
    %c10 = arith.constant 10 : index
    %c0_20 = arith.constant 0 : index
    %21 = vector.load %arg1[%c0_19, %c10, %c0_20] : memref<1x108x16xf32, #tpu.memory_space<vmem>>, vector<1x80x16xf32>
    %22 = vector.shape_cast %21 : vector<1x80x16xf32> to vector<80x16xf32>
    %c3 = arith.constant 3 : index
    %c0_21 = arith.constant 0 : index
    %c0_22 = arith.constant 0 : index
    %23 = vector.load %arg2[%c3, %c0_21, %c0_22] : memref<9x16x64xf32, #tpu.memory_space<vmem>>, vector<1x16x64xf32>
    %24 = vector.shape_cast %23 : vector<1x16x64xf32> to vector<16x64xf32>
    %cst_23 = arith.constant dense<0.000000e+00> : vector<80x64xf32>
    %25 = tpu.matmul %22, %24, %cst_23 {dimension_numbers = #tpu.dot_dimension_numbers<[1], [0], [0], [1], [0, 0, 1, 1], [], []>} : vector<80x16xf32>, vector<16x64xf32>, vector<80x64xf32> -> vector<80x64xf32>
    %26 = arith.addf %20, %25 : vector<80x64xf32>
    %c0_24 = arith.constant 0 : index
    %c11 = arith.constant 11 : index
    %c0_25 = arith.constant 0 : index
    %27 = vector.load %arg1[%c0_24, %c11, %c0_25] : memref<1x108x16xf32, #tpu.memory_space<vmem>>, vector<1x80x16xf32>
    %28 = vector.shape_cast %27 : vector<1x80x16xf32> to vector<80x16xf32>
    %c4 = arith.constant 4 : index
    %c0_26 = arith.constant 0 : index
    %c0_27 = arith.constant 0 : index
    %29 = vector.load %arg2[%c4, %c0_26, %c0_27] : memref<9x16x64xf32, #tpu.memory_space<vmem>>, vector<1x16x64xf32>
    %30 = vector.shape_cast %29 : vector<1x16x64xf32> to vector<16x64xf32>
    %cst_28 = arith.constant dense<0.000000e+00> : vector<80x64xf32>
    %31 = tpu.matmul %28, %30, %cst_28 {dimension_numbers = #tpu.dot_dimension_numbers<[1], [0], [0], [1], [0, 0, 1, 1], [], []>} : vector<80x16xf32>, vector<16x64xf32>, vector<80x64xf32> -> vector<80x64xf32>
    %32 = arith.addf %26, %31 : vector<80x64xf32>
    %c0_29 = arith.constant 0 : index
    %c12 = arith.constant 12 : index
    %c0_30 = arith.constant 0 : index
    %33 = vector.load %arg1[%c0_29, %c12, %c0_30] : memref<1x108x16xf32, #tpu.memory_space<vmem>>, vector<1x80x16xf32>
    %34 = vector.shape_cast %33 : vector<1x80x16xf32> to vector<80x16xf32>
    %c5 = arith.constant 5 : index
    %c0_31 = arith.constant 0 : index
    %c0_32 = arith.constant 0 : index
    %35 = vector.load %arg2[%c5, %c0_31, %c0_32] : memref<9x16x64xf32, #tpu.memory_space<vmem>>, vector<1x16x64xf32>
    %36 = vector.shape_cast %35 : vector<1x16x64xf32> to vector<16x64xf32>
    %cst_33 = arith.constant dense<0.000000e+00> : vector<80x64xf32>
    %37 = tpu.matmul %34, %36, %cst_33 {dimension_numbers = #tpu.dot_dimension_numbers<[1], [0], [0], [1], [0, 0, 1, 1], [], []>} : vector<80x16xf32>, vector<16x64xf32>, vector<80x64xf32> -> vector<80x64xf32>
    %38 = arith.addf %32, %37 : vector<80x64xf32>
    %c0_34 = arith.constant 0 : index
    %c20 = arith.constant 20 : index
    %c0_35 = arith.constant 0 : index
    %39 = vector.load %arg1[%c0_34, %c20, %c0_35] : memref<1x108x16xf32, #tpu.memory_space<vmem>>, vector<1x80x16xf32>
    %40 = vector.shape_cast %39 : vector<1x80x16xf32> to vector<80x16xf32>
    %c6 = arith.constant 6 : index
    %c0_36 = arith.constant 0 : index
    %c0_37 = arith.constant 0 : index
    %41 = vector.load %arg2[%c6, %c0_36, %c0_37] : memref<9x16x64xf32, #tpu.memory_space<vmem>>, vector<1x16x64xf32>
    %42 = vector.shape_cast %41 : vector<1x16x64xf32> to vector<16x64xf32>
    %cst_38 = arith.constant dense<0.000000e+00> : vector<80x64xf32>
    %43 = tpu.matmul %40, %42, %cst_38 {dimension_numbers = #tpu.dot_dimension_numbers<[1], [0], [0], [1], [0, 0, 1, 1], [], []>} : vector<80x16xf32>, vector<16x64xf32>, vector<80x64xf32> -> vector<80x64xf32>
    %44 = arith.addf %38, %43 : vector<80x64xf32>
    %c0_39 = arith.constant 0 : index
    %c21 = arith.constant 21 : index
    %c0_40 = arith.constant 0 : index
    %45 = vector.load %arg1[%c0_39, %c21, %c0_40] : memref<1x108x16xf32, #tpu.memory_space<vmem>>, vector<1x80x16xf32>
    %46 = vector.shape_cast %45 : vector<1x80x16xf32> to vector<80x16xf32>
    %c7 = arith.constant 7 : index
    %c0_41 = arith.constant 0 : index
    %c0_42 = arith.constant 0 : index
    %47 = vector.load %arg2[%c7, %c0_41, %c0_42] : memref<9x16x64xf32, #tpu.memory_space<vmem>>, vector<1x16x64xf32>
    %48 = vector.shape_cast %47 : vector<1x16x64xf32> to vector<16x64xf32>
    %cst_43 = arith.constant dense<0.000000e+00> : vector<80x64xf32>
    %49 = tpu.matmul %46, %48, %cst_43 {dimension_numbers = #tpu.dot_dimension_numbers<[1], [0], [0], [1], [0, 0, 1, 1], [], []>} : vector<80x16xf32>, vector<16x64xf32>, vector<80x64xf32> -> vector<80x64xf32>
    %50 = arith.addf %44, %49 : vector<80x64xf32>
    %c0_44 = arith.constant 0 : index
    %c22 = arith.constant 22 : index
    %c0_45 = arith.constant 0 : index
    %51 = vector.load %arg1[%c0_44, %c22, %c0_45] : memref<1x108x16xf32, #tpu.memory_space<vmem>>, vector<1x80x16xf32>
    %52 = vector.shape_cast %51 : vector<1x80x16xf32> to vector<80x16xf32>
    %c8 = arith.constant 8 : index
    %c0_46 = arith.constant 0 : index
    %c0_47 = arith.constant 0 : index
    %53 = vector.load %arg2[%c8, %c0_46, %c0_47] : memref<9x16x64xf32, #tpu.memory_space<vmem>>, vector<1x16x64xf32>
    %54 = vector.shape_cast %53 : vector<1x16x64xf32> to vector<16x64xf32>
    %cst_48 = arith.constant dense<0.000000e+00> : vector<80x64xf32>
    %55 = tpu.matmul %52, %54, %cst_48 {dimension_numbers = #tpu.dot_dimension_numbers<[1], [0], [0], [1], [0, 0, 1, 1], [], []>} : vector<80x16xf32>, vector<16x64xf32>, vector<80x64xf32> -> vector<80x64xf32>
    %56 = arith.addf %50, %55 : vector<80x64xf32>
    %cst_49 = arith.constant 0.000000e+00 : f32
    %57 = vector.broadcast %cst_49 : f32 to vector<80x64xf32>
    %58 = arith.maximumf %56, %57 : vector<80x64xf32>
    %c0_50 = arith.constant 0 : index
    %c0_51 = arith.constant 0 : index
    %c0_52 = arith.constant 0 : index
    %59 = vector.load %arg4[%c0_50, %c0_51, %c0_52] : memref<1x80x64xf32, #tpu.memory_space<vmem>>, vector<1x80x64xf32>
    %60 = vector.shape_cast %59 : vector<1x80x64xf32> to vector<80x64xf32>
    %61 = vector.shape_cast %58 : vector<80x64xf32> to vector<1x80x64xf32>
    tpu.vector_store %arg4[%c0_50, %c0_51, %c0_52], %61 {strides = array<i32>} : memref<1x80x64xf32, #tpu.memory_space<vmem>>, vector<1x80x64xf32>,
    return
  }
  func.func @transform_0(%arg0: i32) -> (i32, i32, i32) {
    %c0_i32 = arith.constant 0 : i32
    %c0_i32_0 = arith.constant 0 : i32
    %c0_i32_1 = arith.constant 0 : i32
    return %arg0, %c0_i32, %c0_i32_0 : i32, i32, i32
  }
  func.func @transform_1(%arg0: i32) -> (i32, i32, i32) {
    %c0_i32 = arith.constant 0 : i32
    %c0_i32_0 = arith.constant 0 : i32
    %c0_i32_1 = arith.constant 0 : i32
    %c0_i32_2 = arith.constant 0 : i32
    return %c0_i32, %c0_i32_0, %c0_i32_1 : i32, i32, i32
  }
  func.func @transform_2(%arg0: i32) -> (i32, i32) {
    %c0_i32 = arith.constant 0 : i32
    %c0_i32_0 = arith.constant 0 : i32
    %c0_i32_1 = arith.constant 0 : i32
    return %c0_i32, %c0_i32_0 : i32, i32
  }
  func.func @transform_3(%arg0: i32) -> (i32, i32, i32) {
    %c0_i32 = arith.constant 0 : i32
    %c0_i32_0 = arith.constant 0 : i32
    %c0_i32_1 = arith.constant 0 : i32
    return %arg0, %c0_i32, %c0_i32_0 : i32, i32, i32
  }
}

module attributes {stable_mosaic.version = 11 : i64} {
  func.func @_taps_matmul_kernel(%arg0: i32, %arg1: memref<1x332x16xf32, #tpu.memory_space<vmem>>, %arg2: memref<9x16x12xf32, #tpu.memory_space<vmem>>, %arg3: memref<1x12xf32, #tpu.memory_space<vmem>>, %arg4: memref<1x288x12xf32, #tpu.memory_space<vmem>>) attributes {dimension_semantics = [#tpu.dimension_semantics<parallel>], iteration_bounds = array<i64: 2>, scalar_prefetch = 0 : i64, scratch_operands = 0 : i64, tpu.core_type = #tpu.core_type<tc>, window_params = [{transform_indices = @transform_0, window_bounds = array<i64: 1, 332, 16>}, {pipeline_mode = #tpu.pipeline_mode<synchronous>, transform_indices = @transform_1, window_bounds = array<i64: 9, 16, 12>}, {pipeline_mode = #tpu.pipeline_mode<synchronous>, transform_indices = @transform_2, window_bounds = array<i64: 1, 12>}, {transform_indices = @transform_3, window_bounds = array<i64: 1, 288, 12>}]} {
    %c0 = arith.constant 0 : index
    %c0_0 = arith.constant 0 : index
    %0 = vector.load %arg3[%c0, %c0_0] : memref<1x12xf32, #tpu.memory_space<vmem>>, vector<1x12xf32>
    %1 = vector.shape_cast %0 : vector<1x12xf32> to vector<1x12xf32>
    %2 = vector.broadcast %1 : vector<1x12xf32> to vector<288x12xf32>
    %c0_1 = arith.constant 0 : index
    %c0_2 = arith.constant 0 : index
    %c0_3 = arith.constant 0 : index
    %3 = vector.load %arg1[%c0_1, %c0_2, %c0_3] : memref<1x332x16xf32, #tpu.memory_space<vmem>>, vector<1x288x16xf32>
    %4 = vector.shape_cast %3 : vector<1x288x16xf32> to vector<288x16xf32>
    %c0_4 = arith.constant 0 : index
    %c0_5 = arith.constant 0 : index
    %c0_6 = arith.constant 0 : index
    %5 = vector.load %arg2[%c0_4, %c0_5, %c0_6] : memref<9x16x12xf32, #tpu.memory_space<vmem>>, vector<1x16x12xf32>
    %6 = vector.shape_cast %5 : vector<1x16x12xf32> to vector<16x12xf32>
    %cst = arith.constant dense<0.000000e+00> : vector<288x12xf32>
    %7 = tpu.matmul %4, %6, %cst {dimension_numbers = #tpu.dot_dimension_numbers<[1], [0], [0], [1], [0, 0, 1, 1], [], []>} : vector<288x16xf32>, vector<16x12xf32>, vector<288x12xf32> -> vector<288x12xf32>
    %8 = arith.addf %2, %7 : vector<288x12xf32>
    %c0_7 = arith.constant 0 : index
    %c1 = arith.constant 1 : index
    %c0_8 = arith.constant 0 : index
    %9 = vector.load %arg1[%c0_7, %c1, %c0_8] : memref<1x332x16xf32, #tpu.memory_space<vmem>>, vector<1x288x16xf32>
    %10 = vector.shape_cast %9 : vector<1x288x16xf32> to vector<288x16xf32>
    %c1_9 = arith.constant 1 : index
    %c0_10 = arith.constant 0 : index
    %c0_11 = arith.constant 0 : index
    %11 = vector.load %arg2[%c1_9, %c0_10, %c0_11] : memref<9x16x12xf32, #tpu.memory_space<vmem>>, vector<1x16x12xf32>
    %12 = vector.shape_cast %11 : vector<1x16x12xf32> to vector<16x12xf32>
    %cst_12 = arith.constant dense<0.000000e+00> : vector<288x12xf32>
    %13 = tpu.matmul %10, %12, %cst_12 {dimension_numbers = #tpu.dot_dimension_numbers<[1], [0], [0], [1], [0, 0, 1, 1], [], []>} : vector<288x16xf32>, vector<16x12xf32>, vector<288x12xf32> -> vector<288x12xf32>
    %14 = arith.addf %8, %13 : vector<288x12xf32>
    %c0_13 = arith.constant 0 : index
    %c2 = arith.constant 2 : index
    %c0_14 = arith.constant 0 : index
    %15 = vector.load %arg1[%c0_13, %c2, %c0_14] : memref<1x332x16xf32, #tpu.memory_space<vmem>>, vector<1x288x16xf32>
    %16 = vector.shape_cast %15 : vector<1x288x16xf32> to vector<288x16xf32>
    %c2_15 = arith.constant 2 : index
    %c0_16 = arith.constant 0 : index
    %c0_17 = arith.constant 0 : index
    %17 = vector.load %arg2[%c2_15, %c0_16, %c0_17] : memref<9x16x12xf32, #tpu.memory_space<vmem>>, vector<1x16x12xf32>
    %18 = vector.shape_cast %17 : vector<1x16x12xf32> to vector<16x12xf32>
    %cst_18 = arith.constant dense<0.000000e+00> : vector<288x12xf32>
    %19 = tpu.matmul %16, %18, %cst_18 {dimension_numbers = #tpu.dot_dimension_numbers<[1], [0], [0], [1], [0, 0, 1, 1], [], []>} : vector<288x16xf32>, vector<16x12xf32>, vector<288x12xf32> -> vector<288x12xf32>
    %20 = arith.addf %14, %19 : vector<288x12xf32>
    %c0_19 = arith.constant 0 : index
    %c18 = arith.constant 18 : index
    %c0_20 = arith.constant 0 : index
    %21 = vector.load %arg1[%c0_19, %c18, %c0_20] : memref<1x332x16xf32, #tpu.memory_space<vmem>>, vector<1x288x16xf32>
    %22 = vector.shape_cast %21 : vector<1x288x16xf32> to vector<288x16xf32>
    %c3 = arith.constant 3 : index
    %c0_21 = arith.constant 0 : index
    %c0_22 = arith.constant 0 : index
    %23 = vector.load %arg2[%c3, %c0_21, %c0_22] : memref<9x16x12xf32, #tpu.memory_space<vmem>>, vector<1x16x12xf32>
    %24 = vector.shape_cast %23 : vector<1x16x12xf32> to vector<16x12xf32>
    %cst_23 = arith.constant dense<0.000000e+00> : vector<288x12xf32>
    %25 = tpu.matmul %22, %24, %cst_23 {dimension_numbers = #tpu.dot_dimension_numbers<[1], [0], [0], [1], [0, 0, 1, 1], [], []>} : vector<288x16xf32>, vector<16x12xf32>, vector<288x12xf32> -> vector<288x12xf32>
    %26 = arith.addf %20, %25 : vector<288x12xf32>
    %c0_24 = arith.constant 0 : index
    %c19 = arith.constant 19 : index
    %c0_25 = arith.constant 0 : index
    %27 = vector.load %arg1[%c0_24, %c19, %c0_25] : memref<1x332x16xf32, #tpu.memory_space<vmem>>, vector<1x288x16xf32>
    %28 = vector.shape_cast %27 : vector<1x288x16xf32> to vector<288x16xf32>
    %c4 = arith.constant 4 : index
    %c0_26 = arith.constant 0 : index
    %c0_27 = arith.constant 0 : index
    %29 = vector.load %arg2[%c4, %c0_26, %c0_27] : memref<9x16x12xf32, #tpu.memory_space<vmem>>, vector<1x16x12xf32>
    %30 = vector.shape_cast %29 : vector<1x16x12xf32> to vector<16x12xf32>
    %cst_28 = arith.constant dense<0.000000e+00> : vector<288x12xf32>
    %31 = tpu.matmul %28, %30, %cst_28 {dimension_numbers = #tpu.dot_dimension_numbers<[1], [0], [0], [1], [0, 0, 1, 1], [], []>} : vector<288x16xf32>, vector<16x12xf32>, vector<288x12xf32> -> vector<288x12xf32>
    %32 = arith.addf %26, %31 : vector<288x12xf32>
    %c0_29 = arith.constant 0 : index
    %c20 = arith.constant 20 : index
    %c0_30 = arith.constant 0 : index
    %33 = vector.load %arg1[%c0_29, %c20, %c0_30] : memref<1x332x16xf32, #tpu.memory_space<vmem>>, vector<1x288x16xf32>
    %34 = vector.shape_cast %33 : vector<1x288x16xf32> to vector<288x16xf32>
    %c5 = arith.constant 5 : index
    %c0_31 = arith.constant 0 : index
    %c0_32 = arith.constant 0 : index
    %35 = vector.load %arg2[%c5, %c0_31, %c0_32] : memref<9x16x12xf32, #tpu.memory_space<vmem>>, vector<1x16x12xf32>
    %36 = vector.shape_cast %35 : vector<1x16x12xf32> to vector<16x12xf32>
    %cst_33 = arith.constant dense<0.000000e+00> : vector<288x12xf32>
    %37 = tpu.matmul %34, %36, %cst_33 {dimension_numbers = #tpu.dot_dimension_numbers<[1], [0], [0], [1], [0, 0, 1, 1], [], []>} : vector<288x16xf32>, vector<16x12xf32>, vector<288x12xf32> -> vector<288x12xf32>
    %38 = arith.addf %32, %37 : vector<288x12xf32>
    %c0_34 = arith.constant 0 : index
    %c36 = arith.constant 36 : index
    %c0_35 = arith.constant 0 : index
    %39 = vector.load %arg1[%c0_34, %c36, %c0_35] : memref<1x332x16xf32, #tpu.memory_space<vmem>>, vector<1x288x16xf32>
    %40 = vector.shape_cast %39 : vector<1x288x16xf32> to vector<288x16xf32>
    %c6 = arith.constant 6 : index
    %c0_36 = arith.constant 0 : index
    %c0_37 = arith.constant 0 : index
    %41 = vector.load %arg2[%c6, %c0_36, %c0_37] : memref<9x16x12xf32, #tpu.memory_space<vmem>>, vector<1x16x12xf32>
    %42 = vector.shape_cast %41 : vector<1x16x12xf32> to vector<16x12xf32>
    %cst_38 = arith.constant dense<0.000000e+00> : vector<288x12xf32>
    %43 = tpu.matmul %40, %42, %cst_38 {dimension_numbers = #tpu.dot_dimension_numbers<[1], [0], [0], [1], [0, 0, 1, 1], [], []>} : vector<288x16xf32>, vector<16x12xf32>, vector<288x12xf32> -> vector<288x12xf32>
    %44 = arith.addf %38, %43 : vector<288x12xf32>
    %c0_39 = arith.constant 0 : index
    %c37 = arith.constant 37 : index
    %c0_40 = arith.constant 0 : index
    %45 = vector.load %arg1[%c0_39, %c37, %c0_40] : memref<1x332x16xf32, #tpu.memory_space<vmem>>, vector<1x288x16xf32>
    %46 = vector.shape_cast %45 : vector<1x288x16xf32> to vector<288x16xf32>
    %c7 = arith.constant 7 : index
    %c0_41 = arith.constant 0 : index
    %c0_42 = arith.constant 0 : index
    %47 = vector.load %arg2[%c7, %c0_41, %c0_42] : memref<9x16x12xf32, #tpu.memory_space<vmem>>, vector<1x16x12xf32>
    %48 = vector.shape_cast %47 : vector<1x16x12xf32> to vector<16x12xf32>
    %cst_43 = arith.constant dense<0.000000e+00> : vector<288x12xf32>
    %49 = tpu.matmul %46, %48, %cst_43 {dimension_numbers = #tpu.dot_dimension_numbers<[1], [0], [0], [1], [0, 0, 1, 1], [], []>} : vector<288x16xf32>, vector<16x12xf32>, vector<288x12xf32> -> vector<288x12xf32>
    %50 = arith.addf %44, %49 : vector<288x12xf32>
    %c0_44 = arith.constant 0 : index
    %c38 = arith.constant 38 : index
    %c0_45 = arith.constant 0 : index
    %51 = vector.load %arg1[%c0_44, %c38, %c0_45] : memref<1x332x16xf32, #tpu.memory_space<vmem>>, vector<1x288x16xf32>
    %52 = vector.shape_cast %51 : vector<1x288x16xf32> to vector<288x16xf32>
    %c8 = arith.constant 8 : index
    %c0_46 = arith.constant 0 : index
    %c0_47 = arith.constant 0 : index
    %53 = vector.load %arg2[%c8, %c0_46, %c0_47] : memref<9x16x12xf32, #tpu.memory_space<vmem>>, vector<1x16x12xf32>
    %54 = vector.shape_cast %53 : vector<1x16x12xf32> to vector<16x12xf32>
    %cst_48 = arith.constant dense<0.000000e+00> : vector<288x12xf32>
    %55 = tpu.matmul %52, %54, %cst_48 {dimension_numbers = #tpu.dot_dimension_numbers<[1], [0], [0], [1], [0, 0, 1, 1], [], []>} : vector<288x16xf32>, vector<16x12xf32>, vector<288x12xf32> -> vector<288x12xf32>
    %56 = arith.addf %50, %55 : vector<288x12xf32>
    %c0_49 = arith.constant 0 : index
    %c0_50 = arith.constant 0 : index
    %c0_51 = arith.constant 0 : index
    %57 = vector.load %arg4[%c0_49, %c0_50, %c0_51] : memref<1x288x12xf32, #tpu.memory_space<vmem>>, vector<1x288x12xf32>
    %58 = vector.shape_cast %57 : vector<1x288x12xf32> to vector<288x12xf32>
    %59 = vector.shape_cast %56 : vector<288x12xf32> to vector<1x288x12xf32>
    tpu.vector_store %arg4[%c0_49, %c0_50, %c0_51], %59 {strides = array<i32>} : memref<1x288x12xf32, #tpu.memory_space<vmem>>, vector<1x288x12xf32>,
    return
  }
  func.func @transform_0(%arg0: i32) -> (i32, i32, i32) {
    %c0_i32 = arith.constant 0 : i32
    %c0_i32_0 = arith.constant 0 : i32
    %c0_i32_1 = arith.constant 0 : i32
    return %arg0, %c0_i32, %c0_i32_0 : i32, i32, i32
  }
  func.func @transform_1(%arg0: i32) -> (i32, i32, i32) {
    %c0_i32 = arith.constant 0 : i32
    %c0_i32_0 = arith.constant 0 : i32
    %c0_i32_1 = arith.constant 0 : i32
    %c0_i32_2 = arith.constant 0 : i32
    return %c0_i32, %c0_i32_0, %c0_i32_1 : i32, i32, i32
  }
  func.func @transform_2(%arg0: i32) -> (i32, i32) {
    %c0_i32 = arith.constant 0 : i32
    %c0_i32_0 = arith.constant 0 : i32
    %c0_i32_1 = arith.constant 0 : i32
    return %c0_i32, %c0_i32_0 : i32, i32
  }
  func.func @transform_3(%arg0: i32) -> (i32, i32, i32) {
    %c0_i32 = arith.constant 0 : i32
    %c0_i32_0 = arith.constant 0 : i32
    %c0_i32_1 = arith.constant 0 : i32
    return %arg0, %c0_i32, %c0_i32_0 : i32, i32, i32
  }
}

</mosaic_0001>

<bundles_post_ra>
// kernel: cnnae_forward.6
= control target key start
LH: loop header
LB: loop body
LE: loop exit
PB: predicated region body
PF: predicated region fallthrough
CT: control target
= control target key end

     0   :  { %s1674_s12 = smov 0   ;;  %s2074_s0 = inlined_call_operand.vmem [shape: f32[2,297,12], index: 0, kind: input, shape index: {}]   ;;  %s2075_s1 = inlined_call_operand.vmem [shape: f32[4,12,16], index: 1, kind: input, shape index: {}]   ;;  %s2076_s2 = inlined_call_operand.vmem [shape: f32[1,16], index: 2, kind: input, shape index: {}]   ;;  %s2077_s3 = inlined_call_operand.vmem [shape: f32[2,272,16], index: 3, kind: output, shape index: {}]  }
   0x1 LB: > { %s1480_s13 = sadd.s32 4294967295, %s1652_s12   ;;  %p1484_p0 = scmp.ge.s32.totalorder %s1652_s12, 1  ;;  %s1652_s12 = sphi %s1674_s12, %s13_s12  }
   0x2   : > { %p137_p1 = scmp.lt.s32.totalorder %s1652_s12, 3 }
   0x4   : > { %p138_p2 = pnand %p1484_p0, %p137_p1 }
   0x5   : > { %p161_p3 = scmp.lt.s32.totalorder (!%p138_p2), %s1480_s13, 1 }
   0x6   : > { %141 = sbr.rel (%p138_p2) target bundleno = 420 (0x1a4), region = 32 }
   0xb   : > { %vm314_vm0 = vcmask 1043456   ;;  %v1560_v0 = vld [vmem:[%s2075_s1 + $0x28] sm:$0xf]  ;;  %v1559_v2 = vld [vmem:[%s2075_s1 + $0x20] sm:$0xff]  ;;  %v1597_v3 = vld [vmem:[%s2075_s1 + $0x38] sm:$0xf] }
   0xc   : > { %v210_v1 = vld [vmem:[%s2075_s1 + $0x8] sm:$0xf]  ;;  %1561 = vmatpush.msk.msra.mxu2 %vm314_vm0, %v1560_v0  ;;  %v209_v4 = vld [vmem:[%s2075_s1] sm:$0xff]  ;;  %v1596_v5 = vld [vmem:[%s2075_s1 + $0x30] sm:$0xff]  ;;  %1598 = vmatpush.msk.msra.mxu3 %vm314_vm0, %v1597_v3  ;;  %s2079_s13 = smov (!%p161_p3, %s1480_s13), 1  ;;  %vm211_vm1 = vcmask 97280  }
   0xd   : > { %1487 = vmatpush.msk.msra.mxu0 %vm314_vm0, %v210_v1  ;;  %v1523_v6 = vld [vmem:[%s2075_s1 + $0x18] sm:$0xf]  ;;  %v1522_v7 = vld [vmem:[%s2075_s1 + $0x10] sm:$0xff]  ;;  %s1635_s30 = smul.u32 304, %s2079_s13  ;;  %v1835_v58 = vld [vmem:[%s2076_s2] ss:$0 sm:$0xff] }
   0xe   : > { %923 = vmatpush.msra.mxu2 %v1559_v2  ;;  %1524 = vmatpush.msk.msra.mxu1 %vm314_vm0, %v1523_v6  ;;  %s1636_s9 = smul.u32 272, %s2079_s13  ;;  %vm1390_vm2 = vcmask 130048  }
   0xf   : > { %333 = vmatpush.msra.mxu0 %v209_v4  ;;  %1218 = vmatpush.msra.mxu3 %v1596_v5  ;;  %s1716_s6 = scalar_lea.vmem %s2074_s0, %s1635_s30 }
  0x10   : > { %628 = vmatpush.msra.mxu1 %v1522_v7  ;;  %v766_v8 = vld [vmem:[%s1716_s6 + $0x11] sm:$0xff]  ;;  %v175_v9 = vld [vmem:[%s1716_s6] sm:$0xff]  ;;  %v176_v13 = vld [vmem:[%s1716_s6 + $0x8] sm:$0xff]  ;;  %s1853_s14 = scalar_lea.vmem %s2077_s3, %s1636_s9 }
  0x11   : > { %v1061_v10 = vld [vmem:[%s1716_s6 + $0x12] sm:$0xff]  ;;  %1562 = vmatmul.msk.f32.vlgmr.msra.gmra.mxu2 %vm211_vm1, %v766_v8  ;;  %1488 = vmatmul.msk.f32.vlgmr.msra.gmra.mxu0 %vm211_vm1, %v175_v9  ;;  %v471_v11 = vld [vmem:[%s1716_s6 + $0x1] sm:$0xff]  ;;  %v472_v15 = vld [vmem:[%s1716_s6 + $0x9] sm:$0xff] }
  0x12   : > { %1599 = vmatmul.msk.f32.vlgmr.msra.gmra.mxu3 %vm211_vm1, %v1061_v10  ;;  %1525 = vmatmul.msk.f32.vlgmr.msra.gmra.mxu1 %vm211_vm1, %v471_v11  ;;  %v767_v12 = vld [vmem:[%s1716_s6 + $0x19] sm:$0xff]  ;;  %v768_v16 = vld [vmem:[%s1716_s6 + $0x21] sm:$0xff]  ;;  %v177_v17 = vld [vmem:[%s1716_s6 + $0x10] sm:$0xff] }
  0x13   : > { %v1062_v14 = vld [vmem:[%s1716_s6 + $0x1a] sm:$0xff]  ;;  %v1063_v18 = vld [vmem:[%s1716_s6 + $0x22] sm:$0xff]  ;;  %v1064_v21 = vld [vmem:[%s1716_s6 + $0x2a] sm:$0xff] }
  0x14   : > { %v769_v19 = vld [vmem:[%s1716_s6 + $0x29] sm:$0xff]  ;;  %v178_v20 = vld [vmem:[%s1716_s6 + $0x18] sm:$0xff]  ;;  %v179_v23 = vld [vmem:[%s1716_s6 + $0x20] sm:$0xff] }
  0x15   : > { %v770_v22 = vld [vmem:[%s1716_s6 + $0x31] sm:$0xff]  ;;  %v771_v25 = vld [vmem:[%s1716_s6 + $0x39] sm:$0xff]  ;;  %v180_v26 = vld [vmem:[%s1716_s6 + $0x28] sm:$0xff] }
  0x16   : > { %v1065_v24 = vld [vmem:[%s1716_s6 + $0x32] sm:$0xff]  ;;  %v1066_v27 = vld [vmem:[%s1716_s6 + $0x3a] sm:$0xff]  ;;  %v1067_v30 = vld [vmem:[%s1716_s6 + $0x42] sm:$0xff] }
  0x17   : > { %v772_v28 = vld [vmem:[%s1716_s6 + $0x41] sm:$0xff]  ;;  %v181_v29 = vld [vmem:[%s1716_s6 + $0x30] sm:$0xff]  ;;  %v182_v32 = vld [vmem:[%s1716_s6 + $0x38] sm:$0xff] }
  0x18   : > { %v773_v31 = vld [vmem:[%s1716_s6 + $0x49] sm:$0xff]  ;;  %v774_v34 = vld [vmem:[%s1716_s6 + $0x51] sm:$0xff]  ;;  %v183_v35 = vld [vmem:[%s1716_s6 + $0x40] sm:$0xff] }
  0x19   : > { %1563 = vmatmul.msk.f32.gmra.mxu2 %vm211_vm1, %v767_v12  ;;  %1489 = vmatmul.msk.f32.gmra.mxu0 %vm211_vm1, %v176_v13  ;;  %v1068_v33 = vld [vmem:[%s1716_s6 + $0x4a] sm:$0xff]  ;;  %v1069_v36 = vld [vmem:[%s1716_s6 + $0x52] sm:$0xff]  ;;  %v1070_v39 = vld [vmem:[%s1716_s6 + $0x5a] sm:$0xff] }
  0x1a   : > { %1600 = vmatmul.msk.f32.gmra.mxu3 %vm211_vm1, %v1062_v14  ;;  %1526 = vmatmul.msk.f32.gmra.mxu1 %vm211_vm1, %v472_v15  ;;  %v775_v37 = vld [vmem:[%s1716_s6 + $0x59] sm:$0xff]  ;;  %v184_v38 = vld [vmem:[%s1716_s6 + $0x48] sm:$0xff]  ;;  %v185_v41 = vld [vmem:[%s1716_s6 + $0x50] sm:$0xff] }
  0x1b   : > { %v776_v40 = vld [vmem:[%s1716_s6 + $0x61] sm:$0xff]  ;;  %v777_v43 = vld [vmem:[%s1716_s6 + $0x69] sm:$0xff]  ;;  %v186_v44 = vld [vmem:[%s1716_s6 + $0x58] sm:$0xff] }
  0x1c   : > { %v1071_v42 = vld [vmem:[%s1716_s6 + $0x62] sm:$0xff]  ;;  %v1072_v45 = vld [vmem:[%s1716_s6 + $0x6a] sm:$0xff]  ;;  %v1073_v48 = vld [vmem:[%s1716_s6 + $0x72] sm:$0xff] }
  0x1d   : > { %v778_v46 = vld [vmem:[%s1716_s6 + $0x71] sm:$0xff]  ;;  %v187_v47 = vld [vmem:[%s1716_s6 + $0x60] sm:$0xff]  ;;  %v188_v50 = vld [vmem:[%s1716_s6 + $0x68] sm:$0xff] }
  0x1e   : > { %v779_v49 = vld [vmem:[%s1716_s6 + $0x79] sm:$0xff]  ;;  %v780_v52 = vld [vmem:[%s1716_s6 + $0x81] sm:$0xff]  ;;  %v189_v53 = vld [vmem:[%s1716_s6 + $0x70] sm:$0xff] }
  0x1f   : > { %v1074_v51 = vld [vmem:[%s1716_s6 + $0x7a] sm:$0xff]  ;;  %v1075_v54 = vld [vmem:[%s1716_s6 + $0x82] sm:$0xff]  ;;  %v1076_v57 = vld [vmem:[%s1716_s6 + $0x8a] sm:$0xff] }
  0x20   : > { %v781_v55 = vld [vmem:[%s1716_s6 + $0x89] sm:$0xff]  ;;  %v190_v56 = vld [vmem:[%s1716_s6 + $0x78] sm:$0xff]  ;;  %v191_v61 = vld [vmem:[%s1716_s6 + $0x80] sm:$0xff] }
  0x21   : > { %1564 = vmatmul.msk.f32.gmra.mxu2 %vm211_vm1, %v768_v16  ;;  %1490 = vmatmul.msk.f32.gmra.mxu0 %vm211_vm1, %v177_v17  ;;  %v782_v60 = vld [vmem:[%s1716_s6 + $0x91] sm:$0xff]  ;;  %v783_v6 = vld [vmem:[%s1716_s6 + $0x99] sm:$0xff]  ;;  %v192_v7 = vld [vmem:[%s1716_s6 + $0x88] sm:$0xff] }
  0x22   : > { %1601 = vmatmul.msk.f32.gmra.mxu3 %vm211_vm1, %v1063_v18  ;;  %1527 = vmatmul.msk.f32.gmra.mxu1 %vm211_vm1, %v766_v8  ;;  %v1077_v0 = vld [vmem:[%s1716_s6 + $0x92] sm:$0xff]  ;;  %v1078_v11 = vld [vmem:[%s1716_s6 + $0x9a] sm:$0xff] }
  0x23   : > { %v784_v18 = vld [vmem:[%s1716_s6 + $0xa1] sm:$0xff] }
  0x29   : > { %1565 = vmatmul.msk.f32.gmra.mxu2 %vm211_vm1, %v769_v19  ;;  %1491 = vmatmul.msk.f32.gmra.mxu0 %vm211_vm1, %v178_v20 }
  0x2a   : > { %1602 = vmatmul.msk.f32.gmra.mxu3 %vm211_vm1, %v1064_v21  ;;  %1528 = vmatmul.msk.f32.gmra.mxu1 %vm211_vm1, %v767_v12 }
  0x31   : > { %1566 = vmatmul.msk.f32.gmra.mxu2 %vm211_vm1, %v770_v22  ;;  %1492 = vmatmul.msk.f32.gmra.mxu0 %vm211_vm1, %v179_v23  ;;  %v1079_v23 = vld [vmem:[%s1716_s6 + $0xa2] sm:$0xff] }
  0x32   : > { %1603 = vmatmul.msk.f32.gmra.mxu3 %vm211_vm1, %v1065_v24  ;;  %1529 = vmatmul.msk.f32.gmra.mxu1 %vm211_vm1, %v768_v16 }
  0x39   : > { %1567 = vmatmul.msk.f32.gmra.mxu2 %vm211_vm1, %v771_v25  ;;  %1493 = vmatmul.msk.f32.gmra.mxu0 %vm211_vm1, %v180_v26 }
  0x3a   : > { %1604 = vmatmul.msk.f32.gmra.mxu3 %vm211_vm1, %v1066_v27  ;;  %1530 = vmatmul.msk.f32.gmra.mxu1 %vm211_vm1, %v769_v19  ;;  %v193_v19 = vld [vmem:[%s1716_s6 + $0x90] sm:$0xff] }
  0x41   : > { %1568 = vmatmul.msk.f32.gmra.mxu2 %vm211_vm1, %v772_v28  ;;  %1494 = vmatmul.msk.f32.gmra.mxu0 %vm211_vm1, %v181_v29 }
  0x42   : > { %1605 = vmatmul.msk.f32.gmra.mxu3 %vm211_vm1, %v1067_v30  ;;  %1531 = vmatmul.msk.f32.gmra.mxu1 %vm211_vm1, %v770_v22  ;;  %v785_v30 = vld [vmem:[%s1716_s6 + $0xa9] sm:$0xff] }
  0x49   : > { %1569 = vmatmul.msk.f32.gmra.mxu2 %vm211_vm1, %v773_v31  ;;  %1495 = vmatmul.msk.f32.gmra.mxu0 %vm211_vm1, %v182_v32 }
  0x4a   : > { %1606 = vmatmul.msk.f32.gmra.mxu3 %vm211_vm1, %v1068_v33  ;;  %1532 = vmatmul.msk.f32.gmra.mxu1 %vm211_vm1, %v771_v25 }
  0x51   : > { %1570 = vmatmul.msk.f32.gmra.mxu2 %vm211_vm1, %v774_v34  ;;  %1496 = vmatmul.msk.f32.gmra.mxu0 %vm211_vm1, %v183_v35  ;;  %v1080_v35 = vld [vmem:[%s1716_s6 + $0xaa] sm:$0xff] }
  0x52   : > { %1607 = vmatmul.msk.f32.gmra.mxu3 %vm211_vm1, %v1069_v36  ;;  %1533 = vmatmul.msk.f32.gmra.mxu1 %vm211_vm1, %v772_v28 }
  0x59   : > { %1571 = vmatmul.msk.f32.gmra.mxu2 %vm211_vm1, %v775_v37  ;;  %1497 = vmatmul.msk.f32.gmra.mxu0 %vm211_vm1, %v184_v38 }
  0x5a   : > { %1608 = vmatmul.msk.f32.gmra.mxu3 %vm211_vm1, %v1070_v39  ;;  %1534 = vmatmul.msk.f32.gmra.mxu1 %vm211_vm1, %v773_v31  ;;  %v194_v31 = vld [vmem:[%s1716_s6 + $0x98] sm:$0xff] }
  0x61   : > { %1572 = vmatmul.msk.f32.gmra.mxu2 %vm211_vm1, %v776_v40  ;;  %1498 = vmatmul.msk.f32.gmra.mxu0 %vm211_vm1, %v185_v41 }
  0x62   : > { %1609 = vmatmul.msk.f32.gmra.mxu3 %vm211_vm1, %v1071_v42  ;;  %1535 = vmatmul.msk.f32.gmra.mxu1 %vm211_vm1, %v774_v34  ;;  %v786_v42 = vld [vmem:[%s1716_s6 + $0xb1] sm:$0xff] }
  0x69   : > { %1573 = vmatmul.msk.f32.gmra.mxu2 %vm211_vm1, %v777_v43  ;;  %1499 = vmatmul.msk.f32.gmra.mxu0 %vm211_vm1, %v186_v44 }
  0x6a   : > { %1610 = vmatmul.msk.f32.gmra.mxu3 %vm211_vm1, %v1072_v45  ;;  %1536 = vmatmul.msk.f32.gmra.mxu1 %vm211_vm1, %v775_v37 }
  0x71   : > { %1574 = vmatmul.msk.f32.gmra.mxu2 %vm211_vm1, %v778_v46  ;;  %1500 = vmatmul.msk.f32.gmra.mxu0 %vm211_vm1, %v187_v47  ;;  %v1081_v47 = vld [vmem:[%s1716_s6 + $0xb2] sm:$0xff] }
  0x72   : > { %1611 = vmatmul.msk.f32.gmra.mxu3 %vm211_vm1, %v1073_v48  ;;  %1537 = vmatmul.msk.f32.gmra.mxu1 %vm211_vm1, %v776_v40 }
  0x79   : > { %1575 = vmatmul.msk.f32.gmra.mxu2 %vm211_vm1, %v779_v49  ;;  %1501 = vmatmul.msk.f32.gmra.mxu0 %vm211_vm1, %v188_v50 }
  0x7a   : > { %1612 = vmatmul.msk.f32.gmra.mxu3 %vm211_vm1, %v1074_v51  ;;  %1538 = vmatmul.msk.f32.gmra.mxu1 %vm211_vm1, %v777_v43  ;;  %v195_v43 = vld [vmem:[%s1716_s6 + $0xa0] sm:$0xff] }
  0x81   : > { %1576 = vmatmul.msk.f32.gmra.mxu2 %vm211_vm1, %v780_v52  ;;  %1502 = vmatmul.msk.f32.gmra.mxu0 %vm211_vm1, %v189_v53 }
  0x82   : > { %1613 = vmatmul.msk.f32.gmra.mxu3 %vm211_vm1, %v1075_v54  ;;  %1539 = vmatmul.msk.f32.gmra.mxu1 %vm211_vm1, %v778_v46  ;;  %v787_v54 = vld [vmem:[%s1716_s6 + $0xb9] sm:$0xff] }
  0x89   : > { %1577 = vmatmul.msk.f32.gmra.mxu2 %vm211_vm1, %v781_v55  ;;  %1503 = vmatmul.msk.f32.gmra.mxu0 %vm211_vm1, %v190_v56 }
  0x8a   : > { %1614 = vmatmul.msk.f32.gmra.mxu3 %vm211_vm1, %v1076_v57  ;;  %1540 = vmatmul.msk.f32.gmra.mxu1 %vm211_vm1, %v779_v49 }
  0x8e   : > { %v335_v59 = vpop.f32.mrf.mxu0 }
  0x8f   : > { %v437_v62 = vadd.f32 %v1835_v58, %v335_v59  ;;  %v630_v63 = vpop.f32.mrf.mxu1 }
  0x91   : > { %1578 = vmatmul.msk.f32.gmra.mxu2 %vm211_vm1, %v782_v60  ;;  %v732_v1 = vadd.f32 %v630_v63, %v437_v62  ;;  %1504 = vmatmul.msk.f32.gmra.mxu0 %vm211_vm1, %v191_v61 }
  0x92   : > { %1615 = vmatmul.msk.f32.gmra.mxu3 %vm211_vm1, %v1077_v0  ;;  %1541 = vmatmul.msk.f32.gmra.mxu1 %vm211_vm1, %v780_v52 }
  0x94   : > { %v925_v2 = vpop.f32.mrf.mxu2 }
  0x95   : > { %v1027_v3 = vadd.f32 %v925_v2, %v732_v1  ;;  %v1220_v4 = vpop.f32.mrf.mxu3 }
  0x96   : > { %v338_v5 = vpop.f32.mrf.mxu0 }
  0x97   : > { %v1322_v8 = vadd.f32 %v1220_v4, %v1027_v3  ;;  %v438_v9 = vadd.f32 %v1835_v58, %v338_v5  ;;  %v633_v10 = vpop.f32.mrf.mxu1  ;;  %v788_v3 = vld [vmem:[%s1716_s6 + $0xc1] sm:$0xff]  ;;  %v197_v4 = vld [vmem:[%s1716_s6 + $0xb0] sm:$0xff] }
  0x99   : > { %v1356_v12 = vmax.f32 %v1322_v8, 0.0  ;;  %1579 = vmatmul.msk.f32.gmra.mxu2 %vm211_vm1, %v783_v6  ;;  %v733_v13 = vadd.f32 %v633_v10, %v438_v9  ;;  %1505 = vmatmul.msk.f32.gmra.mxu0 %vm211_vm1, %v192_v7  ;;  %v1083_v8 = vld [vmem:[%s1716_s6 + $0xc2] sm:$0xff] }
  0x9a   : > { %1616 = vmatmul.msk.f32.gmra.mxu3 %vm211_vm1, %v1078_v11  ;;  %1542 = vmatmul.msk.f32.gmra.mxu1 %vm211_vm1, %v781_v55  ;;  %v196_v55 = vld [vmem:[%s1716_s6 + $0xa8] sm:$0xff] }
  0x9b   : > { %1391 = vst.msk [vmem:[%s1853_s14] sm:$0xff] %vm1390_vm2, %v1356_v12 }
  0x9c   : > { %v928_v14 = vpop.f32.mrf.mxu2 }
  0x9d   : > { %v1028_v15 = vadd.f32 %v928_v14, %v733_v13  ;;  %v1223_v16 = vpop.f32.mrf.mxu3 }
  0x9e   : > { %v341_v17 = vpop.f32.mrf.mxu0 }
  0x9f   : > { %v1323_v20 = vadd.f32 %v1223_v16, %v1028_v15  ;;  %v439_v21 = vadd.f32 %v1835_v58, %v341_v17  ;;  %v636_v22 = vpop.f32.mrf.mxu1  ;;  %v789_v15 = vld [vmem:[%s1716_s6 + $0xc9] sm:$0xff]  ;;  %v198_v16 = vld [vmem:[%s1716_s6 + $0xb8] sm:$0xff] }
  0xa1   : > { %v1357_v24 = vmax.f32 %v1323_v20, 0.0  ;;  %1580 = vmatmul.msk.f32.gmra.mxu2 %vm211_vm1, %v784_v18  ;;  %v734_v25 = vadd.f32 %v636_v22, %v439_v21  ;;  %1506 = vmatmul.msk.f32.gmra.mxu0 %vm211_vm1, %v193_v19  ;;  %v1084_v20 = vld [vmem:[%s1716_s6 + $0xca] sm:$0xff] }
  0xa2   : > { %1617 = vmatmul.msk.f32.gmra.mxu3 %vm211_vm1, %v1079_v23  ;;  %1543 = vmatmul.msk.f32.gmra.mxu1 %vm211_vm1, %v782_v60  ;;  %v1082_v60 = vld [vmem:[%s1716_s6 + $0xba] sm:$0xff] }
  0xa3   : > { %1392 = vst.msk [vmem:[%s1853_s14 + $0x8] sm:$0xff] %vm1390_vm2, %v1357_v24 }
  0xa4   : > { %v931_v26 = vpop.f32.mrf.mxu2 }
  0xa5   : > { %v1029_v27 = vadd.f32 %v931_v26, %v734_v25  ;;  %v1226_v28 = vpop.f32.mrf.mxu3 }
  0xa6   : > { %v344_v29 = vpop.f32.mrf.mxu0 }
  0xa7   : > { %v1324_v32 = vadd.f32 %v1226_v28, %v1029_v27  ;;  %v440_v33 = vadd.f32 %v1835_v58, %v344_v29  ;;  %v639_v34 = vpop.f32.mrf.mxu1  ;;  %v790_v27 = vld [vmem:[%s1716_s6 + $0xd1] sm:$0xff]  ;;  %v199_v28 = vld [vmem:[%s1716_s6 + $0xc0] sm:$0xff] }
  0xa9   : > { %v1358_v36 = vmax.f32 %v1324_v32, 0.0  ;;  %1581 = vmatmul.msk.f32.gmra.mxu2 %vm211_vm1, %v785_v30  ;;  %v735_v37 = vadd.f32 %v639_v34, %v440_v33  ;;  %1507 = vmatmul.msk.f32.gmra.mxu0 %vm211_vm1, %v194_v31  ;;  %v1085_v32 = vld [vmem:[%s1716_s6 + $0xd2] sm:$0xff] }
  0xaa   : > { %1618 = vmatmul.msk.f32.gmra.mxu3 %vm211_vm1, %v1080_v35  ;;  %1544 = vmatmul.msk.f32.gmra.mxu1 %vm211_vm1, %v783_v6 }
  0xab   : > { %1393 = vst.msk [vmem:[%s1853_s14 + $0x10] sm:$0xff] %vm1390_vm2, %v1358_v36 }
  0xac   : > { %v934_v38 = vpop.f32.mrf.mxu2 }
  0xad   : > { %v1030_v39 = vadd.f32 %v934_v38, %v735_v37  ;;  %v1229_v40 = vpop.f32.mrf.mxu3 }
  0xae   : > { %v347_v41 = vpop.f32.mrf.mxu0 }
  0xaf   : > { %v1325_v44 = vadd.f32 %v1229_v40, %v1030_v39  ;;  %v441_v45 = vadd.f32 %v1835_v58, %v347_v41  ;;  %v642_v46 = vpop.f32.mrf.mxu1  ;;  %v791_v39 = vld [vmem:[%s1716_s6 + $0xd9] sm:$0xff]  ;;  %v200_v40 = vld [vmem:[%s1716_s6 + $0xc8] sm:$0xff] }
  0xb1   : > { %v1359_v48 = vmax.f32 %v1325_v44, 0.0  ;;  %1582 = vmatmul.msk.f32.gmra.mxu2 %vm211_vm1, %v786_v42  ;;  %v736_v49 = vadd.f32 %v642_v46, %v441_v45  ;;  %1508 = vmatmul.msk.f32.gmra.mxu0 %vm211_vm1, %v195_v43  ;;  %v1086_v44 = vld [vmem:[%s1716_s6 + $0xda] sm:$0xff] }
  0xb2   : > { %1619 = vmatmul.msk.f32.gmra.mxu3 %vm211_vm1, %v1081_v47  ;;  %1545 = vmatmul.msk.f32.gmra.mxu1 %vm211_vm1, %v784_v18 }
  0xb3   : > { %1394 = vst.msk [vmem:[%s1853_s14 + $0x18] sm:$0xff] %vm1390_vm2, %v1359_v48 }
  0xb4   : > { %v937_v50 = vpop.f32.mrf.mxu2 }
  0xb5   : > { %v1031_v51 = vadd.f32 %v937_v50, %v736_v49  ;;  %v1232_v52 = vpop.f32.mrf.mxu3 }
  0xb6   : > { %v350_v53 = vpop.f32.mrf.mxu0 }
  0xb7   : > { %v1326_v56 = vadd.f32 %v1232_v52, %v1031_v51  ;;  %v442_v57 = vadd.f32 %v1835_v58, %v350_v53  ;;  %v645_v59 = vpop.f32.mrf.mxu1  ;;  %v792_v51 = vld [vmem:[%s1716_s6 + $0xe1] sm:$0xff]  ;;  %v201_v52 = vld [vmem:[%s1716_s6 + $0xd0] sm:$0xff] }
  0xb9   : > { %v1360_v61 = vmax.f32 %v1326_v56, 0.0  ;;  %1583 = vmatmul.msk.f32.gmra.mxu2 %vm211_vm1, %v787_v54  ;;  %v737_v62 = vadd.f32 %v645_v59, %v442_v57  ;;  %1509 = vmatmul.msk.f32.gmra.mxu0 %vm211_vm1, %v196_v55  ;;  %v1087_v56 = vld [vmem:[%s1716_s6 + $0xe2] sm:$0xff] }
  0xba   : > { %1620 = vmatmul.msk.f32.gmra.mxu3 %vm211_vm1, %v1082_v60  ;;  %1546 = vmatmul.msk.f32.gmra.mxu1 %vm211_vm1, %v785_v30 }
  0xbb   : > { %1395 = vst.msk [vmem:[%s1853_s14 + $0x20] sm:$0xff] %vm1390_vm2, %v1360_v61 }
  0xbc   : > { %v940_v63 = vpop.f32.mrf.mxu2 }
  0xbd   : > { %v1032_v0 = vadd.f32 %v940_v63, %v737_v62  ;;  %v1235_v1 = vpop.f32.mrf.mxu3 }
  0xbe   : > { %v353_v2 = vpop.f32.mrf.mxu0 }
  0xbf   : > { %v1327_v5 = vadd.f32 %v1235_v1, %v1032_v0  ;;  %v443_v6 = vadd.f32 %v1835_v58, %v353_v2  ;;  %v648_v7 = vpop.f32.mrf.mxu1  ;;  %v793_v0 = vld [vmem:[%s1716_s6 + $0xe9] sm:$0xff]  ;;  %v202_v1 = vld [vmem:[%s1716_s6 + $0xd8] sm:$0xff] }
  0xc1   : > { %v1361_v9 = vmax.f32 %v1327_v5, 0.0  ;;  %1584 = vmatmul.msk.f32.gmra.mxu2 %vm211_vm1, %v788_v3  ;;  %v738_v10 = vadd.f32 %v648_v7, %v443_v6  ;;  %1510 = vmatmul.msk.f32.gmra.mxu0 %vm211_vm1, %v197_v4  ;;  %v1088_v5 = vld [vmem:[%s1716_s6 + $0xea] sm:$0xff] }
  0xc2   : > { %1621 = vmatmul.msk.f32.gmra.mxu3 %vm211_vm1, %v1083_v8  ;;  %1547 = vmatmul.msk.f32.gmra.mxu1 %vm211_vm1, %v786_v42 }
  0xc3   : > { %1396 = vst.msk [vmem:[%s1853_s14 + $0x28] sm:$0xff] %vm1390_vm2, %v1361_v9 }
  0xc4   : > { %v943_v11 = vpop.f32.mrf.mxu2 }
  0xc5   : > { %v1033_v12 = vadd.f32 %v943_v11, %v738_v10  ;;  %v1238_v13 = vpop.f32.mrf.mxu3 }
  0xc6   : > { %v356_v14 = vpop.f32.mrf.mxu0 }
  0xc7   : > { %v1328_v17 = vadd.f32 %v1238_v13, %v1033_v12  ;;  %v444_v18 = vadd.f32 %v1835_v58, %v356_v14  ;;  %v651_v19 = vpop.f32.mrf.mxu1  ;;  %v794_v12 = vld [vmem:[%s1716_s6 + $0xf1] sm:$0xff]  ;;  %v203_v13 = vld [vmem:[%s1716_s6 + $0xe0] sm:$0xff] }
  0xc9   : > { %v1362_v21 = vmax.f32 %v1328_v17, 0.0  ;;  %1585 = vmatmul.msk.f32.gmra.mxu2 %vm211_vm1, %v789_v15  ;;  %v739_v22 = vadd.f32 %v651_v19, %v444_v18  ;;  %1511 = vmatmul.msk.f32.gmra.mxu0 %vm211_vm1, %v198_v16  ;;  %v1089_v17 = vld [vmem:[%s1716_s6 + $0xf2] sm:$0xff] }
  0xca   : > { %1622 = vmatmul.msk.f32.gmra.mxu3 %vm211_vm1, %v1084_v20  ;;  %1548 = vmatmul.msk.f32.gmra.mxu1 %vm211_vm1, %v787_v54 }
  0xcb   : > { %1397 = vst.msk [vmem:[%s1853_s14 + $0x30] sm:$0xff] %vm1390_vm2, %v1362_v21 }
  0xcc   : > { %v946_v23 = vpop.f32.mrf.mxu2 }
  0xcd   : > { %v1034_v24 = vadd.f32 %v946_v23, %v739_v22  ;;  %v1241_v25 = vpop.f32.mrf.mxu3 }
  0xce   : > { %v359_v26 = vpop.f32.mrf.mxu0 }
  0xcf   : > { %v1329_v29 = vadd.f32 %v1241_v25, %v1034_v24  ;;  %v445_v30 = vadd.f32 %v1835_v58, %v359_v26  ;;  %v654_v31 = vpop.f32.mrf.mxu1  ;;  %v795_v24 = vld [vmem:[%s1716_s6 + $0xf9] sm:$0xff]  ;;  %v204_v25 = vld [vmem:[%s1716_s6 + $0xe8] sm:$0xff] }
  0xd1   : > { %v1363_v33 = vmax.f32 %v1329_v29, 0.0  ;;  %1586 = vmatmul.msk.f32.gmra.mxu2 %vm211_vm1, %v790_v27  ;;  %v740_v34 = vadd.f32 %v654_v31, %v445_v30  ;;  %1512 = vmatmul.msk.f32.gmra.mxu0 %vm211_vm1, %v199_v28  ;;  %v1090_v29 = vld [vmem:[%s1716_s6 + $0xfa] sm:$0xff] }
  0xd2   : > { %1623 = vmatmul.msk.f32.gmra.mxu3 %vm211_vm1, %v1085_v32  ;;  %1549 = vmatmul.msk.f32.gmra.mxu1 %vm211_vm1, %v788_v3 }
  0xd3   : > { %1398 = vst.msk [vmem:[%s1853_s14 + $0x38] sm:$0xff] %vm1390_vm2, %v1363_v33 }
  0xd4   : > { %v949_v35 = vpop.f32.mrf.mxu2 }
  0xd5   : > { %v1035_v36 = vadd.f32 %v949_v35, %v740_v34  ;;  %v1244_v37 = vpop.f32.mrf.mxu3 }
  0xd6   : > { %v362_v38 = vpop.f32.mrf.mxu0 }
  0xd7   : > { %v1330_v41 = vadd.f32 %v1244_v37, %v1035_v36  ;;  %v446_v42 = vadd.f32 %v1835_v58, %v362_v38  ;;  %v657_v43 = vpop.f32.mrf.mxu1  ;;  %v796_v36 = vld [vmem:[%s1716_s6 + $0x101] sm:$0xff]  ;;  %v205_v37 = vld [vmem:[%s1716_s6 + $0xf0] sm:$0xff] }
  0xd9   : > { %v1364_v45 = vmax.f32 %v1330_v41, 0.0  ;;  %1587 = vmatmul.msk.f32.gmra.mxu2 %vm211_vm1, %v791_v39  ;;  %v741_v46 = vadd.f32 %v657_v43, %v446_v42  ;;  %1513 = vmatmul.msk.f32.gmra.mxu0 %vm211_vm1, %v200_v40  ;;  %v1091_v41 = vld [vmem:[%s1716_s6 + $0x102] sm:$0xff] }
  0xda   : > { %1624 = vmatmul.msk.f32.gmra.mxu3 %vm211_vm1, %v1086_v44  ;;  %1550 = vmatmul.msk.f32.gmra.mxu1 %vm211_vm1, %v789_v15 }
  0xdb   : > { %1399 = vst.msk [vmem:[%s1853_s14 + $0x40] sm:$0xff] %vm1390_vm2, %v1364_v45 }
  0xdc   : > { %v952_v47 = vpop.f32.mrf.mxu2 }
  0xdd   : > { %v1036_v48 = vadd.f32 %v952_v47, %v741_v46  ;;  %v1247_v49 = vpop.f32.mrf.mxu3 }
  0xde   : > { %v365_v50 = vpop.f32.mrf.mxu0 }
  0xdf   : > { %v1331_v53 = vadd.f32 %v1247_v49, %v1036_v48  ;;  %v447_v54 = vadd.f32 %v1835_v58, %v365_v50  ;;  %v660_v55 = vpop.f32.mrf.mxu1  ;;  %v797_v48 = vld [vmem:[%s1716_s6 + $0x109] sm:$0xff]  ;;  %v206_v49 = vld [vmem:[%s1716_s6 + $0xf8] sm:$0xff] }
  0xe1   : > { %v1365_v57 = vmax.f32 %v1331_v53, 0.0  ;;  %1588 = vmatmul.msk.f32.gmra.mxu2 %vm211_vm1, %v792_v51  ;;  %v742_v59 = vadd.f32 %v660_v55, %v447_v54  ;;  %1514 = vmatmul.msk.f32.gmra.mxu0 %vm211_vm1, %v201_v52  ;;  %v1092_v53 = vld [vmem:[%s1716_s6 + $0x10a] sm:$0xff] }
  0xe2   : > { %1625 = vmatmul.msk.f32.gmra.mxu3 %vm211_vm1, %v1087_v56  ;;  %1551 = vmatmul.msk.f32.gmra.mxu1 %vm211_vm1, %v790_v27 }
  0xe3   : > { %1400 = vst.msk [vmem:[%s1853_s14 + $0x48] sm:$0xff] %vm1390_vm2, %v1365_v57 }
  0xe4   : > { %v955_v60 = vpop.f32.mrf.mxu2 }
  0xe5   : > { %v1037_v61 = vadd.f32 %v955_v60, %v742_v59  ;;  %v1250_v62 = vpop.f32.mrf.mxu3 }
  0xe6   : > { %v368_v63 = vpop.f32.mrf.mxu0 }
  0xe7   : > { %v1332_v2 = vadd.f32 %v1250_v62, %v1037_v61  ;;  %v448_v3 = vadd.f32 %v1835_v58, %v368_v63  ;;  %v663_v4 = vpop.f32.mrf.mxu1  ;;  %v798_v61 = vld [vmem:[%s1716_s6 + $0x111] sm:$0xff]  ;;  %v207_v62 = vld [vmem:[%s1716_s6 + $0x100] sm:$0xff] }
  0xe9   : > { %v1366_v6 = vmax.f32 %v1332_v2, 0.0  ;;  %1589 = vmatmul.msk.f32.gmra.mxu2 %vm211_vm1, %v793_v0  ;;  %v743_v7 = vadd.f32 %v663_v4, %v448_v3  ;;  %1515 = vmatmul.msk.f32.gmra.mxu0 %vm211_vm1, %v202_v1  ;;  %v1093_v2 = vld [vmem:[%s1716_s6 + $0x112] sm:$0xff] }
  0xea   : > { %1626 = vmatmul.msk.f32.gmra.mxu3 %vm211_vm1, %v1088_v5  ;;  %1552 = vmatmul.msk.f32.gmra.mxu1 %vm211_vm1, %v791_v39 }
  0xeb   : > { %1401 = vst.msk [vmem:[%s1853_s14 + $0x50] sm:$0xff] %vm1390_vm2, %v1366_v6 }
  0xec   : > { %v958_v8 = vpop.f32.mrf.mxu2 }
  0xed   : > { %v1038_v9 = vadd.f32 %v958_v8, %v743_v7  ;;  %v1253_v10 = vpop.f32.mrf.mxu3 }
  0xee   : > { %v371_v11 = vpop.f32.mrf.mxu0 }
  0xef   : > { %v1333_v14 = vadd.f32 %v1253_v10, %v1038_v9  ;;  %v449_v15 = vadd.f32 %v1835_v58, %v371_v11  ;;  %v666_v16 = vpop.f32.mrf.mxu1  ;;  %v799_v9 = vld [vmem:[%s1716_s6 + $0x119] sm:$0xff]  ;;  %v208_v10 = vld [vmem:[%s1716_s6 + $0x108] sm:$0xff] }
  0xf1   : > { %v1367_v18 = vmax.f32 %v1333_v14, 0.0  ;;  %1590 = vmatmul.msk.f32.gmra.mxu2 %vm211_vm1, %v794_v12  ;;  %v744_v19 = vadd.f32 %v666_v16, %v449_v15  ;;  %1516 = vmatmul.msk.f32.gmra.mxu0 %vm211_vm1, %v203_v13  ;;  %v1094_v14 = vld [vmem:[%s1716_s6 + $0x11a] sm:$0xff] }
  0xf2   : > { %1627 = vmatmul.msk.f32.gmra.mxu3 %vm211_vm1, %v1089_v17  ;;  %1553 = vmatmul.msk.f32.gmra.mxu1 %vm211_vm1, %v792_v51 }
  0xf3   : > { %1402 = vst.msk [vmem:[%s1853_s14 + $0x58] sm:$0xff] %vm1390_vm2, %v1367_v18 }
  0xf4   : > { %v961_v20 = vpop.f32.mrf.mxu2 }
  0xf5   : > { %v1039_v21 = vadd.f32 %v961_v20, %v744_v19  ;;  %v1256_v22 = vpop.f32.mrf.mxu3 }
  0xf6   : > { %v374_v23 = vpop.f32.mrf.mxu0 }
  0xf7   : > { %v1334_v26 = vadd.f32 %v1256_v22, %v1039_v21  ;;  %v450_v27 = vadd.f32 %v1835_v58, %v374_v23  ;;  %v669_v28 = vpop.f32.mrf.mxu1 }
  0xf9   : > { %v1368_v30 = vmax.f32 %v1334_v26, 0.0  ;;  %1591 = vmatmul.msk.f32.gmra.mxu2 %vm211_vm1, %v795_v24  ;;  %v745_v31 = vadd.f32 %v669_v28, %v450_v27  ;;  %1517 = vmatmul.msk.f32.gmra.mxu0 %vm211_vm1, %v204_v25 }
  0xfa   : > { %1628 = vmatmul.msk.f32.gmra.mxu3 %vm211_vm1, %v1090_v29  ;;  %1554 = vmatmul.msk.f32.gmra.mxu1 %vm211_vm1, %v793_v0 }
  0xfb   : > { %1403 = vst.msk [vmem:[%s1853_s14 + $0x60] sm:$0xff] %vm1390_vm2, %v1368_v30 }
  0xfc   : > { %v964_v32 = vpop.f32.mrf.mxu2 }
  0xfd   : > { %v1040_v33 = vadd.f32 %v964_v32, %v745_v31  ;;  %v1259_v34 = vpop.f32.mrf.mxu3 }
  0xfe   : > { %v377_v35 = vpop.f32.mrf.mxu0 }
  0xff   : > { %v1335_v38 = vadd.f32 %v1259_v34, %v1040_v33  ;;  %v451_v39 = vadd.f32 %v1835_v58, %v377_v35  ;;  %v672_v40 = vpop.f32.mrf.mxu1 }
 0x101   : > { %v1369_v42 = vmax.f32 %v1335_v38, 0.0  ;;  %1592 = vmatmul.msk.f32.gmra.mxu2 %vm211_vm1, %v796_v36  ;;  %v746_v43 = vadd.f32 %v672_v40, %v451_v39  ;;  %1518 = vmatmul.msk.f32.gmra.mxu0 %vm211_vm1, %v205_v37 }
 0x102   : > { %1629 = vmatmul.msk.f32.gmra.mxu3 %vm211_vm1, %v1091_v41  ;;  %1555 = vmatmul.msk.f32.gmra.mxu1 %vm211_vm1, %v794_v12 }
 0x103   : > { %1404 = vst.msk [vmem:[%s1853_s14 + $0x68] sm:$0xff] %vm1390_vm2, %v1369_v42 }
 0x104   : > { %v967_v44 = vpop.f32.mrf.mxu2 }
 0x105   : > { %v1041_v45 = vadd.f32 %v967_v44, %v746_v43  ;;  %v1262_v46 = vpop.f32.mrf.mxu3 }
 0x106   : > { %v380_v47 = vpop.f32.mrf.mxu0 }
 0x107   : > { %v1336_v50 = vadd.f32 %v1262_v46, %v1041_v45  ;;  %v452_v51 = vadd.f32 %v1835_v58, %v380_v47  ;;  %v675_v52 = vpop.f32.mrf.mxu1 }
 0x109   : > { %v1370_v54 = vmax.f32 %v1336_v50, 0.0  ;;  %1593 = vmatmul.msk.f32.gmra.mxu2 %vm211_vm1, %v797_v48  ;;  %v747_v55 = vadd.f32 %v675_v52, %v452_v51  ;;  %1519 = vmatmul.msk.f32.gmra.mxu0 %vm211_vm1, %v206_v49 }
 0x10a   : > { %1630 = vmatmul.msk.f32.gmra.mxu3 %vm211_vm1, %v1092_v53  ;;  %1556 = vmatmul.msk.f32.gmra.mxu1 %vm211_vm1, %v795_v24 }
 0x10b   : > { %1405 = vst.msk [vmem:[%s1853_s14 + $0x70] sm:$0xff] %vm1390_vm2, %v1370_v54 }
 0x10c   : > { %v970_v56 = vpop.f32.mrf.mxu2 }
 0x10d   : > { %v1042_v57 = vadd.f32 %v970_v56, %v747_v55  ;;  %v1265_v59 = vpop.f32.mrf.mxu3 }
 0x10e   : > { %v383_v60 = vpop.f32.mrf.mxu0 }
 0x10f   : > { %v1337_v63 = vadd.f32 %v1265_v59, %v1042_v57  ;;  %v453_v0 = vadd.f32 %v1835_v58, %v383_v60  ;;  %v678_v1 = vpop.f32.mrf.mxu1 }
 0x111   : > { %v1371_v3 = vmax.f32 %v1337_v63, 0.0  ;;  %1594 = vmatmul.msk.f32.gmra.mxu2 %vm211_vm1, %v798_v61  ;;  %v748_v4 = vadd.f32 %v678_v1, %v453_v0  ;;  %1520 = vmatmul.msk.f32.gmra.mxu0 %vm211_vm1, %v207_v62 }
 0x112   : > { %1631 = vmatmul.msk.f32.gmra.mxu3 %vm211_vm1, %v1093_v2  ;;  %1557 = vmatmul.msk.f32.gmra.mxu1 %vm211_vm1, %v796_v36 }
 0x113   : > { %1406 = vst.msk [vmem:[%s1853_s14 + $0x78] sm:$0xff] %vm1390_vm2, %v1371_v3 }
 0x114   : > { %v973_v5 = vpop.f32.mrf.mxu2 }
 0x115   : > { %v1043_v6 = vadd.f32 %v973_v5, %v748_v4  ;;  %v1268_v7 = vpop.f32.mrf.mxu3 }
 0x116   : > { %v386_v8 = vpop.f32.mrf.mxu0 }
 0x117   : > { %v1338_v11 = vadd.f32 %v1268_v7, %v1043_v6  ;;  %v454_v12 = vadd.f32 %v1835_v58, %v386_v8  ;;  %v681_v13 = vpop.f32.mrf.mxu1 }
 0x119   : > { %v1372_v15 = vmax.f32 %v1338_v11, 0.0  ;;  %1595 = vmatmul.msk.f32.gmra.mxu2 %vm211_vm1, %v799_v9  ;;  %v749_v16 = vadd.f32 %v681_v13, %v454_v12  ;;  %1521 = vmatmul.msk.f32.gmra.mxu0 %vm211_vm1, %v208_v10 }
 0x11a   : > { %1632 = vmatmul.msk.f32.gmra.mxu3 %vm211_vm1, %v1094_v14  ;;  %1558 = vmatmul.msk.f32.gmra.mxu1 %vm211_vm1, %v797_v48 }
 0x11b   : > { %1407 = vst.msk [vmem:[%s1853_s14 + $0x80] sm:$0xff] %vm1390_vm2, %v1372_v15 }
 0x11c   : > { %v976_v17 = vpop.f32.mrf.mxu2 }
 0x11d   : > { %v1044_v18 = vadd.f32 %v976_v17, %v749_v16  ;;  %v1271_v19 = vpop.f32.mrf.mxu3 }
 0x11e   : > { %v389_v20 = vpop.f32.mrf.mxu0 }
 0x11f   : > { %v1339_v21 = vadd.f32 %v1271_v19, %v1044_v18  ;;  %v455_v22 = vadd.f32 %v1835_v58, %v389_v20  ;;  %v684_v23 = vpop.f32.mrf.mxu1 }
 0x121   : > { %v1373_v24 = vmax.f32 %v1339_v21, 0.0  ;;  %v750_v25 = vadd.f32 %v684_v23, %v455_v22 }
 0x123   : > { %1408 = vst.msk [vmem:[%s1853_s14 + $0x88] sm:$0xff] %vm1390_vm2, %v1373_v24 }
 0x124   : > { %v979_v26 = vpop.f32.mrf.mxu2 }
 0x125   : > { %v1045_v27 = vadd.f32 %v979_v26, %v750_v25  ;;  %v1274_v28 = vpop.f32.mrf.mxu3 }
 0x126   : > { %v392_v29 = vpop.f32.mrf.mxu0 }
 0x127   : > { %v1340_v30 = vadd.f32 %v1274_v28, %v1045_v27  ;;  %v456_v31 = vadd.f32 %v1835_v58, %v392_v29  ;;  %v687_v32 = vpop.f32.mrf.mxu1 }
 0x129   : > { %v1374_v33 = vmax.f32 %v1340_v30, 0.0  ;;  %v751_v34 = vadd.f32 %v687_v32, %v456_v31 }
 0x12b   : > { %1409 = vst.msk [vmem:[%s1853_s14 + $0x90] sm:$0xff] %vm1390_vm2, %v1374_v33 }
 0x12c   : > { %v982_v35 = vpop.f32.mrf.mxu2 }
 0x12d   : > { %v1046_v36 = vadd.f32 %v982_v35, %v751_v34  ;;  %v1277_v37 = vpop.f32.mrf.mxu3 }
 0x12e   : > { %v395_v38 = vpop.f32.mrf.mxu0 }
 0x12f   : > { %v1341_v39 = vadd.f32 %v1277_v37, %v1046_v36  ;;  %v457_v40 = vadd.f32 %v1835_v58, %v395_v38  ;;  %v690_v41 = vpop.f32.mrf.mxu1 }
 0x131   : > { %v1375_v42 = vmax.f32 %v1341_v39, 0.0  ;;  %v752_v43 = vadd.f32 %v690_v41, %v457_v40 }
 0x133   : > { %1410 = vst.msk [vmem:[%s1853_s14 + $0x98] sm:$0xff] %vm1390_vm2, %v1375_v42 }
 0x134   : > { %v985_v44 = vpop.f32.mrf.mxu2 }
 0x135   : > { %v1047_v45 = vadd.f32 %v985_v44, %v752_v43  ;;  %v1280_v46 = vpop.f32.mrf.mxu3 }
 0x136   : > { %v398_v47 = vpop.f32.mrf.mxu0 }
 0x137   : > { %v1342_v48 = vadd.f32 %v1280_v46, %v1047_v45  ;;  %v458_v49 = vadd.f32 %v1835_v58, %v398_v47  ;;  %v693_v50 = vpop.f32.mrf.mxu1 }
 0x139   : > { %v1376_v51 = vmax.f32 %v1342_v48, 0.0  ;;  %v753_v52 = vadd.f32 %v693_v50, %v458_v49 }
 0x13b   : > { %1411 = vst.msk [vmem:[%s1853_s14 + $0xa0] sm:$0xff] %vm1390_vm2, %v1376_v51 }
 0x13c   : > { %v988_v53 = vpop.f32.mrf.mxu2 }
 0x13d   : > { %v1048_v54 = vadd.f32 %v988_v53, %v753_v52  ;;  %v1283_v55 = vpop.f32.mrf.mxu3 }
 0x13e   : > { %v401_v56 = vpop.f32.mrf.mxu0 }
 0x13f   : > { %v1343_v57 = vadd.f32 %v1283_v55, %v1048_v54  ;;  %v459_v59 = vadd.f32 %v1835_v58, %v401_v56  ;;  %v696_v60 = vpop.f32.mrf.mxu1 }
 0x141   : > { %v1377_v61 = vmax.f32 %v1343_v57, 0.0  ;;  %v754_v62 = vadd.f32 %v696_v60, %v459_v59 }
 0x143   : > { %1412 = vst.msk [vmem:[%s1853_s14 + $0xa8] sm:$0xff] %vm1390_vm2, %v1377_v61 }
 0x144   : > { %v991_v63 = vpop.f32.mrf.mxu2 }
 0x145   : > { %v1049_v0 = vadd.f32 %v991_v63, %v754_v62  ;;  %v1286_v1 = vpop.f32.mrf.mxu3 }
 0x146   : > { %v404_v2 = vpop.f32.mrf.mxu0 }
 0x147   : > { %v1344_v3 = vadd.f32 %v1286_v1, %v1049_v0  ;;  %v460_v4 = vadd.f32 %v1835_v58, %v404_v2  ;;  %v699_v5 = vpop.f32.mrf.mxu1 }
 0x149   : > { %v1378_v6 = vmax.f32 %v1344_v3, 0.0  ;;  %v755_v7 = vadd.f32 %v699_v5, %v460_v4 }
 0x14b   : > { %1413 = vst.msk [vmem:[%s1853_s14 + $0xb0] sm:$0xff] %vm1390_vm2, %v1378_v6 }
 0x14c   : > { %v994_v8 = vpop.f32.mrf.mxu2 }
 0x14d   : > { %v1050_v9 = vadd.f32 %v994_v8, %v755_v7  ;;  %v1289_v10 = vpop.f32.mrf.mxu3 }
 0x14e   : > { %v407_v11 = vpop.f32.mrf.mxu0 }
 0x14f   : > { %v1345_v12 = vadd.f32 %v1289_v10, %v1050_v9  ;;  %v461_v13 = vadd.f32 %v1835_v58, %v407_v11  ;;  %v702_v14 = vpop.f32.mrf.mxu1 }
 0x151   : > { %v1379_v15 = vmax.f32 %v1345_v12, 0.0  ;;  %v756_v16 = vadd.f32 %v702_v14, %v461_v13 }
 0x153   : > { %1414 = vst.msk [vmem:[%s1853_s14 + $0xb8] sm:$0xff] %vm1390_vm2, %v1379_v15 }
 0x154   : > { %v997_v17 = vpop.f32.mrf.mxu2 }
 0x155   : > { %v1051_v18 = vadd.f32 %v997_v17, %v756_v16  ;;  %v1292_v19 = vpop.f32.mrf.mxu3 }
 0x156   : > { %v410_v20 = vpop.f32.mrf.mxu0 }
 0x157   : > { %v1346_v21 = vadd.f32 %v1292_v19, %v1051_v18  ;;  %v462_v22 = vadd.f32 %v1835_v58, %v410_v20  ;;  %v705_v23 = vpop.f32.mrf.mxu1 }
 0x159   : > { %v1380_v24 = vmax.f32 %v1346_v21, 0.0  ;;  %v757_v25 = vadd.f32 %v705_v23, %v462_v22 }
 0x15b   : > { %1415 = vst.msk [vmem:[%s1853_s14 + $0xc0] sm:$0xff] %vm1390_vm2, %v1380_v24 }
 0x15c   : > { %v1000_v26 = vpop.f32.mrf.mxu2 }
 0x15d   : > { %v1052_v27 = vadd.f32 %v1000_v26, %v757_v25  ;;  %v1295_v28 = vpop.f32.mrf.mxu3 }
 0x15e   : > { %v413_v29 = vpop.f32.mrf.mxu0 }
 0x15f   : > { %v1347_v30 = vadd.f32 %v1295_v28, %v1052_v27  ;;  %v463_v31 = vadd.f32 %v1835_v58, %v413_v29  ;;  %v708_v32 = vpop.f32.mrf.mxu1 }
 0x161   : > { %v1381_v33 = vmax.f32 %v1347_v30, 0.0  ;;  %v758_v34 = vadd.f32 %v708_v32, %v463_v31 }
 0x163   : > { %1416 = vst.msk [vmem:[%s1853_s14 + $0xc8] sm:$0xff] %vm1390_vm2, %v1381_v33 }
 0x164   : > { %v1003_v35 = vpop.f32.mrf.mxu2 }
 0x165   : > { %v1053_v36 = vadd.f32 %v1003_v35, %v758_v34  ;;  %v1298_v37 = vpop.f32.mrf.mxu3 }
 0x166   : > { %v416_v38 = vpop.f32.mrf.mxu0 }
 0x167   : > { %v1348_v39 = vadd.f32 %v1298_v37, %v1053_v36  ;;  %v464_v40 = vadd.f32 %v1835_v58, %v416_v38  ;;  %v711_v41 = vpop.f32.mrf.mxu1 }
 0x169   : > { %v1382_v42 = vmax.f32 %v1348_v39, 0.0  ;;  %v759_v43 = vadd.f32 %v711_v41, %v464_v40 }
 0x16b   : > { %1417 = vst.msk [vmem:[%s1853_s14 + $0xd0] sm:$0xff] %vm1390_vm2, %v1382_v42 }
 0x16c   : > { %v1006_v44 = vpop.f32.mrf.mxu2 }
 0x16d   : > { %v1054_v45 = vadd.f32 %v1006_v44, %v759_v43  ;;  %v1301_v46 = vpop.f32.mrf.mxu3 }
 0x16e   : > { %v419_v47 = vpop.f32.mrf.mxu0 }
 0x16f   : > { %v1349_v48 = vadd.f32 %v1301_v46, %v1054_v45  ;;  %v465_v49 = vadd.f32 %v1835_v58, %v419_v47  ;;  %v714_v50 = vpop.f32.mrf.mxu1 }
 0x171   : > { %v1383_v51 = vmax.f32 %v1349_v48, 0.0  ;;  %v760_v52 = vadd.f32 %v714_v50, %v465_v49 }
 0x173   : > { %1418 = vst.msk [vmem:[%s1853_s14 + $0xd8] sm:$0xff] %vm1390_vm2, %v1383_v51 }
 0x174   : > { %v1009_v53 = vpop.f32.mrf.mxu2 }
 0x175   : > { %v1055_v54 = vadd.f32 %v1009_v53, %v760_v52  ;;  %v1304_v55 = vpop.f32.mrf.mxu3 }
 0x176   : > { %v422_v56 = vpop.f32.mrf.mxu0 }
 0x177   : > { %v1350_v57 = vadd.f32 %v1304_v55, %v1055_v54  ;;  %v466_v59 = vadd.f32 %v1835_v58, %v422_v56  ;;  %v717_v60 = vpop.f32.mrf.mxu1 }
 0x179   : > { %v1384_v61 = vmax.f32 %v1350_v57, 0.0  ;;  %v761_v62 = vadd.f32 %v717_v60, %v466_v59 }
 0x17b   : > { %1419 = vst.msk [vmem:[%s1853_s14 + $0xe0] sm:$0xff] %vm1390_vm2, %v1384_v61 }
 0x17c   : > { %v1012_v63 = vpop.f32.mrf.mxu2 }
 0x17d   : > { %v1056_v0 = vadd.f32 %v1012_v63, %v761_v62  ;;  %v1307_v1 = vpop.f32.mrf.mxu3 }
 0x17e   : > { %v425_v2 = vpop.f32.mrf.mxu0 }
 0x17f   : > { %v1351_v3 = vadd.f32 %v1307_v1, %v1056_v0  ;;  %v467_v4 = vadd.f32 %v1835_v58, %v425_v2  ;;  %v720_v5 = vpop.f32.mrf.mxu1 }
 0x181   : > { %v1385_v6 = vmax.f32 %v1351_v3, 0.0  ;;  %v762_v7 = vadd.f32 %v720_v5, %v467_v4 }
 0x183   : > { %1420 = vst.msk [vmem:[%s1853_s14 + $0xe8] sm:$0xff] %vm1390_vm2, %v1385_v6 }
 0x184   : > { %v1015_v8 = vpop.f32.mrf.mxu2 }
 0x185   : > { %v1057_v9 = vadd.f32 %v1015_v8, %v762_v7  ;;  %v1310_v10 = vpop.f32.mrf.mxu3 }
 0x186   : > { %v428_v11 = vpop.f32.mrf.mxu0 }
 0x187   : > { %v1352_v12 = vadd.f32 %v1310_v10, %v1057_v9  ;;  %v468_v13 = vadd.f32 %v1835_v58, %v428_v11  ;;  %v723_v14 = vpop.f32.mrf.mxu1 }
 0x189   : > { %v1386_v15 = vmax.f32 %v1352_v12, 0.0  ;;  %v763_v16 = vadd.f32 %v723_v14, %v468_v13 }
 0x18b   : > { %1421 = vst.msk [vmem:[%s1853_s14 + $0xf0] sm:$0xff] %vm1390_vm2, %v1386_v15 }
 0x18c   : > { %v1018_v17 = vpop.f32.mrf.mxu2 }
 0x18d   : > { %v1058_v18 = vadd.f32 %v1018_v17, %v763_v16  ;;  %v1313_v19 = vpop.f32.mrf.mxu3 }
 0x18e   : > { %v431_v20 = vpop.f32.mrf.mxu0 }
 0x18f   : > { %v1353_v21 = vadd.f32 %v1313_v19, %v1058_v18  ;;  %v469_v22 = vadd.f32 %v1835_v58, %v431_v20  ;;  %v726_v23 = vpop.f32.mrf.mxu1 }
 0x191   : > { %v1387_v24 = vmax.f32 %v1353_v21, 0.0  ;;  %v764_v25 = vadd.f32 %v726_v23, %v469_v22 }
 0x193   : > { %1422 = vst.msk [vmem:[%s1853_s14 + $0xf8] sm:$0xff] %vm1390_vm2, %v1387_v24 }
 0x194   : > { %v1021_v26 = vpop.f32.mrf.mxu2 }
 0x195   : > { %v1059_v27 = vadd.f32 %v1021_v26, %v764_v25  ;;  %v1316_v28 = vpop.f32.mrf.mxu3 }
 0x196   : > { %v434_v29 = vpop.f32.mrf.mxu0 }
 0x197   : > { %v1354_v30 = vadd.f32 %v1316_v28, %v1059_v27  ;;  %v470_v31 = vadd.f32 %v1835_v58, %v434_v29  ;;  %v729_v32 = vpop.f32.mrf.mxu1 }
 0x199   : > { %v1388_v33 = vmax.f32 %v1354_v30, 0.0  ;;  %v765_v34 = vadd.f32 %v729_v32, %v470_v31 }
 0x19b   : > { %1423 = vst.msk [vmem:[%s1853_s14 + $0x100] sm:$0xff] %vm1390_vm2, %v1388_v33 }
 0x19c   : > { %v1024_v35 = vpop.f32.mrf.mxu2 }
 0x19d   : > { %v1060_v36 = vadd.f32 %v1024_v35, %v765_v34  ;;  %v1319_v37 = vpop.f32.mrf.mxu3 }
 0x19f   : > { %v1355_v38 = vadd.f32 %v1319_v37, %v1060_v36 }
 0x1a1   : > { %v1389_v39 = vmax.f32 %v1355_v38, 0.0 }
 0x1a3   : > { %1424 = vst.msk [vmem:[%s1853_s14 + $0x108] sm:$0xff] %vm1390_vm2, %v1389_v39 }
 0x1a4 PF: > { %s13_s12 = sadd.s32 1, %s1652_s12  }
 0x1a5   : > { %p10_p4 = scmp.ge.s32.totalorder %s13_s12, 4  }
 0x1a7   :  { %12 = sbr.rel (!%p10_p4) target bundleno = 1 (0x1), region = 65 }

// kernel: cnnae_forward.7
= control target key start
LH: loop header
LB: loop body
LE: loop exit
PB: predicated region body
PF: predicated region fallthrough
CT: control target
= control target key end

     0   :  { %s749_s12 = smov 0   ;;  %s966_s0 = inlined_call_operand.vmem [shape: f32[2,89,64], index: 0, kind: input, shape index: {}]   ;;  %s967_s1 = inlined_call_operand.vmem [shape: f32[4,64,16], index: 1, kind: input, shape index: {}]   ;;  %s968_s2 = inlined_call_operand.vmem [shape: f32[1,16], index: 2, kind: input, shape index: {}]   ;;  %s969_s3 = inlined_call_operand.vmem [shape: f32[2,72,16], index: 3, kind: output, shape index: {}]  }
   0x1 LB: > { %s641_s13 = sadd.s32 4294967295, %s727_s12   ;;  %p645_p0 = scmp.ge.s32.totalorder %s727_s12, 1  ;;  %s727_s12 = sphi %s749_s12, %s13_s12  }
   0x2   : > { %p137_p1 = scmp.lt.s32.totalorder %s727_s12, 3 }
   0x4   : > { %p138_p2 = pnand %p645_p0, %p137_p1 }
   0x5   : > { %p161_p3 = scmp.lt.s32.totalorder (!%p138_p2), %s641_s13, 1 }
   0x6   : > { %141 = sbr.rel (%p138_p2) target bundleno = 231 (0xe7), region = 32 }
   0xb   : > { %v681_v0 = vld [vmem:[%s967_s1 + $0xb8] sm:$0xff]  ;;  %v680_v2 = vld [vmem:[%s967_s1 + $0xb0] sm:$0xff]  ;;  %v679_v6 = vld [vmem:[%s967_s1 + $0xa8] sm:$0xff]  ;;  %s971_s13 = smov (!%p161_p3, %s641_s13), 1  ;;  %vm192_vm0 = vcmask 523264   ;;  %vm576_vm1 = vcmask 130048  }
   0xc   : > { %v191_v1 = vld [vmem:[%s967_s1 + $0x38] sm:$0xff]  ;;  %424 = vmatpush.msra.mxu2 %v681_v0  ;;  %v190_v4 = vld [vmem:[%s967_s1 + $0x30] sm:$0xff]  ;;  %v189_v8 = vld [vmem:[%s967_s1 + $0x28] sm:$0xff]  ;;  %s710_s25 = smul.u32 96, %s971_s13 }
   0xd   : > { %228 = vmatpush.msra.mxu0 %v191_v1  ;;  %v698_v3 = vld [vmem:[%s967_s1 + $0xf8] sm:$0xff]  ;;  %v697_v7 = vld [vmem:[%s967_s1 + $0xf0] sm:$0xff]  ;;  %v696_v10 = vld [vmem:[%s967_s1 + $0xe8] sm:$0xff]  ;;  %s711_s7 = smul.u32 72, %s971_s13 }
   0xe   : > { %v664_v5 = vld [vmem:[%s967_s1 + $0x78] sm:$0xff]  ;;  %522 = vmatpush.msra.mxu3 %v698_v3  ;;  %425 = vmatpush.msra.mxu2 %v680_v2  ;;  %v663_v9 = vld [vmem:[%s967_s1 + $0x70] sm:$0xff]  ;;  %v678_v11 = vld [vmem:[%s967_s1 + $0xa0] sm:$0xff]  ;;  %s841_s19 = scalar_lea.vmem %s966_s0, %s710_s25 }
   0xf   : > { %326 = vmatpush.msra.mxu1 %v664_v5  ;;  %229 = vmatpush.msra.mxu0 %v190_v4  ;;  %v188_v12 = vld [vmem:[%s967_s1 + $0x20] sm:$0xff]  ;;  %v662_v13 = vld [vmem:[%s967_s1 + $0x68] sm:$0xff]  ;;  %v677_v16 = vld [vmem:[%s967_s1 + $0x98] sm:$0xff]  ;;  %s935_s10 = scalar_lea.vmem %s969_s3, %s711_s7 }
  0x10   : > { %523 = vmatpush.msra.mxu3 %v697_v7  ;;  %426 = vmatpush.msra.mxu2 %v679_v6  ;;  %v695_v14 = vld [vmem:[%s967_s1 + $0xe0] sm:$0xff]  ;;  %v187_v17 = vld [vmem:[%s967_s1 + $0x18] sm:$0xff]  ;;  %v676_v20 = vld [vmem:[%s967_s1 + $0x90] sm:$0xff] }
  0x11   : > { %327 = vmatpush.msra.mxu1 %v663_v9  ;;  %230 = vmatpush.msra.mxu0 %v189_v8  ;;  %v661_v15 = vld [vmem:[%s967_s1 + $0x60] sm:$0xff]  ;;  %v694_v18 = vld [vmem:[%s967_s1 + $0xd8] sm:$0xff]  ;;  %v186_v21 = vld [vmem:[%s967_s1 + $0x10] sm:$0xff] }
  0x12   : > { %524 = vmatpush.msra.mxu3 %v696_v10  ;;  %427 = vmatpush.msra.mxu2 %v678_v11  ;;  %v660_v19 = vld [vmem:[%s967_s1 + $0x58] sm:$0xff]  ;;  %v693_v22 = vld [vmem:[%s967_s1 + $0xd0] sm:$0xff]  ;;  %v675_v24 = vld [vmem:[%s967_s1 + $0x88] sm:$0xff] }
  0x13   : > { %328 = vmatpush.msra.mxu1 %v662_v13  ;;  %231 = vmatpush.msra.mxu0 %v188_v12  ;;  %v659_v23 = vld [vmem:[%s967_s1 + $0x50] sm:$0xff]  ;;  %v185_v25 = vld [vmem:[%s967_s1 + $0x8] sm:$0xff]  ;;  %v674_v28 = vld [vmem:[%s967_s1 + $0x80] sm:$0xff] }
  0x14   : > { %525 = vmatpush.msra.mxu3 %v695_v14  ;;  %428 = vmatpush.msra.mxu2 %v677_v16  ;;  %v692_v26 = vld [vmem:[%s967_s1 + $0xc8] sm:$0xff]  ;;  %v184_v29 = vld [vmem:[%s967_s1] sm:$0xff]  ;;  %v372_v36 = vld [vmem:[%s841_s19 + $0x11] sm:$0xff] }
  0x15   : > { %329 = vmatpush.msra.mxu1 %v661_v15  ;;  %232 = vmatpush.msra.mxu0 %v187_v17  ;;  %v658_v27 = vld [vmem:[%s967_s1 + $0x48] sm:$0xff]  ;;  %v691_v31 = vld [vmem:[%s967_s1 + $0xc0] sm:$0xff]  ;;  %v470_v38 = vld [vmem:[%s841_s19 + $0x12] sm:$0xff] }
  0x16   : > { %526 = vmatpush.msra.mxu3 %v694_v18  ;;  %429 = vmatpush.msra.mxu2 %v676_v20  ;;  %v371_v30 = vld [vmem:[%s841_s19 + $0x9] sm:$0xff]  ;;  %v175_v32 = vld [vmem:[%s841_s19] sm:$0xff]  ;;  %v178_v43 = vld [vmem:[%s841_s19 + $0x18] sm:$0xff] }
  0x17   : > { %330 = vmatpush.msra.mxu1 %v660_v19  ;;  %233 = vmatpush.msra.mxu0 %v186_v21  ;;  %v469_v33 = vld [vmem:[%s841_s19 + $0xa] sm:$0xff]  ;;  %v657_v34 = vld [vmem:[%s967_s1 + $0x40] sm:$0xff]  ;;  %v474_v50 = vld [vmem:[%s841_s19 + $0x32] sm:$0xff] }
  0x18   : > { %527 = vmatpush.msra.mxu3 %v693_v22  ;;  %430 = vmatpush.msra.mxu2 %v675_v24  ;;  %v273_v35 = vld [vmem:[%s841_s19 + $0x1] sm:$0xff]  ;;  %v373_v39 = vld [vmem:[%s841_s19 + $0x19] sm:$0xff]  ;;  %v177_v40 = vld [vmem:[%s841_s19 + $0x10] sm:$0xff] }
  0x19   : > { %331 = vmatpush.msra.mxu1 %v659_v23  ;;  %234 = vmatpush.msra.mxu0 %v185_v25  ;;  %v176_v37 = vld [vmem:[%s841_s19 + $0x8] sm:$0xff]  ;;  %v471_v41 = vld [vmem:[%s841_s19 + $0x1a] sm:$0xff]  ;;  %v376_v48 = vld [vmem:[%s841_s19 + $0x31] sm:$0xff] }
  0x1a   : > { %528 = vmatpush.msra.mxu3 %v692_v26  ;;  %431 = vmatpush.msra.mxu2 %v674_v28  ;;  %v374_v42 = vld [vmem:[%s841_s19 + $0x21] sm:$0xff]  ;;  %v375_v45 = vld [vmem:[%s841_s19 + $0x29] sm:$0xff]  ;;  %v377_v51 = vld [vmem:[%s841_s19 + $0x39] sm:$0xff] }
  0x1b   : > { %332 = vmatpush.msra.mxu1 %v658_v27  ;;  %235 = vmatpush.msra.mxu0 %v184_v29  ;;  %v472_v44 = vld [vmem:[%s841_s19 + $0x22] sm:$0xff]  ;;  %v473_v47 = vld [vmem:[%s841_s19 + $0x2a] sm:$0xff]  ;;  %v475_v53 = vld [vmem:[%s841_s19 + $0x3a] sm:$0xff] }
  0x1c   : > { %682 = vmatmul.msk.f32.vlgmr.msra.gmra.mxu2 %vm192_vm0, %v371_v30  ;;  %529 = vmatpush.msra.mxu3 %v691_v31  ;;  %v179_v46 = vld [vmem:[%s841_s19 + $0x20] sm:$0xff]  ;;  %v180_v49 = vld [vmem:[%s841_s19 + $0x28] sm:$0xff]  ;;  %v181_v52 = vld [vmem:[%s841_s19 + $0x30] sm:$0xff] }
  0x1d   : > { %648 = vmatmul.msk.f32.vlgmr.msra.gmra.mxu0 %vm192_vm0, %v175_v32  ;;  %699 = vmatmul.msk.f32.vlgmr.msra.gmra.mxu3 %vm192_vm0, %v469_v33  ;;  %v378_v54 = vld [vmem:[%s841_s19 + $0x41] sm:$0xff]  ;;  %v182_v55 = vld [vmem:[%s841_s19 + $0x38] sm:$0xff]  ;;  %v379_v57 = vld [vmem:[%s841_s19 + $0x49] sm:$0xff] }
  0x1e   : > { %333 = vmatpush.msra.mxu1 %v657_v34  ;;  %v476_v56 = vld [vmem:[%s841_s19 + $0x42] sm:$0xff]  ;;  %v477_v59 = vld [vmem:[%s841_s19 + $0x4a] sm:$0xff]  ;;  %v928_v60 = vld [vmem:[%s968_s2] ss:$0 sm:$0xff] }
  0x1f   : > { %665 = vmatmul.msk.f32.vlgmr.msra.gmra.mxu1 %vm192_vm0, %v273_v35  ;;  %v183_v58 = vld [vmem:[%s841_s19 + $0x40] sm:$0xff] }
  0x24   : > { %683 = vmatmul.msk.f32.gmra.mxu2 %vm192_vm0, %v372_v36 }
  0x25   : > { %649 = vmatmul.msk.f32.gmra.mxu0 %vm192_vm0, %v176_v37  ;;  %700 = vmatmul.msk.f32.gmra.mxu3 %vm192_vm0, %v470_v38 }
  0x27   : > { %666 = vmatmul.msk.f32.gmra.mxu1 %vm192_vm0, %v371_v30 }
  0x2c   : > { %684 = vmatmul.msk.f32.gmra.mxu2 %vm192_vm0, %v373_v39 }
  0x2d   : > { %650 = vmatmul.msk.f32.gmra.mxu0 %vm192_vm0, %v177_v40  ;;  %701 = vmatmul.msk.f32.gmra.mxu3 %vm192_vm0, %v471_v41 }
  0x2f   : > { %667 = vmatmul.msk.f32.gmra.mxu1 %vm192_vm0, %v372_v36 }
  0x34   : > { %685 = vmatmul.msk.f32.gmra.mxu2 %vm192_vm0, %v374_v42 }
  0x35   : > { %651 = vmatmul.msk.f32.gmra.mxu0 %vm192_vm0, %v178_v43  ;;  %702 = vmatmul.msk.f32.gmra.mxu3 %vm192_vm0, %v472_v44 }
  0x37   : > { %668 = vmatmul.msk.f32.gmra.mxu1 %vm192_vm0, %v373_v39 }
  0x3c   : > { %686 = vmatmul.msk.f32.gmra.mxu2 %vm192_vm0, %v375_v45 }
  0x3d   : > { %652 = vmatmul.msk.f32.gmra.mxu0 %vm192_vm0, %v179_v46  ;;  %703 = vmatmul.msk.f32.gmra.mxu3 %vm192_vm0, %v473_v47 }
  0x3f   : > { %669 = vmatmul.msk.f32.gmra.mxu1 %vm192_vm0, %v374_v42 }
  0x44   : > { %687 = vmatmul.msk.f32.gmra.mxu2 %vm192_vm0, %v376_v48 }
  0x45   : > { %653 = vmatmul.msk.f32.gmra.mxu0 %vm192_vm0, %v180_v49  ;;  %704 = vmatmul.msk.f32.gmra.mxu3 %vm192_vm0, %v474_v50 }
  0x47   : > { %670 = vmatmul.msk.f32.gmra.mxu1 %vm192_vm0, %v375_v45 }
  0x4c   : > { %688 = vmatmul.msk.f32.gmra.mxu2 %vm192_vm0, %v377_v51 }
  0x4d   : > { %654 = vmatmul.msk.f32.gmra.mxu0 %vm192_vm0, %v181_v52  ;;  %705 = vmatmul.msk.f32.gmra.mxu3 %vm192_vm0, %v475_v53 }
  0x4f   : > { %671 = vmatmul.msk.f32.gmra.mxu1 %vm192_vm0, %v376_v48 }
  0x54   : > { %689 = vmatmul.msk.f32.gmra.mxu2 %vm192_vm0, %v378_v54 }
  0x55   : > { %655 = vmatmul.msk.f32.gmra.mxu0 %vm192_vm0, %v182_v55  ;;  %706 = vmatmul.msk.f32.gmra.mxu3 %vm192_vm0, %v476_v56 }
  0x57   : > { %672 = vmatmul.msk.f32.gmra.mxu1 %vm192_vm0, %v377_v51 }
  0x5c   : > { %690 = vmatmul.msk.f32.gmra.mxu2 %vm192_vm0, %v379_v57 }
  0x5d   : > { %656 = vmatmul.msk.f32.gmra.mxu0 %vm192_vm0, %v183_v58  ;;  %707 = vmatmul.msk.f32.gmra.mxu3 %vm192_vm0, %v477_v59 }
  0x5f   : > { %673 = vmatmul.msk.f32.gmra.mxu1 %vm192_vm0, %v378_v54 }
  0x9a   : > { %v237_v61 = vpop.f32.mrf.mxu0 }
  0x9b   : > { %v264_v62 = vadd.f32 %v928_v60, %v237_v61 }
  0x9c   : > { %v335_v63 = vpop.f32.mrf.mxu1 }
  0x9d   : > { %v362_v0 = vadd.f32 %v335_v63, %v264_v62 }
  0x9f   : > { %v433_v1 = vpop.f32.mrf.mxu2 }
  0xa0   : > { %v460_v2 = vadd.f32 %v433_v1, %v362_v0  ;;  %v531_v3 = vpop.f32.mrf.mxu3 }
  0xa2   : > { %v558_v4 = vadd.f32 %v531_v3, %v460_v2  ;;  %v240_v5 = vpop.f32.mrf.mxu0 }
  0xa3   : > { %v265_v6 = vadd.f32 %v928_v60, %v240_v5 }
  0xa4   : > { %v567_v7 = vmax.f32 %v558_v4, 0.0  ;;  %v338_v8 = vpop.f32.mrf.mxu1 }
  0xa5   : > { %v363_v9 = vadd.f32 %v338_v8, %v265_v6 }
  0xa6   : > { %577 = vst.msk [vmem:[%s935_s10] sm:$0xff] %vm576_vm1, %v567_v7 }
  0xa7   : > { %v436_v10 = vpop.f32.mrf.mxu2 }
  0xa8   : > { %v461_v11 = vadd.f32 %v436_v10, %v363_v9  ;;  %v534_v12 = vpop.f32.mrf.mxu3 }
  0xaa   : > { %v559_v13 = vadd.f32 %v534_v12, %v461_v11  ;;  %v243_v14 = vpop.f32.mrf.mxu0 }
  0xab   : > { %v266_v15 = vadd.f32 %v928_v60, %v243_v14 }
  0xac   : > { %v568_v16 = vmax.f32 %v559_v13, 0.0  ;;  %v341_v17 = vpop.f32.mrf.mxu1 }
  0xad   : > { %v364_v18 = vadd.f32 %v341_v17, %v266_v15 }
  0xae   : > { %578 = vst.msk [vmem:[%s935_s10 + $0x8] sm:$0xff] %vm576_vm1, %v568_v16 }
  0xaf   : > { %v439_v19 = vpop.f32.mrf.mxu2 }
  0xb0   : > { %v462_v20 = vadd.f32 %v439_v19, %v364_v18  ;;  %v537_v21 = vpop.f32.mrf.mxu3 }
  0xb2   : > { %v560_v22 = vadd.f32 %v537_v21, %v462_v20  ;;  %v246_v23 = vpop.f32.mrf.mxu0 }
  0xb3   : > { %v267_v24 = vadd.f32 %v928_v60, %v246_v23 }
  0xb4   : > { %v569_v25 = vmax.f32 %v560_v22, 0.0  ;;  %v344_v26 = vpop.f32.mrf.mxu1 }
  0xb5   : > { %v365_v27 = vadd.f32 %v344_v26, %v267_v24 }
  0xb6   : > { %579 = vst.msk [vmem:[%s935_s10 + $0x10] sm:$0xff] %vm576_vm1, %v569_v25 }
  0xb7   : > { %v442_v28 = vpop.f32.mrf.mxu2 }
  0xb8   : > { %v463_v29 = vadd.f32 %v442_v28, %v365_v27  ;;  %v540_v30 = vpop.f32.mrf.mxu3 }
  0xba   : > { %v561_v31 = vadd.f32 %v540_v30, %v463_v29  ;;  %v249_v32 = vpop.f32.mrf.mxu0 }
  0xbb   : > { %v268_v33 = vadd.f32 %v928_v60, %v249_v32 }
  0xbc   : > { %v570_v34 = vmax.f32 %v561_v31, 0.0  ;;  %v347_v35 = vpop.f32.mrf.mxu1 }
  0xbd   : > { %v366_v36 = vadd.f32 %v347_v35, %v268_v33 }
  0xbe   : > { %580 = vst.msk [vmem:[%s935_s10 + $0x18] sm:$0xff] %vm576_vm1, %v570_v34 }
  0xbf   : > { %v445_v37 = vpop.f32.mrf.mxu2 }
  0xc0   : > { %v464_v38 = vadd.f32 %v445_v37, %v366_v36  ;;  %v543_v39 = vpop.f32.mrf.mxu3 }
  0xc2   : > { %v562_v40 = vadd.f32 %v543_v39, %v464_v38  ;;  %v252_v41 = vpop.f32.mrf.mxu0 }
  0xc3   : > { %v269_v42 = vadd.f32 %v928_v60, %v252_v41 }
  0xc4   : > { %v571_v43 = vmax.f32 %v562_v40, 0.0  ;;  %v350_v44 = vpop.f32.mrf.mxu1 }
  0xc5   : > { %v367_v45 = vadd.f32 %v350_v44, %v269_v42 }
  0xc6   : > { %581 = vst.msk [vmem:[%s935_s10 + $0x20] sm:$0xff] %vm576_vm1, %v571_v43 }
  0xc7   : > { %v448_v46 = vpop.f32.mrf.mxu2 }
  0xc8   : > { %v465_v47 = vadd.f32 %v448_v46, %v367_v45  ;;  %v546_v48 = vpop.f32.mrf.mxu3 }
  0xca   : > { %v563_v49 = vadd.f32 %v546_v48, %v465_v47  ;;  %v255_v50 = vpop.f32.mrf.mxu0 }
  0xcb   : > { %v270_v51 = vadd.f32 %v928_v60, %v255_v50 }
  0xcc   : > { %v572_v52 = vmax.f32 %v563_v49, 0.0  ;;  %v353_v53 = vpop.f32.mrf.mxu1 }
  0xcd   : > { %v368_v54 = vadd.f32 %v353_v53, %v270_v51 }
  0xce   : > { %582 = vst.msk [vmem:[%s935_s10 + $0x28] sm:$0xff] %vm576_vm1, %v572_v52 }
  0xcf   : > { %v451_v55 = vpop.f32.mrf.mxu2 }
  0xd0   : > { %v466_v56 = vadd.f32 %v451_v55, %v368_v54  ;;  %v549_v57 = vpop.f32.mrf.mxu3 }
  0xd2   : > { %v564_v58 = vadd.f32 %v549_v57, %v466_v56  ;;  %v258_v59 = vpop.f32.mrf.mxu0 }
  0xd3   : > { %v271_v61 = vadd.f32 %v928_v60, %v258_v59 }
  0xd4   : > { %v573_v62 = vmax.f32 %v564_v58, 0.0  ;;  %v356_v63 = vpop.f32.mrf.mxu1 }
  0xd5   : > { %v369_v0 = vadd.f32 %v356_v63, %v271_v61 }
  0xd6   : > { %583 = vst.msk [vmem:[%s935_s10 + $0x30] sm:$0xff] %vm576_vm1, %v573_v62 }
  0xd7   : > { %v454_v1 = vpop.f32.mrf.mxu2 }
  0xd8   : > { %v467_v2 = vadd.f32 %v454_v1, %v369_v0  ;;  %v552_v3 = vpop.f32.mrf.mxu3 }
  0xda   : > { %v565_v4 = vadd.f32 %v552_v3, %v467_v2  ;;  %v261_v5 = vpop.f32.mrf.mxu0 }
  0xdb   : > { %v272_v6 = vadd.f32 %v928_v60, %v261_v5 }
  0xdc   : > { %v574_v7 = vmax.f32 %v565_v4, 0.0  ;;  %v359_v8 = vpop.f32.mrf.mxu1 }
  0xdd   : > { %v370_v9 = vadd.f32 %v359_v8, %v272_v6 }
  0xde   : > { %584 = vst.msk [vmem:[%s935_s10 + $0x38] sm:$0xff] %vm576_vm1, %v574_v7 }
  0xdf   : > { %v457_v10 = vpop.f32.mrf.mxu2 }
  0xe0   : > { %v468_v11 = vadd.f32 %v457_v10, %v370_v9  ;;  %v555_v12 = vpop.f32.mrf.mxu3 }
  0xe2   : > { %v566_v13 = vadd.f32 %v555_v12, %v468_v11 }
  0xe4   : > { %v575_v14 = vmax.f32 %v566_v13, 0.0 }
  0xe6   : > { %585 = vst.msk [vmem:[%s935_s10 + $0x40] sm:$0xff] %vm576_vm1, %v575_v14 }
  0xe7 PF: > { %s13_s12 = sadd.s32 1, %s727_s12  }
  0xe8   : > { %p10_p4 = scmp.ge.s32.totalorder %s13_s12, 4  }
  0xea   :  { %12 = sbr.rel (!%p10_p4) target bundleno = 1 (0x1), region = 65 }

// kernel: cnnae_forward.8
= control target key start
LH: loop header
LB: loop body
LE: loop exit
PB: predicated region body
PF: predicated region fallthrough
CT: control target
= control target key end

     0   :  { %s522_s12 = smov 0   ;;  %s668_s0 = inlined_call_operand.vmem [shape: f32[2,33,64], index: 0, kind: input, shape index: {}]   ;;  %s669_s1 = inlined_call_operand.vmem [shape: f32[4,64,4], index: 1, kind: input, shape index: {}]   ;;  %s670_s2 = inlined_call_operand.vmem [shape: f32[1,4], index: 2, kind: input, shape index: {}]   ;;  %s671_s3 = inlined_call_operand.vmem [shape: f32[2,20,4], index: 3, kind: output, shape index: {}]  }
   0x1 LB: > { %s438_s13 = sadd.s32 4294967295, %s500_s12   ;;  %p442_p0 = scmp.ge.s32.totalorder %s500_s12, 1  ;;  %s500_s12 = sphi %s522_s12, %s13_s12  }
   0x2   : > { %p137_p1 = scmp.lt.s32.totalorder %s500_s12, 3 }
   0x4   : > { %p138_p2 = pnand %p442_p0, %p137_p1 }
   0x5   : > { %p161_p3 = scmp.lt.s32.totalorder (!%p138_p2), %s438_s13, 1 }
   0x6   : > { %141 = sbr.rel (%p138_p2) target bundleno = 183 (0xb7), region = 32 }
   0xb   : > { %v466_v0 = vld [vmem:[%s669_s1 + $0xb8] sm:$0xff]  ;;  %v465_v2 = vld [vmem:[%s669_s1 + $0xb0] sm:$0xff]  ;;  %v464_v6 = vld [vmem:[%s669_s1 + $0xa8] sm:$0xff]  ;;  %s673_s13 = smov (!%p161_p3, %s438_s13), 1  ;;  %vm186_vm0 = vcmask 523264   ;;  %vm378_vm1 = vcmask 31744  }
   0xc   : > { %v185_v1 = vld [vmem:[%s669_s1 + $0x38] sm:$0xff]  ;;  %304 = vmatpush.msra.mxu2 %v466_v0  ;;  %v184_v4 = vld [vmem:[%s669_s1 + $0x30] sm:$0xff]  ;;  %v183_v8 = vld [vmem:[%s669_s1 + $0x28] sm:$0xff]  ;;  %s483_s25 = smul.u32 40, %s673_s13  ;;  %vm381_vm2 = vcmask 27648  }
   0xd   : > { %204 = vmatpush.msra.mxu0 %v185_v1  ;;  %v477_v3 = vld [vmem:[%s669_s1 + $0xf8] sm:$0xff]  ;;  %v476_v7 = vld [vmem:[%s669_s1 + $0xf0] sm:$0xff]  ;;  %v475_v10 = vld [vmem:[%s669_s1 + $0xe8] sm:$0xff]  ;;  %s484_s7 = smul.u32 24, %s673_s13 }
   0xe   : > { %v455_v5 = vld [vmem:[%s669_s1 + $0x78] sm:$0xff]  ;;  %354 = vmatpush.msra.mxu3 %v477_v3  ;;  %305 = vmatpush.msra.mxu2 %v465_v2  ;;  %v454_v9 = vld [vmem:[%s669_s1 + $0x70] sm:$0xff]  ;;  %v463_v11 = vld [vmem:[%s669_s1 + $0xa0] sm:$0xff]  ;;  %s614_s19 = scalar_lea.vmem %s668_s0, %s483_s25 }
   0xf   : > { %254 = vmatpush.msra.mxu1 %v455_v5  ;;  %205 = vmatpush.msra.mxu0 %v184_v4  ;;  %v182_v12 = vld [vmem:[%s669_s1 + $0x20] sm:$0xff]  ;;  %v453_v13 = vld [vmem:[%s669_s1 + $0x68] sm:$0xff]  ;;  %v462_v16 = vld [vmem:[%s669_s1 + $0x98] sm:$0xff]  ;;  %s170_s10 = scalar_lea.vmem %s671_s3, %s484_s7 }
  0x10   : > { %355 = vmatpush.msra.mxu3 %v476_v7  ;;  %306 = vmatpush.msra.mxu2 %v464_v6  ;;  %v474_v14 = vld [vmem:[%s669_s1 + $0xe0] sm:$0xff]  ;;  %v181_v17 = vld [vmem:[%s669_s1 + $0x18] sm:$0xff]  ;;  %v461_v20 = vld [vmem:[%s669_s1 + $0x90] sm:$0xff] }
  0x11   : > { %255 = vmatpush.msra.mxu1 %v454_v9  ;;  %206 = vmatpush.msra.mxu0 %v183_v8  ;;  %v452_v15 = vld [vmem:[%s669_s1 + $0x60] sm:$0xff]  ;;  %v473_v18 = vld [vmem:[%s669_s1 + $0xd8] sm:$0xff]  ;;  %v180_v21 = vld [vmem:[%s669_s1 + $0x10] sm:$0xff] }
  0x12   : > { %356 = vmatpush.msra.mxu3 %v475_v10  ;;  %307 = vmatpush.msra.mxu2 %v463_v11  ;;  %v451_v19 = vld [vmem:[%s669_s1 + $0x58] sm:$0xff]  ;;  %v472_v22 = vld [vmem:[%s669_s1 + $0xd0] sm:$0xff]  ;;  %v460_v24 = vld [vmem:[%s669_s1 + $0x88] sm:$0xff] }
  0x13   : > { %256 = vmatpush.msra.mxu1 %v453_v13  ;;  %207 = vmatpush.msra.mxu0 %v182_v12  ;;  %v450_v23 = vld [vmem:[%s669_s1 + $0x50] sm:$0xff]  ;;  %v179_v25 = vld [vmem:[%s669_s1 + $0x8] sm:$0xff]  ;;  %v459_v28 = vld [vmem:[%s669_s1 + $0x80] sm:$0xff] }
  0x14   : > { %357 = vmatpush.msra.mxu3 %v474_v14  ;;  %308 = vmatpush.msra.mxu2 %v462_v16  ;;  %v471_v26 = vld [vmem:[%s669_s1 + $0xc8] sm:$0xff]  ;;  %v178_v29 = vld [vmem:[%s669_s1] sm:$0xff]  ;;  %v277_v40 = vld [vmem:[%s614_s19 + $0x15] sm:$0xf] }
  0x15   : > { %257 = vmatpush.msra.mxu1 %v452_v15  ;;  %208 = vmatpush.msra.mxu0 %v181_v17  ;;  %v449_v27 = vld [vmem:[%s669_s1 + $0x48] sm:$0xff]  ;;  %v470_v31 = vld [vmem:[%s669_s1 + $0xc0] sm:$0xff]  ;;  %v177_v41 = vld [vmem:[%s614_s19 + $0x10] sm:$0xf] }
  0x16   : > { %358 = vmatpush.msra.mxu3 %v473_v18  ;;  %309 = vmatpush.msra.mxu2 %v461_v20  ;;  %v275_v30 = vld [vmem:[%s614_s19 + $0x5] sm:$0xff]  ;;  %v276_v36 = vld [vmem:[%s614_s19 + $0xd] sm:$0xff]  ;;  %v327_v42 = vld [vmem:[%s614_s19 + $0x16] sm:$0xf] }
  0x17   : > { %258 = vmatpush.msra.mxu1 %v451_v19  ;;  %209 = vmatpush.msra.mxu0 %v180_v21  ;;  %v175_v32 = vld [vmem:[%s614_s19] sm:$0xff]  ;;  %v176_v37 = vld [vmem:[%s614_s19 + $0x8] sm:$0xff]  ;;  %v227_v43 = vld [vmem:[%s614_s19 + $0x11] sm:$0xf] }
  0x18   : > { %359 = vmatpush.msra.mxu3 %v472_v22  ;;  %310 = vmatpush.msra.mxu2 %v460_v24  ;;  %v325_v33 = vld [vmem:[%s614_s19 + $0x6] sm:$0xff]  ;;  %v326_v38 = vld [vmem:[%s614_s19 + $0xe] sm:$0xff]  ;;  %v493_v44 = vld [vmem:[%s670_s2] ss:$0 sm:$0xff] }
  0x19   : > { %259 = vmatpush.msra.mxu1 %v450_v23  ;;  %210 = vmatpush.msra.mxu0 %v179_v25  ;;  %v448_v34 = vld [vmem:[%s669_s1 + $0x40] sm:$0xff]  ;;  %v226_v39 = vld [vmem:[%s614_s19 + $0x9] sm:$0xff] }
  0x1a   : > { %360 = vmatpush.msra.mxu3 %v471_v26  ;;  %311 = vmatpush.msra.mxu2 %v459_v28  ;;  %v225_v35 = vld [vmem:[%s614_s19 + $0x1] sm:$0xff] }
  0x1b   : > { %260 = vmatpush.msra.mxu1 %v449_v27  ;;  %211 = vmatpush.msra.mxu0 %v178_v29 }
  0x1c   : > { %467 = vmatmul.msk.f32.vlgmr.msra.gmra.mxu2 %vm186_vm0, %v275_v30  ;;  %361 = vmatpush.msra.mxu3 %v470_v31 }
  0x1d   : > { %445 = vmatmul.msk.f32.vlgmr.msra.gmra.mxu0 %vm186_vm0, %v175_v32  ;;  %478 = vmatmul.msk.f32.vlgmr.msra.gmra.mxu3 %vm186_vm0, %v325_v33 }
  0x1e   : > { %261 = vmatpush.msra.mxu1 %v448_v34 }
  0x1f   : > { %456 = vmatmul.msk.f32.vlgmr.msra.gmra.mxu1 %vm186_vm0, %v225_v35 }
  0x24   : > { %468 = vmatmul.msk.f32.gmra.mxu2 %vm186_vm0, %v276_v36 }
  0x25   : > { %446 = vmatmul.msk.f32.gmra.mxu0 %vm186_vm0, %v176_v37  ;;  %479 = vmatmul.msk.f32.gmra.mxu3 %vm186_vm0, %v326_v38 }
  0x27   : > { %457 = vmatmul.msk.f32.gmra.mxu1 %vm186_vm0, %v226_v39 }
  0x2c   : > { %469 = vmatmul.msk.f32.gmra.mxu2 %vm186_vm0, %v277_v40 }
  0x2d   : > { %447 = vmatmul.msk.f32.gmra.mxu0 %vm186_vm0, %v177_v41  ;;  %480 = vmatmul.msk.f32.gmra.mxu3 %vm186_vm0, %v327_v42 }
  0x2f   : > { %458 = vmatmul.msk.f32.gmra.mxu1 %vm186_vm0, %v227_v43 }
  0x9a   : > { %v213_v45 = vpop.f32.mrf.mxu0 }
  0x9b   : > { %v222_v46 = vadd.f32 %v493_v44, %v213_v45 }
  0x9c   : > { %v263_v47 = vpop.f32.mrf.mxu1 }
  0x9d   : > { %v272_v48 = vadd.f32 %v263_v47, %v222_v46 }
  0x9f   : > { %v313_v49 = vpop.f32.mrf.mxu2 }
  0xa0   : > { %v322_v50 = vadd.f32 %v313_v49, %v272_v48  ;;  %v363_v51 = vpop.f32.mrf.mxu3 }
  0xa2   : > { %v372_v52 = vadd.f32 %v363_v51, %v322_v50  ;;  %v216_v53 = vpop.f32.mrf.mxu0 }
  0xa3   : > { %v223_v54 = vadd.f32 %v493_v44, %v216_v53 }
  0xa4   : > { %v375_v55 = vmax.f32 %v372_v52, 0.0  ;;  %v266_v56 = vpop.f32.mrf.mxu1 }
  0xa5   : > { %v273_v57 = vadd.f32 %v266_v56, %v223_v54 }
  0xa6   : > { %379 = vst.msk [vmem:[%s170_s10] sm:$0xff] %vm378_vm1, %v375_v55 }
  0xa7   : > { %v316_v58 = vpop.f32.mrf.mxu2 }
  0xa8   : > { %v323_v59 = vadd.f32 %v316_v58, %v273_v57  ;;  %v366_v60 = vpop.f32.mrf.mxu3 }
  0xaa   : > { %v373_v61 = vadd.f32 %v366_v60, %v323_v59  ;;  %v219_v62 = vpop.f32.mrf.mxu0 }
  0xab   : > { %v224_v63 = vadd.f32 %v493_v44, %v219_v62 }
  0xac   : > { %v376_v0 = vmax.f32 %v373_v61, 0.0  ;;  %v269_v1 = vpop.f32.mrf.mxu1 }
  0xad   : > { %v274_v2 = vadd.f32 %v269_v1, %v224_v63 }
  0xae   : > { %380 = vst.msk [vmem:[%s170_s10 + $0x8] sm:$0xff] %vm378_vm1, %v376_v0 }
  0xaf   : > { %v319_v3 = vpop.f32.mrf.mxu2 }
  0xb0   : > { %v324_v4 = vadd.f32 %v319_v3, %v274_v2  ;;  %v369_v5 = vpop.f32.mrf.mxu3 }
  0xb2   : > { %v374_v6 = vadd.f32 %v369_v5, %v324_v4 }
  0xb4   : > { %v377_v7 = vmax.f32 %v374_v6, 0.0 }
  0xb6   : > { %382 = vst.msk [vmem:[%s170_s10 + $0x10] sm:$0xf] %vm381_vm2, %v377_v7 }
  0xb7 PF: > { %s13_s12 = sadd.s32 1, %s500_s12  }
  0xb8   : > { %p10_p4 = scmp.ge.s32.totalorder %s13_s12, 4  }
  0xba   :  { %12 = sbr.rel (!%p10_p4) target bundleno = 1 (0x1), region = 65 }

// kernel: cnnae_forward.9
= control target key start
LH: loop header
LB: loop body
LE: loop exit
PB: predicated region body
PF: predicated region fallthrough
CT: control target
= control target key end

     0   :  { %s746_s12 = smov 0   ;;  %s863_s0 = inlined_call_operand.vmem [shape: f32[2,44,4], index: 0, kind: input, shape index: {}]   ;;  %s864_s1 = inlined_call_operand.vmem [shape: f32[9,4,64], index: 1, kind: input, shape index: {}]   ;;  %s865_s2 = inlined_call_operand.vmem [shape: f32[1,64], index: 2, kind: input, shape index: {}]   ;;  %s866_s3 = inlined_call_operand.vmem [shape: f32[2,24,64], index: 3, kind: output, shape index: {}]  }
   0x1 LB: > { %s652_s13 = sadd.s32 4294967295, %s724_s12   ;;  %p656_p0 = scmp.ge.s32.totalorder %s724_s12, 1  ;;  %s724_s12 = sphi %s746_s12, %s13_s12  }
   0x2   : > { %p137_p1 = scmp.lt.s32.totalorder %s724_s12, 3 }
   0x4   : > { %p138_p2 = pnand %p656_p0, %p137_p1 }
   0x5   : > { %p161_p3 = scmp.lt.s32.totalorder (!%p138_p2), %s652_s13, 1 }
   0x6   : > { %141 = sbr.rel (%p138_p2) target bundleno = 206 (0xce), region = 32 }
   0xb   : > { %v178_v0 = vld [vmem:[%s864_s1] sm:$0xf]  ;;  %vm189_vm0 = vcmask 1043456   ;;  %v668_v1 = vld [vmem:[%s864_s1 + $0x8] sm:$0xf]  ;;  %s868_s13 = smov (!%p161_p3, %s652_s13), 1 }
   0xc   : > { %705 = vmatpush.msk.msra.mxu1 %vm189_vm0, %v178_v0  ;;  %706 = vmatpush.msk.msra.mxu2 %vm189_vm0, %v178_v0  ;;  %v663_v2 = vld [vmem:[%s864_s1 + $0x4] sm:$0xf]  ;;  %v673_v3 = vld [vmem:[%s864_s1 + $0xc] sm:$0xf]  ;;  %v678_v4 = vld [vmem:[%s864_s1 + $0x10] sm:$0xf] }
   0xd   : > { %659 = vmatpush.msk.msra.mxu0 %vm189_vm0, %v178_v0  ;;  %674 = vmatpush.msk.msra.mxu3 %vm189_vm0, %v673_v3  ;;  %v693_v5 = vld [vmem:[%s864_s1 + $0x1c] sm:$0xf]  ;;  %s707_s26 = smul.u32 48, %s868_s13  ;;  %vm179_vm1 = vcmask 31744   ;;  %v688_v6 = vld [vmem:[%s864_s1 + $0x18] sm:$0xf] }
   0xe   : > { %669 = vmatpush.msk.msrb.mxu2 %vm189_vm0, %v668_v1  ;;  %664 = vmatpush.msk.msrb.mxu1 %vm189_vm0, %v663_v2  ;;  %v683_v9 = vld [vmem:[%s864_s1 + $0x14] sm:$0xf]  ;;  %v698_v12 = vld [vmem:[%s864_s1 + $0x20] sm:$0xf]  ;;  %s708_s11 = smul.u32 24, %s868_s13  ;;  %vm593_vm2 = vcmask 523264  }
   0xf   : > { %679 = vmatpush.msk.msrb.mxu0 %vm189_vm0, %v678_v4  ;;  %694 = vmatpush.msk.msrb.mxu3 %vm189_vm0, %v693_v5  ;;  %s786_s29 = scalar_lea.vmem %s863_s0, %s707_s26  ;;  %v717_v41 = vld [vmem:[%s865_s2] ss:$0 sm:$0xff] }
  0x10   : > { %v176_v7 = vld [vmem:[%s786_s29 + $0x8] sm:$0xff]  ;;  %v177_v8 = vld [vmem:[%s786_s29 + $0x10] sm:$0xff]  ;;  %v175_v10 = vld [vmem:[%s786_s29] sm:$0xff]  ;;  %s170_s16 = scalar_lea.vmem %s866_s3, %s708_s11 }
  0x11   : > { %661 = vmatmul.msk.f32.vlgmr.msra.gmra.mxu1 %vm179_vm1, %v176_v7  ;;  %662 = vmatmul.msk.f32.vlgmr.msra.gmra.mxu2 %vm179_vm1, %v177_v8  ;;  %v314_v11 = vld [vmem:[%s786_s29 + $0x6] sm:$0xff]  ;;  %v315_v16 = vld [vmem:[%s786_s29 + $0xe] sm:$0xff]  ;;  %v316_v20 = vld [vmem:[%s786_s29 + $0x16] sm:$0xff] }
  0x12   : > { %689 = vmatpush.msk.msra.mxu2 %vm189_vm0, %v688_v6  ;;  %660 = vmatmul.msk.f32.vlgmr.msra.gmra.mxu0 %vm179_vm1, %v175_v10  ;;  %v222_v13 = vld [vmem:[%s786_s29 + $0x1] sm:$0xff]  ;;  %v223_v17 = vld [vmem:[%s786_s29 + $0x9] sm:$0xff]  ;;  %v224_v21 = vld [vmem:[%s786_s29 + $0x11] sm:$0xff] }
  0x13   : > { %675 = vmatmul.msk.f32.vlgmr.msra.gmra.mxu3 %vm179_vm1, %v314_v11  ;;  %684 = vmatpush.msk.msra.mxu1 %vm189_vm0, %v683_v9  ;;  %v268_v14 = vld [vmem:[%s786_s29 + $0x2] sm:$0xff]  ;;  %v269_v18 = vld [vmem:[%s786_s29 + $0xa] sm:$0xff]  ;;  %v270_v22 = vld [vmem:[%s786_s29 + $0x12] sm:$0xff] }
  0x14   : > { %699 = vmatpush.msk.msra.mxu0 %vm189_vm0, %v698_v12  ;;  %v360_v15 = vld [vmem:[%s786_s29 + $0x7] sm:$0xff]  ;;  %v361_v19 = vld [vmem:[%s786_s29 + $0xf] sm:$0xff]  ;;  %v362_v23 = vld [vmem:[%s786_s29 + $0x17] sm:$0xff] }
  0x15   : > { %v498_v24 = vld [vmem:[%s786_s29 + $0xd] sm:$0xff]  ;;  %v499_v26 = vld [vmem:[%s786_s29 + $0x15] sm:$0xff]  ;;  %v500_v28 = vld [vmem:[%s786_s29 + $0x1d] sm:$0xff] }
  0x16   : > { %v452_v25 = vld [vmem:[%s786_s29 + $0xc] sm:$0xff]  ;;  %v453_v27 = vld [vmem:[%s786_s29 + $0x14] sm:$0xff]  ;;  %v454_v30 = vld [vmem:[%s786_s29 + $0x1c] sm:$0xff] }
  0x17   : > { %v408_v29 = vld [vmem:[%s786_s29 + $0x18] sm:$0xff] }
  0x18   : > { %v546_v31 = vld [vmem:[%s786_s29 + $0x1e] sm:$0xff] }
  0x19   : > { %665 = vmatmul.msk.f32.vlgmr.msrb.gmra.mxu1 %vm179_vm1, %v222_v13  ;;  %670 = vmatmul.msk.f32.vlgmr.msrb.gmra.mxu2 %vm179_vm1, %v268_v14 }
  0x1a   : > { %680 = vmatmul.msk.f32.vlgmr.msrb.gmra.mxu0 %vm179_vm1, %v360_v15 }
  0x1b   : > { %676 = vmatmul.msk.f32.gmra.mxu3 %vm179_vm1, %v315_v16 }
  0x21   : > { %666 = vmatmul.msk.f32.gmra.mxu1 %vm179_vm1, %v223_v17  ;;  %671 = vmatmul.msk.f32.gmra.mxu2 %vm179_vm1, %v269_v18 }
  0x22   : > { %681 = vmatmul.msk.f32.gmra.mxu0 %vm179_vm1, %v361_v19 }
  0x23   : > { %677 = vmatmul.msk.f32.gmra.mxu3 %vm179_vm1, %v316_v20 }
  0x29   : > { %667 = vmatmul.msk.f32.gmra.mxu1 %vm179_vm1, %v224_v21  ;;  %672 = vmatmul.msk.f32.gmra.mxu2 %vm179_vm1, %v270_v22 }
  0x2a   : > { %682 = vmatmul.msk.f32.gmra.mxu0 %vm179_vm1, %v362_v23 }
  0x2b   : > { %695 = vmatmul.msk.f32.vlgmr.msrb.gmra.mxu3 %vm179_vm1, %v498_v24 }
  0x31   : > { %685 = vmatmul.msk.f32.vlgmr.msra.gmra.mxu1 %vm179_vm1, %v176_v7  ;;  %690 = vmatmul.msk.f32.vlgmr.msra.gmra.mxu2 %vm179_vm1, %v452_v25 }
  0x32   : > { %700 = vmatmul.msk.f32.vlgmr.msra.gmra.mxu0 %vm179_vm1, %v315_v16 }
  0x33   : > { %696 = vmatmul.msk.f32.gmra.mxu3 %vm179_vm1, %v499_v26 }
  0x39   : > { %686 = vmatmul.msk.f32.gmra.mxu1 %vm179_vm1, %v177_v8  ;;  %691 = vmatmul.msk.f32.gmra.mxu2 %vm179_vm1, %v453_v27 }
  0x3a   : > { %701 = vmatmul.msk.f32.gmra.mxu0 %vm179_vm1, %v316_v20 }
  0x3b   : > { %697 = vmatmul.msk.f32.gmra.mxu3 %vm179_vm1, %v500_v28 }
  0x41   : > { %687 = vmatmul.msk.f32.gmra.mxu1 %vm179_vm1, %v408_v29  ;;  %692 = vmatmul.msk.f32.gmra.mxu2 %vm179_vm1, %v454_v30 }
  0x42   : > { %702 = vmatmul.msk.f32.gmra.mxu0 %vm179_vm1, %v546_v31 }
  0x8e   : > { %v213_v32 = vpop.f32.mrf.mxu1 }
  0x8f   : > { %v210_v33 = vpop.f32.mrf.mxu0  ;;  %v220_v51 = vadd.f32 %v717_v41, %v213_v32 }
  0x90   : > { %v219_v43 = vadd.f32 %v717_v41, %v210_v33 }
  0x94   : > { %v216_v34 = vpop.f32.mrf.mxu2 }
  0x95   : > { %v221_v61 = vadd.f32 %v717_v41, %v216_v34 }
  0x96   : > { %v256_v35 = vpop.f32.mrf.mxu1  ;;  %v348_v36 = vpop.f32.mrf.mxu3 }
  0x97   : > { %v394_v37 = vpop.f32.mrf.mxu0  ;;  %v265_v45 = vadd.f32 %v256_v35, %v219_v43 }
  0x9c   : > { %v302_v38 = vpop.f32.mrf.mxu2 }
  0x9d   : > { %v311_v49 = vadd.f32 %v302_v38, %v265_v45 }
  0x9e   : > { %v259_v39 = vpop.f32.mrf.mxu1  ;;  %v351_v40 = vpop.f32.mrf.mxu3 }
  0x9f   : > { %v397_v42 = vpop.f32.mrf.mxu0  ;;  %v357_v52 = vadd.f32 %v348_v36, %v311_v49  ;;  %v266_v54 = vadd.f32 %v259_v39, %v220_v51 }
  0xa1   : > { %v403_v56 = vadd.f32 %v394_v37, %v357_v52 }
  0xa4   : > { %v305_v44 = vpop.f32.mrf.mxu2 }
  0xa5   : > { %v312_v57 = vadd.f32 %v305_v44, %v266_v54 }
  0xa6   : > { %v262_v46 = vpop.f32.mrf.mxu1  ;;  %v354_v47 = vpop.f32.mrf.mxu3 }
  0xa7   : > { %v400_v48 = vpop.f32.mrf.mxu0  ;;  %v358_v62 = vadd.f32 %v351_v40, %v312_v57  ;;  %v267_v1 = vadd.f32 %v262_v46, %v221_v61 }
  0xa9   : > { %v404_v3 = vadd.f32 %v397_v42, %v358_v62 }
  0xac   : > { %v308_v50 = vpop.f32.mrf.mxu2 }
  0xad   : > { %v313_v4 = vadd.f32 %v308_v50, %v267_v1 }
  0xae   : > { %v440_v53 = vpop.f32.mrf.mxu1  ;;  %v532_v55 = vpop.f32.mrf.mxu3 }
  0xaf   : > { %v578_v58 = vpop.f32.mrf.mxu0  ;;  %v449_v59 = vadd.f32 %v440_v53, %v403_v56  ;;  %v359_v11 = vadd.f32 %v354_v47, %v313_v4 }
  0xb1   : > { %v405_v15 = vadd.f32 %v400_v48, %v359_v11 }
  0xb4   : > { %v486_v60 = vpop.f32.mrf.mxu2 }
  0xb5   : > { %v495_v63 = vadd.f32 %v486_v60, %v449_v59 }
  0xb6   : > { %v443_v0 = vpop.f32.mrf.mxu1  ;;  %v535_v6 = vpop.f32.mrf.mxu3 }
  0xb7   : > { %v541_v2 = vadd.f32 %v532_v55, %v495_v63  ;;  %v450_v7 = vadd.f32 %v443_v0, %v404_v3  ;;  %v581_v10 = vpop.f32.mrf.mxu0 }
  0xb9   : > { %v587_v5 = vadd.f32 %v578_v58, %v541_v2 }
  0xbb   : > { %v590_v8 = vmax.f32 %v587_v5, 0.0 }
  0xbc   : > { %v489_v9 = vpop.f32.mrf.mxu2 }
  0xbd   : > { %594 = vst.msk [vmem:[%s170_s16] sm:$0xff] %vm593_vm2, %v590_v8  ;;  %v496_v12 = vadd.f32 %v489_v9, %v450_v7 }
  0xbe   : > { %v446_v14 = vpop.f32.mrf.mxu1  ;;  %v538_v20 = vpop.f32.mrf.mxu3 }
  0xbf   : > { %v542_v13 = vadd.f32 %v535_v6, %v496_v12  ;;  %v451_v17 = vadd.f32 %v446_v14, %v405_v15  ;;  %v584_v22 = vpop.f32.mrf.mxu0 }
  0xc1   : > { %v588_v16 = vadd.f32 %v581_v10, %v542_v13 }
  0xc3   : > { %v591_v18 = vmax.f32 %v588_v16, 0.0 }
  0xc4   : > { %v492_v19 = vpop.f32.mrf.mxu2 }
  0xc5   : > { %595 = vst.msk [vmem:[%s170_s16 + $0x8] sm:$0xff] %vm593_vm2, %v591_v18  ;;  %v497_v21 = vadd.f32 %v492_v19, %v451_v17 }
  0xc7   : > { %v543_v23 = vadd.f32 %v538_v20, %v497_v21 }
  0xc9   : > { %v589_v24 = vadd.f32 %v584_v22, %v543_v23 }
  0xcb   : > { %v592_v25 = vmax.f32 %v589_v24, 0.0 }
  0xcd   : > { %596 = vst.msk [vmem:[%s170_s16 + $0x10] sm:$0xff] %vm593_vm2, %v592_v25 }
  0xce PF: > { %s13_s12 = sadd.s32 1, %s724_s12  }
  0xcf   : > { %p10_p4 = scmp.ge.s32.totalorder %s13_s12, 4  }
  0xd1   :  { %12 = sbr.rel (!%p10_p4) target bundleno = 1 (0x1), region = 70 }

// kernel: cnnae_forward.10
= control target key start
LH: loop header
LB: loop body
LE: loop exit
PB: predicated region body
PF: predicated region fallthrough
CT: control target
= control target key end

     0   :  { %s1311_s12 = smov 0   ;;  %s1638_s0 = inlined_call_operand.vmem [shape: f32[2,108,16], index: 0, kind: input, shape index: {}]   ;;  %s1639_s1 = inlined_call_operand.vmem [shape: f32[9,16,64], index: 1, kind: input, shape index: {}]   ;;  %s1640_s2 = inlined_call_operand.vmem [shape: f32[1,64], index: 2, kind: input, shape index: {}]   ;;  %s1641_s3 = inlined_call_operand.vmem [shape: f32[2,80,64], index: 3, kind: output, shape index: {}]  }
   0x1 LB: > { %s1151_s13 = sadd.s32 4294967295, %s1289_s12   ;;  %p1155_p0 = scmp.ge.s32.totalorder %s1289_s12, 1  ;;  %s1289_s12 = sphi %s1311_s12, %s13_s12  }
   0x2   : > { %p137_p1 = scmp.lt.s32.totalorder %s1289_s12, 3 }
   0x4   : > { %p138_p2 = pnand %p1155_p0, %p137_p1 }
   0x5   : > { %p161_p3 = scmp.lt.s32.totalorder (!%p138_p2), %s1151_s13, 1 }
   0x6   : > { %141 = sbr.rel (%p138_p2) target bundleno = 334 (0x14e), region = 32 }
   0xb   : > { %v186_v0 = vld [vmem:[%s1639_s1 + $0x8] sm:$0xff]  ;;  %v185_v1 = vld [vmem:[%s1639_s1] sm:$0xff]  ;;  %v1193_v2 = vld [vmem:[%s1639_s1 + $0x38] sm:$0xff]  ;;  %s1643_s13 = smov (!%p161_p3, %s1151_s13), 1  ;;  %vm187_vm0 = vcmask 130048   ;;  %vm1085_vm1 = vcmask 523264  }
   0xc   : > { %1266 = vmatpush.msra.mxu1 %v186_v0  ;;  %1268 = vmatpush.msra.mxu3 %v186_v0  ;;  %v1169_v3 = vld [vmem:[%s1639_s1 + $0x18] sm:$0xff]  ;;  %v1205_v4 = vld [vmem:[%s1639_s1 + $0x48] sm:$0xff]  ;;  %v1192_v5 = vld [vmem:[%s1639_s1 + $0x30] sm:$0xff]  ;;  %s1272_s26 = smul.u32 112, %s1643_s13 }
   0xd   : > { %232 = vmatpush.msra.mxu0 %v186_v0  ;;  %1267 = vmatpush.msra.mxu2 %v186_v0  ;;  %v1168_v6 = vld [vmem:[%s1639_s1 + $0x10] sm:$0xff]  ;;  %v1181_v7 = vld [vmem:[%s1639_s1 + $0x28] sm:$0xff]  ;;  %v1180_v8 = vld [vmem:[%s1639_s1 + $0x20] sm:$0xff]  ;;  %s1273_s4 = smul.u32 80, %s1643_s13 }
   0xe   : > { %1269 = vmatpush.msra.mxu1 %v185_v1  ;;  %1271 = vmatpush.msra.mxu3 %v185_v1  ;;  %s1349_s6 = scalar_lea.vmem %s1638_s0, %s1272_s26  ;;  %v1204_v9 = vld [vmem:[%s1639_s1 + $0x40] sm:$0xff]  ;;  %v1229_v14 = vld [vmem:[%s1639_s1 + $0x68] sm:$0xff]  ;;  %v1241_v15 = vld [vmem:[%s1639_s1 + $0x78] sm:$0xff] }
   0xf   : > { %233 = vmatpush.msra.mxu0 %v185_v1  ;;  %1270 = vmatpush.msra.mxu2 %v185_v1  ;;  %v178_v10 = vld [vmem:[%s1349_s6 + $0x18] sm:$0xff]  ;;  %v175_v12 = vld [vmem:[%s1349_s6] sm:$0xff]  ;;  %v181_v13 = vld [vmem:[%s1349_s6 + $0x30] sm:$0xff]  ;;  %s1605_s7 = scalar_lea.vmem %s1641_s3, %s1273_s4 }
  0x10   : > { %532 = vmatpush.msrb.mxu3 %v1193_v2  ;;  %332 = vmatpush.msrb.mxu1 %v1169_v3  ;;  %v182_v11 = vld [vmem:[%s1349_s6 + $0x38] sm:$0xff]  ;;  %v1253_v17 = vld [vmem:[%s1639_s1 + $0x88] sm:$0xff]  ;;  %v179_v18 = vld [vmem:[%s1349_s6 + $0x20] sm:$0xff] }
  0x11   : > { %632 = vmatpush.msrb.mxu0 %v1205_v4  ;;  %432 = vmatpush.msrb.mxu2 %v1181_v7  ;;  %v1217_v16 = vld [vmem:[%s1639_s1 + $0x58] sm:$0xff]  ;;  %v183_v19 = vld [vmem:[%s1349_s6 + $0x40] sm:$0xff]  ;;  %v176_v20 = vld [vmem:[%s1349_s6 + $0x8] sm:$0xff] }
  0x12   : > { %533 = vmatpush.msrb.mxu3 %v1192_v5  ;;  %333 = vmatpush.msrb.mxu1 %v1168_v6  ;;  %v375_v21 = vld [vmem:[%s1349_s6 + $0x2] sm:$0xff]  ;;  %v177_v24 = vld [vmem:[%s1349_s6 + $0x10] sm:$0xff]  ;;  %v477_v32 = vld [vmem:[%s1349_s6 + $0x1a] sm:$0xff] }
  0x13   : > { %1161 = vmatmul.msk.f32.vlgmr.msra.gmra.mxu1 %vm187_vm0, %v178_v10  ;;  %1165 = vmatmul.msk.f32.vlgmr.msra.gmra.mxu3 %vm187_vm0, %v182_v11  ;;  %v180_v22 = vld [vmem:[%s1349_s6 + $0x28] sm:$0xff]  ;;  %v476_v28 = vld [vmem:[%s1349_s6 + $0x12] sm:$0xff]  ;;  %v1228_v29 = vld [vmem:[%s1639_s1 + $0x60] sm:$0xff] }
  0x14   : > { %1158 = vmatmul.msk.f32.vlgmr.msra.gmra.mxu0 %vm187_vm0, %v175_v12  ;;  %1164 = vmatmul.msk.f32.vlgmr.msra.gmra.mxu2 %vm187_vm0, %v181_v13  ;;  %v184_v23 = vld [vmem:[%s1349_s6 + $0x48] sm:$0xff]  ;;  %v576_v31 = vld [vmem:[%s1349_s6 + $0x13] sm:$0xff]  ;;  %v577_v36 = vld [vmem:[%s1349_s6 + $0x1b] sm:$0xff] }
  0x15   : > { %433 = vmatpush.msrb.mxu2 %v1180_v8  ;;  %633 = vmatpush.msrb.mxu0 %v1204_v9  ;;  %v475_v25 = vld [vmem:[%s1349_s6 + $0xa] sm:$0xff]  ;;  %v275_v26 = vld [vmem:[%s1349_s6 + $0x1] sm:$0xff]  ;;  %v278_v39 = vld [vmem:[%s1349_s6 + $0x19] sm:$0xff] }
  0x16   : > { %932 = vmatpush.msra.mxu3 %v1241_v15  ;;  %732 = vmatpush.msra.mxu1 %v1217_v16  ;;  %v575_v27 = vld [vmem:[%s1349_s6 + $0xb] sm:$0xff]  ;;  %v478_v37 = vld [vmem:[%s1349_s6 + $0x22] sm:$0xff]  ;;  %v580_v46 = vld [vmem:[%s1349_s6 + $0x33] sm:$0xff] }
  0x17   : > { %832 = vmatpush.msra.mxu2 %v1229_v14  ;;  %1032 = vmatpush.msra.mxu0 %v1253_v17  ;;  %v276_v30 = vld [vmem:[%s1349_s6 + $0x9] sm:$0xff]  ;;  %v277_v35 = vld [vmem:[%s1349_s6 + $0x11] sm:$0xff]  ;;  %v1252_v38 = vld [vmem:[%s1639_s1 + $0x80] sm:$0xff] }
  0x18   : > { %v1240_v33 = vld [vmem:[%s1639_s1 + $0x70] sm:$0xff]  ;;  %v578_v40 = vld [vmem:[%s1349_s6 + $0x23] sm:$0xff]  ;;  %v481_v47 = vld [vmem:[%s1349_s6 + $0x3a] sm:$0xff] }
  0x19   : > { %833 = vmatpush.msra.mxu2 %v1228_v29  ;;  %v1216_v34 = vld [vmem:[%s1639_s1 + $0x50] sm:$0xff]  ;;  %933 = vmatpush.msra.mxu3 %v1240_v33  ;;  %v279_v42 = vld [vmem:[%s1349_s6 + $0x21] sm:$0xff]  ;;  %v282_v51 = vld [vmem:[%s1349_s6 + $0x39] sm:$0xff] }
  0x1a   : > { %733 = vmatpush.msra.mxu1 %v1216_v34  ;;  %1033 = vmatpush.msra.mxu0 %v1252_v38  ;;  %v479_v41 = vld [vmem:[%s1349_s6 + $0x2a] sm:$0xff]  ;;  %v480_v44 = vld [vmem:[%s1349_s6 + $0x32] sm:$0xff]  ;;  %v581_v49 = vld [vmem:[%s1349_s6 + $0x3b] sm:$0xff] }
  0x1b   : > { %1162 = vmatmul.msk.f32.gmra.mxu1 %vm187_vm0, %v179_v18  ;;  %1166 = vmatmul.msk.f32.gmra.mxu3 %vm187_vm0, %v183_v19  ;;  %v579_v43 = vld [vmem:[%s1349_s6 + $0x2b] sm:$0xff]  ;;  %v482_v50 = vld [vmem:[%s1349_s6 + $0x42] sm:$0xff]  ;;  %v775_v56 = vld [vmem:[%s1349_s6 + $0x14] sm:$0xff] }
  0x1c   : > { %1159 = vmatmul.msk.f32.gmra.mxu0 %vm187_vm0, %v176_v20  ;;  %1182 = vmatmul.msk.f32.vlgmr.msrb.gmra.mxu2 %vm187_vm0, %v375_v21  ;;  %v280_v45 = vld [vmem:[%s1349_s6 + $0x29] sm:$0xff]  ;;  %v281_v48 = vld [vmem:[%s1349_s6 + $0x31] sm:$0xff]  ;;  %v283_v54 = vld [vmem:[%s1349_s6 + $0x41] sm:$0xff] }
  0x1d   : > { %v582_v52 = vld [vmem:[%s1349_s6 + $0x43] sm:$0xff]  ;;  %v583_v55 = vld [vmem:[%s1349_s6 + $0x4b] sm:$0xff]  ;;  %v584_v59 = vld [vmem:[%s1349_s6 + $0x53] sm:$0xff] }
  0x1e   : > { %v483_v53 = vld [vmem:[%s1349_s6 + $0x4a] sm:$0xff]  ;;  %v484_v58 = vld [vmem:[%s1349_s6 + $0x52] sm:$0xff]  ;;  %v776_v60 = vld [vmem:[%s1349_s6 + $0x1c] sm:$0xff] }
  0x1f   : > { %v284_v57 = vld [vmem:[%s1349_s6 + $0x49] sm:$0xff]  ;;  %v875_v62 = vld [vmem:[%s1349_s6 + $0x15] sm:$0xff]  ;;  %v876_v1 = vld [vmem:[%s1349_s6 + $0x1d] sm:$0xff] }
  0x20   : > { %v675_v61 = vld [vmem:[%s1349_s6 + $0xc] sm:$0xff]  ;;  %v975_v63 = vld [vmem:[%s1349_s6 + $0x16] sm:$0xff]  ;;  %v777_v0 = vld [vmem:[%s1349_s6 + $0x24] sm:$0xff] }
  0x21   : > { %v976_v2 = vld [vmem:[%s1349_s6 + $0x1e] sm:$0xff]  ;;  %v778_v3 = vld [vmem:[%s1349_s6 + $0x2c] sm:$0xff]  ;;  %v779_v6 = vld [vmem:[%s1349_s6 + $0x34] sm:$0xff] }
  0x22   : > { %v877_v4 = vld [vmem:[%s1349_s6 + $0x25] sm:$0xff]  ;;  %v878_v8 = vld [vmem:[%s1349_s6 + $0x2d] sm:$0xff]  ;;  %v780_v11 = vld [vmem:[%s1349_s6 + $0x3c] sm:$0xff] }
  0x23   : > { %1163 = vmatmul.msk.f32.gmra.mxu1 %vm187_vm0, %v180_v22  ;;  %1167 = vmatmul.msk.f32.gmra.mxu3 %vm187_vm0, %v184_v23  ;;  %v977_v5 = vld [vmem:[%s1349_s6 + $0x26] sm:$0xff]  ;;  %v978_v10 = vld [vmem:[%s1349_s6 + $0x2e] sm:$0xff]  ;;  %v979_v17 = vld [vmem:[%s1349_s6 + $0x36] sm:$0xff] }
  0x24   : > { %1160 = vmatmul.msk.f32.gmra.mxu0 %vm187_vm0, %v177_v24  ;;  %1183 = vmatmul.msk.f32.gmra.mxu2 %vm187_vm0, %v475_v25  ;;  %v879_v15 = vld [vmem:[%s1349_s6 + $0x35] sm:$0xff]  ;;  %v781_v18 = vld [vmem:[%s1349_s6 + $0x44] sm:$0xff]  ;;  %v1523_v19 = vld [vmem:[%s1640_s2] ss:$0 sm:$0xff] }
  0x25   : > { %v880_v24 = vld [vmem:[%s1349_s6 + $0x3d] sm:$0xff]  ;;  %v881_v33 = vld [vmem:[%s1349_s6 + $0x45] sm:$0xff] }
  0x2b   : > { %1170 = vmatmul.msk.f32.vlgmr.msrb.gmra.mxu1 %vm187_vm0, %v275_v26  ;;  %1194 = vmatmul.msk.f32.vlgmr.msrb.gmra.mxu3 %vm187_vm0, %v475_v25  ;;  %v980_v26 = vld [vmem:[%s1349_s6 + $0x3e] sm:$0xff] }
  0x2c   : > { %1206 = vmatmul.msk.f32.vlgmr.msrb.gmra.mxu0 %vm187_vm0, %v575_v27  ;;  %1184 = vmatmul.msk.f32.gmra.mxu2 %vm187_vm0, %v476_v28  ;;  %v782_v27 = vld [vmem:[%s1349_s6 + $0x4c] sm:$0xff] }
  0x33   : > { %1171 = vmatmul.msk.f32.gmra.mxu1 %vm187_vm0, %v276_v30  ;;  %1195 = vmatmul.msk.f32.gmra.mxu3 %vm187_vm0, %v476_v28 }
  0x34   : > { %1207 = vmatmul.msk.f32.gmra.mxu0 %vm187_vm0, %v576_v31  ;;  %1185 = vmatmul.msk.f32.gmra.mxu2 %vm187_vm0, %v477_v32 }
  0x3b   : > { %1172 = vmatmul.msk.f32.gmra.mxu1 %vm187_vm0, %v277_v35  ;;  %1196 = vmatmul.msk.f32.gmra.mxu3 %vm187_vm0, %v477_v32 }
  0x3c   : > { %1208 = vmatmul.msk.f32.gmra.mxu0 %vm187_vm0, %v577_v36  ;;  %1186 = vmatmul.msk.f32.gmra.mxu2 %vm187_vm0, %v478_v37  ;;  %v981_v36 = vld [vmem:[%s1349_s6 + $0x46] sm:$0xff] }
  0x43   : > { %1173 = vmatmul.msk.f32.gmra.mxu1 %vm187_vm0, %v278_v39  ;;  %1197 = vmatmul.msk.f32.gmra.mxu3 %vm187_vm0, %v478_v37  ;;  %v783_v37 = vld [vmem:[%s1349_s6 + $0x54] sm:$0xff] }
  0x44   : > { %1209 = vmatmul.msk.f32.gmra.mxu0 %vm187_vm0, %v578_v40  ;;  %1187 = vmatmul.msk.f32.gmra.mxu2 %vm187_vm0, %v479_v41 }
  0x4b   : > { %1174 = vmatmul.msk.f32.gmra.mxu1 %vm187_vm0, %v279_v42  ;;  %1198 = vmatmul.msk.f32.gmra.mxu3 %vm187_vm0, %v479_v41 }
  0x4c   : > { %1210 = vmatmul.msk.f32.gmra.mxu0 %vm187_vm0, %v579_v43  ;;  %1188 = vmatmul.msk.f32.gmra.mxu2 %vm187_vm0, %v480_v44 }
  0x53   : > { %1175 = vmatmul.msk.f32.gmra.mxu1 %vm187_vm0, %v280_v45  ;;  %1199 = vmatmul.msk.f32.gmra.mxu3 %vm187_vm0, %v480_v44  ;;  %v882_v44 = vld [vmem:[%s1349_s6 + $0x4d] sm:$0xff] }
  0x54   : > { %1211 = vmatmul.msk.f32.gmra.mxu0 %vm187_vm0, %v580_v46  ;;  %1189 = vmatmul.msk.f32.gmra.mxu2 %vm187_vm0, %v481_v47 }
  0x5b   : > { %1176 = vmatmul.msk.f32.gmra.mxu1 %vm187_vm0, %v281_v48  ;;  %1200 = vmatmul.msk.f32.gmra.mxu3 %vm187_vm0, %v481_v47  ;;  %v982_v48 = vld [vmem:[%s1349_s6 + $0x4e] sm:$0xff] }
  0x5c   : > { %1212 = vmatmul.msk.f32.gmra.mxu0 %vm187_vm0, %v581_v49  ;;  %1190 = vmatmul.msk.f32.gmra.mxu2 %vm187_vm0, %v482_v50  ;;  %v784_v49 = vld [vmem:[%s1349_s6 + $0x5c] sm:$0xff] }
  0x63   : > { %1177 = vmatmul.msk.f32.gmra.mxu1 %vm187_vm0, %v282_v51  ;;  %1201 = vmatmul.msk.f32.gmra.mxu3 %vm187_vm0, %v482_v50 }
  0x64   : > { %1213 = vmatmul.msk.f32.gmra.mxu0 %vm187_vm0, %v582_v52  ;;  %1191 = vmatmul.msk.f32.gmra.mxu2 %vm187_vm0, %v483_v53 }
  0x6b   : > { %1178 = vmatmul.msk.f32.gmra.mxu1 %vm187_vm0, %v283_v54  ;;  %1202 = vmatmul.msk.f32.gmra.mxu3 %vm187_vm0, %v483_v53 }
  0x6c   : > { %1214 = vmatmul.msk.f32.gmra.mxu0 %vm187_vm0, %v583_v55  ;;  %1230 = vmatmul.msk.f32.vlgmr.msra.gmra.mxu2 %vm187_vm0, %v775_v56 }
  0x73   : > { %1179 = vmatmul.msk.f32.gmra.mxu1 %vm187_vm0, %v284_v57  ;;  %1203 = vmatmul.msk.f32.gmra.mxu3 %vm187_vm0, %v484_v58 }
  0x74   : > { %1215 = vmatmul.msk.f32.gmra.mxu0 %vm187_vm0, %v584_v59  ;;  %1231 = vmatmul.msk.f32.gmra.mxu2 %vm187_vm0, %v776_v60 }
  0x7b   : > { %1218 = vmatmul.msk.f32.vlgmr.msra.gmra.mxu1 %vm187_vm0, %v675_v61  ;;  %1242 = vmatmul.msk.f32.vlgmr.msra.gmra.mxu3 %vm187_vm0, %v875_v62 }
  0x7c   : > { %1254 = vmatmul.msk.f32.vlgmr.msra.gmra.mxu0 %vm187_vm0, %v975_v63  ;;  %1232 = vmatmul.msk.f32.gmra.mxu2 %vm187_vm0, %v777_v0 }
  0x83   : > { %1219 = vmatmul.msk.f32.gmra.mxu1 %vm187_vm0, %v775_v56  ;;  %1243 = vmatmul.msk.f32.gmra.mxu3 %vm187_vm0, %v876_v1  ;;  %v883_v56 = vld [vmem:[%s1349_s6 + $0x55] sm:$0xff] }
  0x84   : > { %1255 = vmatmul.msk.f32.gmra.mxu0 %vm187_vm0, %v976_v2  ;;  %1233 = vmatmul.msk.f32.gmra.mxu2 %vm187_vm0, %v778_v3 }
  0x8b   : > { %1220 = vmatmul.msk.f32.gmra.mxu1 %vm187_vm0, %v776_v60  ;;  %1244 = vmatmul.msk.f32.gmra.mxu3 %vm187_vm0, %v877_v4  ;;  %v983_v60 = vld [vmem:[%s1349_s6 + $0x56] sm:$0xff] }
  0x8c   : > { %1256 = vmatmul.msk.f32.gmra.mxu0 %vm187_vm0, %v977_v5  ;;  %1234 = vmatmul.msk.f32.gmra.mxu2 %vm187_vm0, %v779_v6 }
  0x90   : > { %v1498_v7 = vpop.f32.mrf.mxu1 }
  0x91   : > { %v235_v9 = vpop.f32.mrf.mxu0  ;;  %v268_v63 = vadd.f32 %v1523_v19, %v1498_v7 }
  0x92   : > { %v265_v29 = vadd.f32 %v1523_v19, %v235_v9 }
  0x93   : > { %1221 = vmatmul.msk.f32.gmra.mxu1 %vm187_vm0, %v777_v0  ;;  %1245 = vmatmul.msk.f32.gmra.mxu3 %vm187_vm0, %v878_v8  ;;  %v984_v8 = vld [vmem:[%s1349_s6 + $0x5e] sm:$0xff] }
  0x94   : > { %1257 = vmatmul.msk.f32.gmra.mxu0 %vm187_vm0, %v978_v10  ;;  %1235 = vmatmul.msk.f32.gmra.mxu2 %vm187_vm0, %v780_v11 }
  0x96   : > { %v1507_v12 = vpop.f32.mrf.mxu3 }
  0x97   : > { %v1509_v13 = vpop.f32.mrf.mxu2 }
  0x98   : > { %v1511_v14 = vpop.f32.mrf.mxu1 }
  0x99   : > { %v238_v16 = vpop.f32.mrf.mxu0  ;;  %v269_v7 = vadd.f32 %v1523_v19, %v1511_v14 }
  0x9a   : > { %v266_v40 = vadd.f32 %v1523_v19, %v238_v16 }
  0x9b   : > { %1222 = vmatmul.msk.f32.gmra.mxu1 %vm187_vm0, %v778_v3  ;;  %1246 = vmatmul.msk.f32.gmra.mxu3 %vm187_vm0, %v879_v15  ;;  %v884_v3 = vld [vmem:[%s1349_s6 + $0x5d] sm:$0xff] }
  0x9c   : > { %1258 = vmatmul.msk.f32.gmra.mxu0 %vm187_vm0, %v979_v17  ;;  %1236 = vmatmul.msk.f32.gmra.mxu2 %vm187_vm0, %v781_v18 }
  0x9e   : > { %v259_v20 = vpop.f32.mrf.mxu3 }
  0x9f   : > { %v1526_v21 = vadd.f32 %v1523_v19, %v259_v20  ;;  %v435_v22 = vpop.f32.mrf.mxu2 }
  0xa0   : > { %v1528_v23 = vpop.f32.mrf.mxu1 }
  0xa1   : > { %v241_v25 = vpop.f32.mrf.mxu0 }
  0xa2   : > { %v267_v52 = vadd.f32 %v1523_v19, %v241_v25  ;;  %v270_v25 = vadd.f32 %v1523_v19, %v1528_v23 }
  0xa3   : > { %1223 = vmatmul.msk.f32.gmra.mxu1 %vm187_vm0, %v779_v6  ;;  %1247 = vmatmul.msk.f32.gmra.mxu3 %vm187_vm0, %v880_v24 }
  0xa4   : > { %1259 = vmatmul.msk.f32.gmra.mxu0 %vm187_vm0, %v980_v26  ;;  %1237 = vmatmul.msk.f32.gmra.mxu2 %vm187_vm0, %v782_v27 }
  0xa6   : > { %v262_v28 = vpop.f32.mrf.mxu3 }
  0xa7   : > { %v1539_v30 = vadd.f32 %v1523_v19, %v262_v28  ;;  %v438_v31 = vpop.f32.mrf.mxu2 }
  0xa8   : > { %v335_v32 = vpop.f32.mrf.mxu1 }
  0xa9   : > { %v365_v34 = vadd.f32 %v335_v32, %v265_v29  ;;  %v635_v35 = vpop.f32.mrf.mxu0 }
  0xab   : > { %v465_v38 = vadd.f32 %v435_v22, %v365_v34  ;;  %1224 = vmatmul.msk.f32.gmra.mxu1 %vm187_vm0, %v780_v11  ;;  %1248 = vmatmul.msk.f32.gmra.mxu3 %vm187_vm0, %v881_v33  ;;  %v271_v34 = vadd.f32 %v1523_v19, %v1509_v13 }
  0xac   : > { %1260 = vmatmul.msk.f32.gmra.mxu0 %vm187_vm0, %v981_v36  ;;  %1238 = vmatmul.msk.f32.gmra.mxu2 %vm187_vm0, %v783_v37 }
  0xae   : > { %v535_v39 = vpop.f32.mrf.mxu3 }
  0xaf   : > { %v565_v41 = vadd.f32 %v535_v39, %v465_v38  ;;  %v441_v42 = vpop.f32.mrf.mxu2 }
  0xb0   : > { %v338_v43 = vpop.f32.mrf.mxu1 }
  0xb1   : > { %v366_v45 = vadd.f32 %v338_v43, %v266_v40  ;;  %v1550_v46 = vadd.f32 %v635_v35, %v565_v41  ;;  %v638_v47 = vpop.f32.mrf.mxu0 }
  0xb3   : > { %v466_v50 = vadd.f32 %v438_v31, %v366_v45  ;;  %1225 = vmatmul.msk.f32.gmra.mxu1 %vm187_vm0, %v781_v18  ;;  %1249 = vmatmul.msk.f32.gmra.mxu3 %vm187_vm0, %v882_v44 }
  0xb4   : > { %1261 = vmatmul.msk.f32.gmra.mxu0 %vm187_vm0, %v982_v48  ;;  %1239 = vmatmul.msk.f32.gmra.mxu2 %vm187_vm0, %v784_v49 }
  0xb6   : > { %v538_v51 = vpop.f32.mrf.mxu3 }
  0xb7   : > { %v566_v53 = vadd.f32 %v538_v51, %v466_v50  ;;  %v444_v54 = vpop.f32.mrf.mxu2 }
  0xb8   : > { %v341_v55 = vpop.f32.mrf.mxu1 }
  0xb9   : > { %v367_v57 = vadd.f32 %v341_v55, %v267_v52  ;;  %v1560_v58 = vadd.f32 %v638_v47, %v566_v53  ;;  %v641_v59 = vpop.f32.mrf.mxu0 }
  0xbb   : > { %v467_v61 = vadd.f32 %v441_v42, %v367_v57  ;;  %1226 = vmatmul.msk.f32.gmra.mxu1 %vm187_vm0, %v782_v27  ;;  %1250 = vmatmul.msk.f32.gmra.mxu3 %vm187_vm0, %v883_v56  ;;  %v272_v42 = vadd.f32 %v1523_v19, %v1507_v12 }
  0xbc   : > { %1262 = vmatmul.msk.f32.gmra.mxu0 %vm187_vm0, %v983_v60 }
  0xbe   : > { %v541_v62 = vpop.f32.mrf.mxu3 }
  0xbf   : > { %v567_v0 = vadd.f32 %v541_v62, %v467_v61  ;;  %v447_v1 = vpop.f32.mrf.mxu2 }
  0xc0   : > { %v344_v2 = vpop.f32.mrf.mxu1 }
  0xc1   : > { %v368_v4 = vadd.f32 %v344_v2, %v268_v63  ;;  %v1569_v5 = vadd.f32 %v641_v59, %v567_v0  ;;  %v644_v6 = vpop.f32.mrf.mxu0 }
  0xc3   : > { %v468_v9 = vadd.f32 %v444_v54, %v368_v4  ;;  %1227 = vmatmul.msk.f32.gmra.mxu1 %vm187_vm0, %v783_v37  ;;  %1251 = vmatmul.msk.f32.gmra.mxu3 %vm187_vm0, %v884_v3 }
  0xc4   : > { %1263 = vmatmul.msk.f32.gmra.mxu0 %vm187_vm0, %v984_v8 }
  0xc6   : > { %v544_v10 = vpop.f32.mrf.mxu3 }
  0xc7   : > { %v568_v11 = vadd.f32 %v544_v10, %v468_v9  ;;  %v450_v15 = vpop.f32.mrf.mxu2 }
  0xc8   : > { %v347_v16 = vpop.f32.mrf.mxu1 }
  0xc9   : > { %v369_v17 = vadd.f32 %v347_v16, %v269_v7  ;;  %v1577_v18 = vadd.f32 %v644_v6, %v568_v11  ;;  %v647_v20 = vpop.f32.mrf.mxu0 }
  0xcb   : > { %v469_v22 = vadd.f32 %v447_v1, %v369_v17 }
  0xce   : > { %v547_v24 = vpop.f32.mrf.mxu3 }
  0xcf   : > { %v569_v26 = vadd.f32 %v547_v24, %v469_v22  ;;  %v453_v27 = vpop.f32.mrf.mxu2 }
  0xd0   : > { %v350_v28 = vpop.f32.mrf.mxu1 }
  0xd1   : > { %v370_v29 = vadd.f32 %v350_v28, %v270_v25  ;;  %v1581_v31 = vadd.f32 %v647_v20, %v569_v26  ;;  %v650_v32 = vpop.f32.mrf.mxu0 }
  0xd3   : > { %v470_v14 = vadd.f32 %v450_v15, %v370_v29 }
  0xd6   : > { %v550_v33 = vpop.f32.mrf.mxu3 }
  0xd7   : > { %v570_v35 = vadd.f32 %v550_v33, %v470_v14  ;;  %v456_v36 = vpop.f32.mrf.mxu2 }
  0xd8   : > { %v353_v37 = vpop.f32.mrf.mxu1 }
  0xd9   : > { %v371_v38 = vadd.f32 %v353_v37, %v271_v34  ;;  %v1585_v39 = vadd.f32 %v650_v32, %v570_v35  ;;  %v653_v40 = vpop.f32.mrf.mxu0 }
  0xdb   : > { %v471_v23 = vadd.f32 %v453_v27, %v371_v38 }
  0xde   : > { %v553_v41 = vpop.f32.mrf.mxu3 }
  0xdf   : > { %v571_v43 = vadd.f32 %v553_v41, %v471_v23  ;;  %v459_v44 = vpop.f32.mrf.mxu2 }
  0xe0   : > { %v356_v45 = vpop.f32.mrf.mxu1 }
  0xe1   : > { %v372_v47 = vadd.f32 %v356_v45, %v272_v42  ;;  %v1589_v48 = vadd.f32 %v653_v40, %v571_v43  ;;  %v656_v49 = vpop.f32.mrf.mxu0 }
  0xe3   : > { %v472_v13 = vadd.f32 %v456_v36, %v372_v47 }
  0xe6   : > { %v556_v50 = vpop.f32.mrf.mxu3 }
  0xe7   : > { %v572_v51 = vadd.f32 %v556_v50, %v472_v13  ;;  %v462_v52 = vpop.f32.mrf.mxu2 }
  0xe8   : > { %v359_v53 = vpop.f32.mrf.mxu1 }
  0xe9   : > { %v373_v54 = vadd.f32 %v359_v53, %v1526_v21  ;;  %v1592_v55 = vadd.f32 %v656_v49, %v572_v51  ;;  %v659_v56 = vpop.f32.mrf.mxu0 }
  0xeb   : > { %v473_v57 = vadd.f32 %v459_v44, %v373_v54 }
  0xee   : > { %v559_v59 = vpop.f32.mrf.mxu3 }
  0xef   : > { %v573_v12 = vadd.f32 %v559_v59, %v473_v57  ;;  %v835_v19 = vpop.f32.mrf.mxu2 }
  0xf0   : > { %v362_v60 = vpop.f32.mrf.mxu1 }
  0xf1   : > { %v374_v61 = vadd.f32 %v362_v60, %v1539_v30  ;;  %v1595_v62 = vadd.f32 %v659_v56, %v573_v12  ;;  %v662_v63 = vpop.f32.mrf.mxu0 }
  0xf3   : > { %v474_v0 = vadd.f32 %v462_v52, %v374_v61 }
  0xf6   : > { %v562_v1 = vpop.f32.mrf.mxu3 }
  0xf7   : > { %v574_v2 = vadd.f32 %v562_v1, %v474_v0  ;;  %v838_v3 = vpop.f32.mrf.mxu2 }
  0xf8   : > { %v735_v4 = vpop.f32.mrf.mxu1 }
  0xf9   : > { %v1597_v21 = vadd.f32 %v662_v63, %v574_v2  ;;  %v765_v6 = vadd.f32 %v735_v4, %v1550_v46  ;;  %v1035_v8 = vpop.f32.mrf.mxu0 }
  0xfb   : > { %v865_v9 = vadd.f32 %v835_v19, %v765_v6 }
  0xfe   : > { %v935_v10 = vpop.f32.mrf.mxu3 }
  0xff   : > { %v965_v7 = vadd.f32 %v935_v10, %v865_v9  ;;  %v841_v11 = vpop.f32.mrf.mxu2 }
 0x100   : > { %v738_v15 = vpop.f32.mrf.mxu1 }
 0x101   : > { %v766_v30 = vadd.f32 %v738_v15, %v1560_v58  ;;  %v1065_v16 = vadd.f32 %v1035_v8, %v965_v7  ;;  %v1038_v17 = vpop.f32.mrf.mxu0 }
 0x103   : > { %v1075_v46 = vmax.f32 %v1065_v16, 0.0  ;;  %v866_v20 = vadd.f32 %v838_v3, %v766_v30 }
 0x105   : > { %1086 = vst.msk [vmem:[%s1605_s7] sm:$0xff] %vm1085_vm1, %v1075_v46 }
 0x106   : > { %v938_v22 = vpop.f32.mrf.mxu3 }
 0x107   : > { %v966_v24 = vadd.f32 %v938_v22, %v866_v20  ;;  %v844_v25 = vpop.f32.mrf.mxu2 }
 0x108   : > { %v741_v26 = vpop.f32.mrf.mxu1 }
 0x109   : > { %v767_v58 = vadd.f32 %v741_v26, %v1569_v5  ;;  %v1066_v27 = vadd.f32 %v1038_v17, %v966_v24  ;;  %v1041_v28 = vpop.f32.mrf.mxu0 }
 0x10b   : > { %v1076_v29 = vmax.f32 %v1066_v27, 0.0  ;;  %v867_v32 = vadd.f32 %v841_v11, %v767_v58 }
 0x10d   : > { %1087 = vst.msk [vmem:[%s1605_s7 + $0x8] sm:$0xff] %vm1085_vm1, %v1076_v29 }
 0x10e   : > { %v941_v14 = vpop.f32.mrf.mxu3 }
 0x10f   : > { %v967_v33 = vadd.f32 %v941_v14, %v867_v32  ;;  %v847_v35 = vpop.f32.mrf.mxu2 }
 0x110   : > { %v744_v34 = vpop.f32.mrf.mxu1 }
 0x111   : > { %v768_v36 = vadd.f32 %v744_v34, %v1577_v18  ;;  %v1067_v37 = vadd.f32 %v1041_v28, %v967_v33  ;;  %v1044_v38 = vpop.f32.mrf.mxu0 }
 0x113   : > { %v1077_v40 = vmax.f32 %v1067_v37, 0.0  ;;  %v868_v23 = vadd.f32 %v844_v25, %v768_v36 }
 0x115   : > { %1088 = vst.msk [vmem:[%s1605_s7 + $0x10] sm:$0xff] %vm1085_vm1, %v1077_v40 }
 0x116   : > { %v944_v5 = vpop.f32.mrf.mxu3 }
 0x117   : > { %v968_v41 = vadd.f32 %v944_v5, %v868_v23  ;;  %v850_v47 = vpop.f32.mrf.mxu2 }
 0x118   : > { %v747_v42 = vpop.f32.mrf.mxu1 }
 0x119   : > { %v769_v43 = vadd.f32 %v747_v42, %v1581_v31  ;;  %v1068_v44 = vadd.f32 %v1044_v38, %v968_v41  ;;  %v1047_v45 = vpop.f32.mrf.mxu0 }
 0x11b   : > { %v1078_v49 = vmax.f32 %v1068_v44, 0.0  ;;  %v869_v13 = vadd.f32 %v847_v35, %v769_v43 }
 0x11d   : > { %1089 = vst.msk [vmem:[%s1605_s7 + $0x18] sm:$0xff] %vm1085_vm1, %v1078_v49 }
 0x11e   : > { %v947_v18 = vpop.f32.mrf.mxu3 }
 0x11f   : > { %v969_v50 = vadd.f32 %v947_v18, %v869_v13  ;;  %v853_v57 = vpop.f32.mrf.mxu2 }
 0x120   : > { %v750_v51 = vpop.f32.mrf.mxu1 }
 0x121   : > { %v770_v52 = vadd.f32 %v750_v51, %v1585_v39  ;;  %v1069_v53 = vadd.f32 %v1047_v45, %v969_v50  ;;  %v1050_v54 = vpop.f32.mrf.mxu0 }
 0x123   : > { %v1079_v56 = vmax.f32 %v1069_v53, 0.0  ;;  %v870_v31 = vadd.f32 %v850_v47, %v770_v52 }
 0x125   : > { %1090 = vst.msk [vmem:[%s1605_s7 + $0x20] sm:$0xff] %vm1085_vm1, %v1079_v56 }
 0x126   : > { %v950_v59 = vpop.f32.mrf.mxu3 }
 0x127   : > { %v970_v12 = vadd.f32 %v950_v59, %v870_v31  ;;  %v856_v2 = vpop.f32.mrf.mxu2 }
 0x128   : > { %v753_v19 = vpop.f32.mrf.mxu1 }
 0x129   : > { %v771_v60 = vadd.f32 %v753_v19, %v1589_v48  ;;  %v1070_v61 = vadd.f32 %v1050_v54, %v970_v12  ;;  %v1053_v63 = vpop.f32.mrf.mxu0 }
 0x12b   : > { %v1080_v0 = vmax.f32 %v1070_v61, 0.0  ;;  %v871_v1 = vadd.f32 %v853_v57, %v771_v60 }
 0x12d   : > { %1091 = vst.msk [vmem:[%s1605_s7 + $0x28] sm:$0xff] %vm1085_vm1, %v1080_v0 }
 0x12e   : > { %v953_v39 = vpop.f32.mrf.mxu3 }
 0x12f   : > { %v971_v3 = vadd.f32 %v953_v39, %v871_v1  ;;  %v859_v30 = vpop.f32.mrf.mxu2 }
 0x130   : > { %v756_v4 = vpop.f32.mrf.mxu1 }
 0x131   : > { %v772_v6 = vadd.f32 %v756_v4, %v1592_v55  ;;  %v1071_v8 = vadd.f32 %v1053_v63, %v971_v3  ;;  %v1056_v9 = vpop.f32.mrf.mxu0 }
 0x133   : > { %v1081_v10 = vmax.f32 %v1071_v8, 0.0  ;;  %v872_v7 = vadd.f32 %v856_v2, %v772_v6 }
 0x135   : > { %1092 = vst.msk [vmem:[%s1605_s7 + $0x30] sm:$0xff] %vm1085_vm1, %v1081_v10 }
 0x136   : > { %v956_v48 = vpop.f32.mrf.mxu3 }
 0x137   : > { %v972_v11 = vadd.f32 %v956_v48, %v872_v7  ;;  %v862_v27 = vpop.f32.mrf.mxu2 }
 0x138   : > { %v759_v15 = vpop.f32.mrf.mxu1 }
 0x139   : > { %v773_v16 = vadd.f32 %v759_v15, %v1595_v62  ;;  %v1072_v17 = vadd.f32 %v1056_v9, %v972_v11  ;;  %v1059_v20 = vpop.f32.mrf.mxu0 }
 0x13b   : > { %v1082_v46 = vmax.f32 %v1072_v17, 0.0  ;;  %v873_v55 = vadd.f32 %v859_v30, %v773_v16 }
 0x13d   : > { %1093 = vst.msk [vmem:[%s1605_s7 + $0x38] sm:$0xff] %vm1085_vm1, %v1082_v46 }
 0x13e   : > { %v959_v22 = vpop.f32.mrf.mxu3 }
 0x13f   : > { %v973_v24 = vadd.f32 %v959_v22, %v873_v55 }
 0x140   : > { %v762_v25 = vpop.f32.mrf.mxu1 }
 0x141   : > { %v774_v26 = vadd.f32 %v762_v25, %v1597_v21  ;;  %v1073_v58 = vadd.f32 %v1059_v20, %v973_v24  ;;  %v1062_v62 = vpop.f32.mrf.mxu0 }
 0x143   : > { %v1083_v28 = vmax.f32 %v1073_v58, 0.0  ;;  %v874_v29 = vadd.f32 %v862_v27, %v774_v26 }
 0x145   : > { %1094 = vst.msk [vmem:[%s1605_s7 + $0x40] sm:$0xff] %vm1085_vm1, %v1083_v28 }
 0x146   : > { %v962_v32 = vpop.f32.mrf.mxu3 }
 0x147   : > { %v974_v14 = vadd.f32 %v962_v32, %v874_v29 }
 0x149   : > { %v1074_v33 = vadd.f32 %v1062_v62, %v974_v14 }
 0x14b   : > { %v1084_v34 = vmax.f32 %v1074_v33, 0.0 }
 0x14d   : > { %1095 = vst.msk [vmem:[%s1605_s7 + $0x48] sm:$0xff] %vm1085_vm1, %v1084_v34 }
 0x14e PF: > { %s13_s12 = sadd.s32 1, %s1289_s12  }
 0x14f   : > { %p10_p4 = scmp.ge.s32.totalorder %s13_s12, 4  }
 0x151   :  { %12 = sbr.rel (!%p10_p4) target bundleno = 1 (0x1), region = 70 }

// kernel: cnnae_forward.11
= control target key start
LH: loop header
LB: loop body
LE: loop exit
PB: predicated region body
PF: predicated region fallthrough
CT: control target
= control target key end

     0   :  { %s3434_s12 = smov 0   ;;  %s4421_s0 = inlined_call_operand.vmem [shape: f32[2,332,16], index: 0, kind: input, shape index: {}]   ;;  %s4422_s1 = inlined_call_operand.vmem [shape: f32[9,16,12], index: 1, kind: input, shape index: {}]   ;;  %s4423_s2 = inlined_call_operand.vmem [shape: f32[1,12], index: 2, kind: input, shape index: {}]   ;;  %s4424_s3 = inlined_call_operand.vmem [shape: f32[2,288,12], index: 3, kind: output, shape index: {}]  }
   0x1 LB: > { %s3039_s13 = sadd.s32 4294967295, %s3412_s12   ;;  %p3043_p0 = scmp.ge.s32.totalorder %s3412_s12, 1  ;;  %s3412_s12 = sphi %s3434_s12, %s13_s12  }
   0x2   : > { %p137_p1 = scmp.lt.s32.totalorder %s3412_s12, 3 }
   0x4   : > { %p138_p2 = pnand %p3043_p0, %p137_p1 }
   0x5   : > { %p161_p3 = scmp.lt.s32.totalorder (!%p138_p2), %s3039_s13, 1 }
   0x6   : > { %141 = sbr.rel (%p138_p2) target bundleno = 797 (0x31d), region = 32 }
   0xb   : > { %v212_v0 = vld [vmem:[%s4422_s1 + $0x8] sm:$0xff]  ;;  %v211_v1 = vld [vmem:[%s4422_s1] sm:$0xff]  ;;  %s4426_s13 = smov (!%p161_p3, %s3039_s13), 1  ;;  %v3159_v3 = vld [vmem:[%s4422_s1 + $0x38] sm:$0xff]  ;;  %vm213_vm0 = vcmask 130048   ;;  %vm2947_vm1 = vcmask 97280  }
   0xc   : > { %3388 = vmatpush.msra.mxu1 %v212_v0  ;;  %3389 = vmatpush.msra.mxu2 %v212_v0  ;;  %v3121_v2 = vld [vmem:[%s4422_s1 + $0x28] sm:$0xff]  ;;  %v3083_v4 = vld [vmem:[%s4422_s1 + $0x18] sm:$0xff]  ;;  %s3394_s24 = smul.u32 336, %s4426_s13  ;;  %v3120_v12 = vld [vmem:[%s4422_s1 + $0x20] sm:$0xff] }
   0xd   : > { %3390 = vmatpush.msra.mxu3 %v212_v0  ;;  %336 = vmatpush.msra.mxu0 %v212_v0  ;;  %v3197_v5 = vld [vmem:[%s4422_s1 + $0x48] sm:$0xff]  ;;  %v3158_v13 = vld [vmem:[%s4422_s1 + $0x30] sm:$0xff]  ;;  %v3196_v17 = vld [vmem:[%s4422_s1 + $0x40] sm:$0xff]  ;;  %s3395_s7 = smul.u32 288, %s4426_s13 }
   0xe   : > { %3391 = vmatpush.msra.mxu1 %v211_v1  ;;  %3392 = vmatpush.msra.mxu2 %v211_v1  ;;  %s3466_s29 = scalar_lea.vmem %s4421_s0, %s3394_s24  ;;  %v3082_v16 = vld [vmem:[%s4422_s1 + $0x10] sm:$0xff]  ;;  %v3273_v34 = vld [vmem:[%s4422_s1 + $0x68] sm:$0xff]  ;;  %v3311_v35 = vld [vmem:[%s4422_s1 + $0x78] sm:$0xff] }
   0xf   : > { %3393 = vmatpush.msra.mxu3 %v211_v1  ;;  %337 = vmatpush.msra.mxu0 %v211_v1  ;;  %v184_v6 = vld [vmem:[%s3466_s29 + $0x48] sm:$0xff]  ;;  %v193_v7 = vld [vmem:[%s3466_s29 + $0x90] sm:$0xff]  ;;  %v202_v8 = vld [vmem:[%s3466_s29 + $0xd8] sm:$0xff]  ;;  %s4179_s10 = scalar_lea.vmem %s4424_s3, %s3395_s7 }
  0x10   : > { %952 = vmatpush.msrb.mxu2 %v3121_v2  ;;  %644 = vmatpush.msrb.mxu1 %v3083_v4  ;;  %v175_v9 = vld [vmem:[%s3466_s29] sm:$0xff]  ;;  %v185_v10 = vld [vmem:[%s3466_s29 + $0x50] sm:$0xff]  ;;  %v194_v11 = vld [vmem:[%s3466_s29 + $0x98] sm:$0xff] }
  0x11   : > { %1260 = vmatpush.msrb.mxu3 %v3159_v3  ;;  %1568 = vmatpush.msrb.mxu0 %v3197_v5  ;;  %v203_v14 = vld [vmem:[%s3466_s29 + $0xe0] sm:$0xff]  ;;  %v176_v15 = vld [vmem:[%s3466_s29 + $0x8] sm:$0xff]  ;;  %v186_v18 = vld [vmem:[%s3466_s29 + $0x58] sm:$0xff] }
  0x12   : > { %3055 = vmatmul.msk.f32.vlgmr.msra.gmra.mxu1 %vm213_vm0, %v184_v6  ;;  %3064 = vmatmul.msk.f32.vlgmr.msra.gmra.mxu2 %vm213_vm0, %v193_v7  ;;  %v195_v19 = vld [vmem:[%s3466_s29 + $0xa0] sm:$0xff]  ;;  %v204_v20 = vld [vmem:[%s3466_s29 + $0xe8] sm:$0xff]  ;;  %v177_v21 = vld [vmem:[%s3466_s29 + $0x10] sm:$0xff] }
  0x13   : > { %3073 = vmatmul.msk.f32.vlgmr.msra.gmra.mxu3 %vm213_vm0, %v202_v8  ;;  %3046 = vmatmul.msk.f32.vlgmr.msra.gmra.mxu0 %vm213_vm0, %v175_v9  ;;  %v187_v22 = vld [vmem:[%s3466_s29 + $0x60] sm:$0xff]  ;;  %v196_v23 = vld [vmem:[%s3466_s29 + $0xa8] sm:$0xff]  ;;  %v205_v24 = vld [vmem:[%s3466_s29 + $0xf0] sm:$0xff] }
  0x14   : > { %953 = vmatpush.msrb.mxu2 %v3120_v12  ;;  %1261 = vmatpush.msrb.mxu3 %v3158_v13  ;;  %v178_v25 = vld [vmem:[%s3466_s29 + $0x18] sm:$0xff]  ;;  %v188_v26 = vld [vmem:[%s3466_s29 + $0x68] sm:$0xff]  ;;  %v197_v27 = vld [vmem:[%s3466_s29 + $0xb0] sm:$0xff] }
  0x15   : > { %645 = vmatpush.msrb.mxu1 %v3082_v16  ;;  %1569 = vmatpush.msrb.mxu0 %v3196_v17  ;;  %v206_v28 = vld [vmem:[%s3466_s29 + $0xf8] sm:$0xff]  ;;  %v179_v29 = vld [vmem:[%s3466_s29 + $0x20] sm:$0xff]  ;;  %v189_v30 = vld [vmem:[%s3466_s29 + $0x70] sm:$0xff] }
  0x16   : > { %v198_v31 = vld [vmem:[%s3466_s29 + $0xb8] sm:$0xff]  ;;  %v207_v32 = vld [vmem:[%s3466_s29 + $0x100] sm:$0xff]  ;;  %v180_v33 = vld [vmem:[%s3466_s29 + $0x28] sm:$0xff]  ;;  %2184 = vmatpush.msra.mxu2 %v3273_v34  ;;  %2492 = vmatpush.msra.mxu3 %v3311_v35 }
  0x17   : > { %v3235_v36 = vld [vmem:[%s4422_s1 + $0x58] sm:$0xff]  ;;  %v199_v38 = vld [vmem:[%s3466_s29 + $0xc0] sm:$0xff]  ;;  %v208_v39 = vld [vmem:[%s3466_s29 + $0x108] sm:$0xff] }
  0x18   : > { %1876 = vmatpush.msra.mxu1 %v3235_v36  ;;  %v190_v37 = vld [vmem:[%s3466_s29 + $0x78] sm:$0xff]  ;;  %v181_v40 = vld [vmem:[%s3466_s29 + $0x30] sm:$0xff]  ;;  %v3349_v41 = vld [vmem:[%s4422_s1 + $0x88] sm:$0xff] }
  0x19   : > { %2800 = vmatpush.msra.mxu0 %v3349_v41  ;;  %v191_v42 = vld [vmem:[%s3466_s29 + $0x80] sm:$0xff]  ;;  %v200_v43 = vld [vmem:[%s3466_s29 + $0xc8] sm:$0xff]  ;;  %v209_v44 = vld [vmem:[%s3466_s29 + $0x110] sm:$0xff] }
  0x1a   : > { %3056 = vmatmul.msk.f32.gmra.mxu1 %vm213_vm0, %v185_v10  ;;  %3065 = vmatmul.msk.f32.gmra.mxu2 %vm213_vm0, %v194_v11  ;;  %v182_v45 = vld [vmem:[%s3466_s29 + $0x38] sm:$0xff]  ;;  %v192_v46 = vld [vmem:[%s3466_s29 + $0x88] sm:$0xff]  ;;  %v201_v47 = vld [vmem:[%s3466_s29 + $0xd0] sm:$0xff] }
  0x1b   : > { %3074 = vmatmul.msk.f32.gmra.mxu3 %vm213_vm0, %v203_v14  ;;  %3047 = vmatmul.msk.f32.gmra.mxu0 %vm213_vm0, %v176_v15  ;;  %v210_v48 = vld [vmem:[%s3466_s29 + $0x118] sm:$0xff]  ;;  %v183_v49 = vld [vmem:[%s3466_s29 + $0x40] sm:$0xff]  ;;  %v484_v54 = vld [vmem:[%s3466_s29 + $0x9] sm:$0xff] }
  0x1c   : > { %v483_v50 = vld [vmem:[%s3466_s29 + $0x1] sm:$0xff]  ;;  %v1099_v52 = vld [vmem:[%s3466_s29 + $0x12] sm:$0xff]  ;;  %v792_v55 = vld [vmem:[%s3466_s29 + $0xa] sm:$0xff] }
  0x1d   : > { %v791_v51 = vld [vmem:[%s3466_s29 + $0x2] sm:$0xff]  ;;  %v1407_v53 = vld [vmem:[%s3466_s29 + $0x13] sm:$0xff]  ;;  %v1102_v62 = vld [vmem:[%s3466_s29 + $0x2a] sm:$0xff] }
  0x1e   : > { %v1100_v56 = vld [vmem:[%s3466_s29 + $0x1a] sm:$0xff]  ;;  %v485_v58 = vld [vmem:[%s3466_s29 + $0x11] sm:$0xff]  ;;  %v1101_v59 = vld [vmem:[%s3466_s29 + $0x22] sm:$0xff] }
  0x1f   : > { %v1408_v57 = vld [vmem:[%s3466_s29 + $0x1b] sm:$0xff]  ;;  %v1409_v60 = vld [vmem:[%s3466_s29 + $0x23] sm:$0xff]  ;;  %v1410_v63 = vld [vmem:[%s3466_s29 + $0x2b] sm:$0xff] }
  0x20   : > { %v486_v61 = vld [vmem:[%s3466_s29 + $0x19] sm:$0xff]  ;;  %v487_v0 = vld [vmem:[%s3466_s29 + $0x21] sm:$0xff]  ;;  %v488_v3 = vld [vmem:[%s3466_s29 + $0x29] sm:$0xff] }
  0x21   : > { %v1103_v1 = vld [vmem:[%s3466_s29 + $0x32] sm:$0xff]  ;;  %v1104_v4 = vld [vmem:[%s3466_s29 + $0x3a] sm:$0xff]  ;;  %v1105_v7 = vld [vmem:[%s3466_s29 + $0x42] sm:$0xff] }
  0x22   : > { %3057 = vmatmul.msk.f32.gmra.mxu1 %vm213_vm0, %v186_v18  ;;  %3066 = vmatmul.msk.f32.gmra.mxu2 %vm213_vm0, %v195_v19  ;;  %v1411_v2 = vld [vmem:[%s3466_s29 + $0x33] sm:$0xff]  ;;  %v1412_v5 = vld [vmem:[%s3466_s29 + $0x3b] sm:$0xff]  ;;  %v1413_v8 = vld [vmem:[%s3466_s29 + $0x43] sm:$0xff] }
  0x23   : > { %3075 = vmatmul.msk.f32.gmra.mxu3 %vm213_vm0, %v204_v20  ;;  %3048 = vmatmul.msk.f32.gmra.mxu0 %vm213_vm0, %v177_v21  ;;  %v489_v6 = vld [vmem:[%s3466_s29 + $0x31] sm:$0xff]  ;;  %v490_v10 = vld [vmem:[%s3466_s29 + $0x39] sm:$0xff]  ;;  %v491_v17 = vld [vmem:[%s3466_s29 + $0x41] sm:$0xff] }
  0x24   : > { %v1106_v11 = vld [vmem:[%s3466_s29 + $0x4a] sm:$0xff]  ;;  %v1107_v18 = vld [vmem:[%s3466_s29 + $0x52] sm:$0xff] }
  0x25   : > { %v1414_v13 = vld [vmem:[%s3466_s29 + $0x4b] sm:$0xff]  ;;  %v1415_v20 = vld [vmem:[%s3466_s29 + $0x53] sm:$0xff]  ;;  %v1417_v34 = vld [vmem:[%s3466_s29 + $0x63] sm:$0xff] }
  0x26   : > { %v1418_v41 = vld [vmem:[%s3466_s29 + $0x6b] sm:$0xff] }
  0x2a   : > { %3058 = vmatmul.msk.f32.gmra.mxu1 %vm213_vm0, %v187_v22  ;;  %3067 = vmatmul.msk.f32.gmra.mxu2 %vm213_vm0, %v196_v23 }
  0x2b   : > { %3076 = vmatmul.msk.f32.gmra.mxu3 %vm213_vm0, %v205_v24  ;;  %3049 = vmatmul.msk.f32.gmra.mxu0 %vm213_vm0, %v178_v25  ;;  %v492_v24 = vld [vmem:[%s3466_s29 + $0x49] sm:$0xff]  ;;  %v1108_v25 = vld [vmem:[%s3466_s29 + $0x5a] sm:$0xff] }
  0x32   : > { %3059 = vmatmul.msk.f32.gmra.mxu1 %vm213_vm0, %v188_v26  ;;  %3068 = vmatmul.msk.f32.gmra.mxu2 %vm213_vm0, %v197_v27  ;;  %v1416_v27 = vld [vmem:[%s3466_s29 + $0x5b] sm:$0xff] }
  0x33   : > { %3077 = vmatmul.msk.f32.gmra.mxu3 %vm213_vm0, %v206_v28  ;;  %3050 = vmatmul.msk.f32.gmra.mxu0 %vm213_vm0, %v179_v29 }
  0x3a   : > { %3060 = vmatmul.msk.f32.gmra.mxu1 %vm213_vm0, %v189_v30  ;;  %3069 = vmatmul.msk.f32.gmra.mxu2 %vm213_vm0, %v198_v31  ;;  %v493_v31 = vld [vmem:[%s3466_s29 + $0x51] sm:$0xff] }
  0x3b   : > { %3078 = vmatmul.msk.f32.gmra.mxu3 %vm213_vm0, %v207_v32  ;;  %3051 = vmatmul.msk.f32.gmra.mxu0 %vm213_vm0, %v180_v33  ;;  %v1109_v32 = vld [vmem:[%s3466_s29 + $0x62] sm:$0xff] }
  0x42   : > { %3061 = vmatmul.msk.f32.gmra.mxu1 %vm213_vm0, %v190_v37  ;;  %3070 = vmatmul.msk.f32.gmra.mxu2 %vm213_vm0, %v199_v38  ;;  %v494_v38 = vld [vmem:[%s3466_s29 + $0x59] sm:$0xff] }
  0x43   : > { %3079 = vmatmul.msk.f32.gmra.mxu3 %vm213_vm0, %v208_v39  ;;  %3052 = vmatmul.msk.f32.gmra.mxu0 %vm213_vm0, %v181_v40  ;;  %v1110_v39 = vld [vmem:[%s3466_s29 + $0x6a] sm:$0xff] }
  0x4a   : > { %3062 = vmatmul.msk.f32.gmra.mxu1 %vm213_vm0, %v191_v42  ;;  %3071 = vmatmul.msk.f32.gmra.mxu2 %vm213_vm0, %v200_v43 }
  0x4b   : > { %3080 = vmatmul.msk.f32.gmra.mxu3 %vm213_vm0, %v209_v44  ;;  %3053 = vmatmul.msk.f32.gmra.mxu0 %vm213_vm0, %v182_v45  ;;  %v495_v45 = vld [vmem:[%s3466_s29 + $0x61] sm:$0xff] }
  0x52   : > { %3063 = vmatmul.msk.f32.gmra.mxu1 %vm213_vm0, %v192_v46  ;;  %3072 = vmatmul.msk.f32.gmra.mxu2 %vm213_vm0, %v201_v47  ;;  %v1111_v46 = vld [vmem:[%s3466_s29 + $0x72] sm:$0xff] }
  0x53   : > { %3081 = vmatmul.msk.f32.gmra.mxu3 %vm213_vm0, %v210_v48  ;;  %3054 = vmatmul.msk.f32.gmra.mxu0 %vm213_vm0, %v183_v49  ;;  %v1419_v48 = vld [vmem:[%s3466_s29 + $0x73] sm:$0xff] }
  0x5a   : > { %3084 = vmatmul.msk.f32.vlgmr.msrb.gmra.mxu1 %vm213_vm0, %v483_v50  ;;  %3122 = vmatmul.msk.f32.vlgmr.msrb.gmra.mxu2 %vm213_vm0, %v791_v51 }
  0x5b   : > { %3160 = vmatmul.msk.f32.vlgmr.msrb.gmra.mxu3 %vm213_vm0, %v1099_v52  ;;  %3198 = vmatmul.msk.f32.vlgmr.msrb.gmra.mxu0 %vm213_vm0, %v1407_v53  ;;  %v1112_v53 = vld [vmem:[%s3466_s29 + $0x7a] sm:$0xff] }
  0x62   : > { %3085 = vmatmul.msk.f32.gmra.mxu1 %vm213_vm0, %v484_v54  ;;  %3123 = vmatmul.msk.f32.gmra.mxu2 %vm213_vm0, %v792_v55  ;;  %v1420_v55 = vld [vmem:[%s3466_s29 + $0x7b] sm:$0xff] }
  0x63   : > { %3161 = vmatmul.msk.f32.gmra.mxu3 %vm213_vm0, %v1100_v56  ;;  %3199 = vmatmul.msk.f32.gmra.mxu0 %vm213_vm0, %v1408_v57 }
  0x6a   : > { %3086 = vmatmul.msk.f32.gmra.mxu1 %vm213_vm0, %v485_v58  ;;  %3124 = vmatmul.msk.f32.gmra.mxu2 %vm213_vm0, %v1099_v52  ;;  %v496_v52 = vld [vmem:[%s3466_s29 + $0x69] sm:$0xff] }
  0x6b   : > { %3162 = vmatmul.msk.f32.gmra.mxu3 %vm213_vm0, %v1101_v59  ;;  %3200 = vmatmul.msk.f32.gmra.mxu0 %vm213_vm0, %v1409_v60  ;;  %v1113_v60 = vld [vmem:[%s3466_s29 + $0x82] sm:$0xff] }
  0x72   : > { %3087 = vmatmul.msk.f32.gmra.mxu1 %vm213_vm0, %v486_v61  ;;  %3125 = vmatmul.msk.f32.gmra.mxu2 %vm213_vm0, %v1100_v56 }
  0x73   : > { %3163 = vmatmul.msk.f32.gmra.mxu3 %vm213_vm0, %v1102_v62  ;;  %3201 = vmatmul.msk.f32.gmra.mxu0 %vm213_vm0, %v1410_v63  ;;  %v3272_v63 = vld [vmem:[%s4422_s1 + $0x60] sm:$0xff] }
  0x74   : > { %2185 = vmatpush.msra.mxu2 %v3272_v63 }
  0x7a   : > { %3088 = vmatmul.msk.f32.gmra.mxu1 %vm213_vm0, %v487_v0  ;;  %3126 = vmatmul.msk.f32.gmra.mxu2 %vm213_vm0, %v1101_v59  ;;  %v497_v59 = vld [vmem:[%s3466_s29 + $0x71] sm:$0xff] }
  0x7b   : > { %3164 = vmatmul.msk.f32.gmra.mxu3 %vm213_vm0, %v1103_v1  ;;  %3202 = vmatmul.msk.f32.gmra.mxu0 %vm213_vm0, %v1411_v2  ;;  %v3310_v0 = vld [vmem:[%s4422_s1 + $0x70] sm:$0xff] }
  0x7c   : > { %2493 = vmatpush.msra.mxu3 %v3310_v0 }
  0x82   : > { %3089 = vmatmul.msk.f32.gmra.mxu1 %vm213_vm0, %v488_v3  ;;  %3127 = vmatmul.msk.f32.gmra.mxu2 %vm213_vm0, %v1102_v62  ;;  %v1421_v62 = vld [vmem:[%s3466_s29 + $0x83] sm:$0xff]  ;;  %v3234_v3 = vld [vmem:[%s4422_s1 + $0x50] sm:$0xff] }
  0x83   : > { %3165 = vmatmul.msk.f32.gmra.mxu3 %vm213_vm0, %v1104_v4  ;;  %3203 = vmatmul.msk.f32.gmra.mxu0 %vm213_vm0, %v1412_v5  ;;  %v498_v5 = vld [vmem:[%s3466_s29 + $0x79] sm:$0xff] }
  0x84   : > { %1877 = vmatpush.msra.mxu1 %v3234_v3  ;;  %v501_v3 = vld [vmem:[%s3466_s29 + $0x91] sm:$0xff] }
  0x8a   : > { %3090 = vmatmul.msk.f32.gmra.mxu1 %vm213_vm0, %v489_v6  ;;  %3128 = vmatmul.msk.f32.gmra.mxu2 %vm213_vm0, %v1103_v1  ;;  %v1114_v6 = vld [vmem:[%s3466_s29 + $0x8a] sm:$0xff] }
  0x8b   : > { %3166 = vmatmul.msk.f32.gmra.mxu3 %vm213_vm0, %v1105_v7  ;;  %3204 = vmatmul.msk.f32.gmra.mxu0 %vm213_vm0, %v1413_v8  ;;  %v1422_v8 = vld [vmem:[%s3466_s29 + $0x8b] sm:$0xff] }
  0x8f   : > { %v3615_v9 = vpop.f32.mrf.mxu1 }
  0x90   : > { %v3619_v12 = vpop.f32.mrf.mxu0 }
  0x92   : > { %3091 = vmatmul.msk.f32.gmra.mxu1 %vm213_vm0, %v490_v10  ;;  %3129 = vmatmul.msk.f32.gmra.mxu2 %vm213_vm0, %v1104_v4  ;;  %v3348_v10 = vld [vmem:[%s4422_s1 + $0x80] sm:$0xff] }
  0x93   : > { %3167 = vmatmul.msk.f32.gmra.mxu3 %vm213_vm0, %v1106_v11  ;;  %3205 = vmatmul.msk.f32.gmra.mxu0 %vm213_vm0, %v1414_v13 }
  0x94   : > { %2801 = vmatpush.msra.mxu0 %v3348_v10  ;;  %v1425_v10 = vld [vmem:[%s3466_s29 + $0xa3] sm:$0xff] }
  0x95   : > { %v3626_v14 = vpop.f32.mrf.mxu2 }
  0x96   : > { %v3628_v15 = vpop.f32.mrf.mxu3 }
  0x97   : > { %v3630_v16 = vpop.f32.mrf.mxu1 }
  0x98   : > { %v3634_v19 = vpop.f32.mrf.mxu0 }
  0x9a   : > { %3092 = vmatmul.msk.f32.gmra.mxu1 %vm213_vm0, %v491_v17  ;;  %3130 = vmatmul.msk.f32.gmra.mxu2 %vm213_vm0, %v1105_v7 }
  0x9b   : > { %3168 = vmatmul.msk.f32.gmra.mxu3 %vm213_vm0, %v1107_v18  ;;  %3206 = vmatmul.msk.f32.gmra.mxu0 %vm213_vm0, %v1415_v20  ;;  %v3766_v20 = vld [vmem:[%s4423_s2] ss:$0 sm:$0xff] }
  0x9d   : > { %v3641_v21 = vpop.f32.mrf.mxu2 }
  0x9e   : > { %v3643_v22 = vpop.f32.mrf.mxu3 }
  0x9f   : > { %v3645_v23 = vpop.f32.mrf.mxu1 }
  0xa0   : > { %v3649_v26 = vpop.f32.mrf.mxu0 }
  0xa2   : > { %3093 = vmatmul.msk.f32.gmra.mxu1 %vm213_vm0, %v492_v24  ;;  %3131 = vmatmul.msk.f32.gmra.mxu2 %vm213_vm0, %v1106_v11  ;;  %v1115_v24 = vld [vmem:[%s3466_s29 + $0x92] sm:$0xff] }
  0xa3   : > { %3169 = vmatmul.msk.f32.gmra.mxu3 %vm213_vm0, %v1108_v25  ;;  %3207 = vmatmul.msk.f32.gmra.mxu0 %vm213_vm0, %v1416_v27  ;;  %v1423_v27 = vld [vmem:[%s3466_s29 + $0x93] sm:$0xff] }
  0xa5   : > { %v3656_v28 = vpop.f32.mrf.mxu2 }
  0xa6   : > { %v3658_v29 = vpop.f32.mrf.mxu3 }
  0xa7   : > { %v3660_v30 = vpop.f32.mrf.mxu1 }
  0xa8   : > { %v3664_v33 = vpop.f32.mrf.mxu0 }
  0xaa   : > { %3094 = vmatmul.msk.f32.gmra.mxu1 %vm213_vm0, %v493_v31  ;;  %3132 = vmatmul.msk.f32.gmra.mxu2 %vm213_vm0, %v1107_v18  ;;  %v499_v18 = vld [vmem:[%s3466_s29 + $0x81] sm:$0xff]  ;;  %v447_v31 = vadd.f32 %v3766_v20, %v3619_v12 }
  0xab   : > { %3170 = vmatmul.msk.f32.gmra.mxu3 %vm213_vm0, %v1109_v32  ;;  %3208 = vmatmul.msk.f32.gmra.mxu0 %vm213_vm0, %v1417_v34  ;;  %v1424_v12 = vld [vmem:[%s3466_s29 + $0x9b] sm:$0xff] }
  0xad   : > { %v3671_v35 = vpop.f32.mrf.mxu2 }
  0xae   : > { %v3673_v36 = vpop.f32.mrf.mxu3 }
  0xaf   : > { %v3675_v37 = vpop.f32.mrf.mxu1 }
  0xb0   : > { %v3679_v40 = vpop.f32.mrf.mxu0 }
  0xb2   : > { %3095 = vmatmul.msk.f32.gmra.mxu1 %vm213_vm0, %v494_v38  ;;  %3133 = vmatmul.msk.f32.gmra.mxu2 %vm213_vm0, %v1108_v25 }
  0xb3   : > { %3171 = vmatmul.msk.f32.gmra.mxu3 %vm213_vm0, %v1110_v39  ;;  %3209 = vmatmul.msk.f32.gmra.mxu0 %vm213_vm0, %v1418_v41 }
  0xb5   : > { %v3686_v42 = vpop.f32.mrf.mxu2 }
  0xb6   : > { %v3688_v43 = vpop.f32.mrf.mxu3 }
  0xb7   : > { %v3690_v44 = vpop.f32.mrf.mxu1 }
  0xb8   : > { %v3694_v47 = vpop.f32.mrf.mxu0 }
  0xba   : > { %3096 = vmatmul.msk.f32.gmra.mxu1 %vm213_vm0, %v495_v45  ;;  %3134 = vmatmul.msk.f32.gmra.mxu2 %vm213_vm0, %v1109_v32  ;;  %v500_v45 = vld [vmem:[%s3466_s29 + $0x89] sm:$0xff] }
  0xbb   : > { %3172 = vmatmul.msk.f32.gmra.mxu3 %vm213_vm0, %v1111_v46  ;;  %3210 = vmatmul.msk.f32.gmra.mxu0 %vm213_vm0, %v1419_v48  ;;  %v1116_v48 = vld [vmem:[%s3466_s29 + $0x9a] sm:$0xff] }
  0xbd   : > { %v3701_v49 = vpop.f32.mrf.mxu2 }
  0xbe   : > { %v3703_v50 = vpop.f32.mrf.mxu3 }
  0xbf   : > { %v3705_v51 = vpop.f32.mrf.mxu1 }
  0xc0   : > { %v3709_v54 = vpop.f32.mrf.mxu0 }
  0xc2   : > { %3097 = vmatmul.msk.f32.gmra.mxu1 %vm213_vm0, %v496_v52  ;;  %3135 = vmatmul.msk.f32.gmra.mxu2 %vm213_vm0, %v1110_v39 }
  0xc3   : > { %3173 = vmatmul.msk.f32.gmra.mxu3 %vm213_vm0, %v1112_v53  ;;  %3211 = vmatmul.msk.f32.gmra.mxu0 %vm213_vm0, %v1420_v55 }
  0xc5   : > { %v3716_v56 = vpop.f32.mrf.mxu2 }
  0xc6   : > { %v3718_v57 = vpop.f32.mrf.mxu3 }
  0xc7   : > { %v3720_v58 = vpop.f32.mrf.mxu1 }
  0xc8   : > { %v3724_v61 = vpop.f32.mrf.mxu0 }
  0xca   : > { %3098 = vmatmul.msk.f32.gmra.mxu1 %vm213_vm0, %v497_v59  ;;  %3136 = vmatmul.msk.f32.gmra.mxu2 %vm213_vm0, %v1111_v46 }
  0xcb   : > { %3174 = vmatmul.msk.f32.gmra.mxu3 %vm213_vm0, %v1113_v60  ;;  %3212 = vmatmul.msk.f32.gmra.mxu0 %vm213_vm0, %v1421_v62 }
  0xcd   : > { %v3737_v1 = vpop.f32.mrf.mxu2 }
  0xce   : > { %v3739_v2 = vpop.f32.mrf.mxu3 }
  0xcf   : > { %v3744_v4 = vpop.f32.mrf.mxu1 }
  0xd0   : > { %v3748_v7 = vpop.f32.mrf.mxu0 }
  0xd2   : > { %3099 = vmatmul.msk.f32.gmra.mxu1 %vm213_vm0, %v498_v5  ;;  %3137 = vmatmul.msk.f32.gmra.mxu2 %vm213_vm0, %v1112_v53  ;;  %v448_v53 = vadd.f32 %v3766_v20, %v3634_v19 }
  0xd3   : > { %3175 = vmatmul.msk.f32.gmra.mxu3 %vm213_vm0, %v1114_v6  ;;  %3213 = vmatmul.msk.f32.gmra.mxu0 %vm213_vm0, %v1422_v8  ;;  %v1117_v8 = vld [vmem:[%s3466_s29 + $0xa2] sm:$0xff] }
  0xd5   : > { %v3758_v11 = vpop.f32.mrf.mxu2 }
  0xd6   : > { %v3760_v13 = vpop.f32.mrf.mxu3 }
  0xd7   : > { %v647_v17 = vpop.f32.mrf.mxu1 }
  0xd8   : > { %v1571_v25 = vpop.f32.mrf.mxu0  ;;  %v755_v32 = vadd.f32 %v647_v17, %v447_v31 }
  0xda   : > { %3100 = vmatmul.msk.f32.gmra.mxu1 %vm213_vm0, %v499_v18  ;;  %3138 = vmatmul.msk.f32.gmra.mxu2 %vm213_vm0, %v1113_v60 }
  0xdb   : > { %3176 = vmatmul.msk.f32.gmra.mxu3 %vm213_vm0, %v1115_v24  ;;  %3214 = vmatmul.msk.f32.gmra.mxu0 %vm213_vm0, %v1423_v27 }
  0xdd   : > { %v955_v34 = vpop.f32.mrf.mxu2 }
  0xde   : > { %v1063_v38 = vadd.f32 %v955_v34, %v755_v32  ;;  %v1263_v39 = vpop.f32.mrf.mxu3  ;;  %v502_v34 = vld [vmem:[%s3466_s29 + $0x99] sm:$0xff] }
  0xdf   : > { %v650_v41 = vpop.f32.mrf.mxu1 }
  0xe0   : > { %v1371_v46 = vadd.f32 %v1263_v39, %v1063_v38  ;;  %v1574_v52 = vpop.f32.mrf.mxu0  ;;  %v756_v59 = vadd.f32 %v650_v41, %v448_v53  ;;  %v1118_v39 = vld [vmem:[%s3466_s29 + $0xaa] sm:$0xff] }
  0xe1   : > { %v1426_v41 = vld [vmem:[%s3466_s29 + $0xab] sm:$0xff] }
  0xe2   : > { %v3781_v55 = vadd.f32 %v1571_v25, %v1371_v46  ;;  %3101 = vmatmul.msk.f32.gmra.mxu1 %vm213_vm0, %v500_v45  ;;  %3139 = vmatmul.msk.f32.gmra.mxu2 %vm213_vm0, %v1114_v6  ;;  %v449_v6 = vadd.f32 %v3766_v20, %v3649_v26 }
  0xe3   : > { %3177 = vmatmul.msk.f32.gmra.mxu3 %vm213_vm0, %v1116_v48  ;;  %3215 = vmatmul.msk.f32.gmra.mxu0 %vm213_vm0, %v1424_v12 }
  0xe5   : > { %v958_v60 = vpop.f32.mrf.mxu2 }
  0xe6   : > { %v1064_v62 = vadd.f32 %v958_v60, %v756_v59  ;;  %v1266_v63 = vpop.f32.mrf.mxu3  ;;  %v503_v60 = vld [vmem:[%s3466_s29 + $0xa1] sm:$0xff] }
  0xe7   : > { %v653_v0 = vpop.f32.mrf.mxu1 }
  0xe8   : > { %v1372_v5 = vadd.f32 %v1266_v63, %v1064_v62  ;;  %v1577_v19 = vpop.f32.mrf.mxu0  ;;  %v757_v18 = vadd.f32 %v653_v0, %v449_v6  ;;  %v1119_v63 = vld [vmem:[%s3466_s29 + $0xb2] sm:$0xff] }
  0xe9   : > { %v1427_v0 = vld [vmem:[%s3466_s29 + $0xb3] sm:$0xff] }
  0xea   : > { %v3792_v17 = vadd.f32 %v1574_v52, %v1372_v5  ;;  %3102 = vmatmul.msk.f32.gmra.mxu1 %vm213_vm0, %v501_v3  ;;  %3140 = vmatmul.msk.f32.gmra.mxu2 %vm213_vm0, %v1115_v24  ;;  %v450_v24 = vadd.f32 %v3766_v20, %v3664_v33 }
  0xeb   : > { %3178 = vmatmul.msk.f32.gmra.mxu3 %vm213_vm0, %v1117_v8  ;;  %3216 = vmatmul.msk.f32.gmra.mxu0 %vm213_vm0, %v1425_v10 }
  0xed   : > { %v961_v25 = vpop.f32.mrf.mxu2 }
  0xee   : > { %v1065_v27 = vadd.f32 %v961_v25, %v757_v18  ;;  %v1269_v31 = vpop.f32.mrf.mxu3  ;;  %v504_v25 = vld [vmem:[%s3466_s29 + $0xa9] sm:$0xff] }
  0xef   : > { %v656_v32 = vpop.f32.mrf.mxu1 }
  0xf0   : > { %v1373_v38 = vadd.f32 %v1269_v31, %v1065_v27  ;;  %v1580_v26 = vpop.f32.mrf.mxu0  ;;  %v758_v46 = vadd.f32 %v656_v32, %v450_v24  ;;  %v1120_v31 = vld [vmem:[%s3466_s29 + $0xba] sm:$0xff] }
  0xf1   : > { %v1428_v32 = vld [vmem:[%s3466_s29 + $0xbb] sm:$0xff] }
  0xf2   : > { %v3803_v45 = vadd.f32 %v1577_v19, %v1373_v38  ;;  %3103 = vmatmul.msk.f32.gmra.mxu1 %vm213_vm0, %v502_v34  ;;  %3141 = vmatmul.msk.f32.gmra.mxu2 %vm213_vm0, %v1116_v48  ;;  %v451_v48 = vadd.f32 %v3766_v20, %v3679_v40 }
  0xf3   : > { %3179 = vmatmul.msk.f32.gmra.mxu3 %vm213_vm0, %v1118_v39  ;;  %3217 = vmatmul.msk.f32.gmra.mxu0 %vm213_vm0, %v1426_v41 }
  0xf5   : > { %v964_v52 = vpop.f32.mrf.mxu2 }
  0xf6   : > { %v1066_v12 = vadd.f32 %v964_v52, %v758_v46  ;;  %v1272_v53 = vpop.f32.mrf.mxu3  ;;  %v505_v52 = vld [vmem:[%s3466_s29 + $0xb1] sm:$0xff] }
  0xf7   : > { %v659_v59 = vpop.f32.mrf.mxu1 }
  0xf8   : > { %v1374_v62 = vadd.f32 %v1272_v53, %v1066_v12  ;;  %v1583_v33 = vpop.f32.mrf.mxu0  ;;  %v759_v5 = vadd.f32 %v659_v59, %v451_v48  ;;  %v1121_v53 = vld [vmem:[%s3466_s29 + $0xc2] sm:$0xff] }
  0xf9   : > { %v1429_v59 = vld [vmem:[%s3466_s29 + $0xc3] sm:$0xff] }
  0xfa   : > { %v3814_v3 = vadd.f32 %v1580_v26, %v1374_v62  ;;  %3104 = vmatmul.msk.f32.gmra.mxu1 %vm213_vm0, %v503_v60  ;;  %3142 = vmatmul.msk.f32.gmra.mxu2 %vm213_vm0, %v1117_v8  ;;  %v452_v8 = vadd.f32 %v3766_v20, %v3694_v47 }
  0xfb   : > { %3180 = vmatmul.msk.f32.gmra.mxu3 %vm213_vm0, %v1119_v63  ;;  %3218 = vmatmul.msk.f32.gmra.mxu0 %vm213_vm0, %v1427_v0 }
  0xfd   : > { %v967_v19 = vpop.f32.mrf.mxu2 }
  0xfe   : > { %v1067_v10 = vadd.f32 %v967_v19, %v759_v5  ;;  %v1275_v6 = vpop.f32.mrf.mxu3  ;;  %v506_v19 = vld [vmem:[%s3466_s29 + $0xb9] sm:$0xff] }
  0xff   : > { %v662_v18 = vpop.f32.mrf.mxu1 }
 0x100   : > { %v1375_v27 = vadd.f32 %v1275_v6, %v1067_v10  ;;  %v1586_v40 = vpop.f32.mrf.mxu0  ;;  %v760_v38 = vadd.f32 %v662_v18, %v452_v8  ;;  %v1122_v6 = vld [vmem:[%s3466_s29 + $0xca] sm:$0xff] }
 0x101   : > { %v1430_v18 = vld [vmem:[%s3466_s29 + $0xcb] sm:$0xff] }
 0x102   : > { %v3825_v34 = vadd.f32 %v1583_v33, %v1375_v27  ;;  %3105 = vmatmul.msk.f32.gmra.mxu1 %vm213_vm0, %v504_v25  ;;  %3143 = vmatmul.msk.f32.gmra.mxu2 %vm213_vm0, %v1118_v39  ;;  %v453_v39 = vadd.f32 %v3766_v20, %v3709_v54 }
 0x103   : > { %3181 = vmatmul.msk.f32.gmra.mxu3 %vm213_vm0, %v1120_v31  ;;  %3219 = vmatmul.msk.f32.gmra.mxu0 %vm213_vm0, %v1428_v32 }
 0x105   : > { %v970_v26 = vpop.f32.mrf.mxu2 }
 0x106   : > { %v1068_v41 = vadd.f32 %v970_v26, %v760_v38  ;;  %v1278_v24 = vpop.f32.mrf.mxu3  ;;  %v507_v26 = vld [vmem:[%s3466_s29 + $0xc1] sm:$0xff] }
 0x107   : > { %v665_v46 = vpop.f32.mrf.mxu1 }
 0x108   : > { %v1376_v12 = vadd.f32 %v1278_v24, %v1068_v41  ;;  %v1589_v47 = vpop.f32.mrf.mxu0  ;;  %v761_v62 = vadd.f32 %v665_v46, %v453_v39  ;;  %v1123_v24 = vld [vmem:[%s3466_s29 + $0xd2] sm:$0xff] }
 0x109   : > { %v1431_v46 = vld [vmem:[%s3466_s29 + $0xd3] sm:$0xff] }
 0x10a   : > { %v3836_v60 = vadd.f32 %v1586_v40, %v1376_v12  ;;  %3106 = vmatmul.msk.f32.gmra.mxu1 %vm213_vm0, %v505_v52  ;;  %3144 = vmatmul.msk.f32.gmra.mxu2 %vm213_vm0, %v1119_v63  ;;  %v454_v63 = vadd.f32 %v3766_v20, %v3724_v61 }
 0x10b   : > { %3182 = vmatmul.msk.f32.gmra.mxu3 %vm213_vm0, %v1121_v53  ;;  %3220 = vmatmul.msk.f32.gmra.mxu0 %vm213_vm0, %v1429_v59 }
 0x10d   : > { %v973_v33 = vpop.f32.mrf.mxu2 }
 0x10e   : > { %v1069_v0 = vadd.f32 %v973_v33, %v761_v62  ;;  %v1281_v48 = vpop.f32.mrf.mxu3  ;;  %v508_v33 = vld [vmem:[%s3466_s29 + $0xc9] sm:$0xff] }
 0x10f   : > { %v668_v5 = vpop.f32.mrf.mxu1 }
 0x110   : > { %v1377_v10 = vadd.f32 %v1281_v48, %v1069_v0  ;;  %v1592_v54 = vpop.f32.mrf.mxu0  ;;  %v762_v27 = vadd.f32 %v668_v5, %v454_v63  ;;  %v1124_v48 = vld [vmem:[%s3466_s29 + $0xda] sm:$0xff] }
 0x111   : > { %v1432_v5 = vld [vmem:[%s3466_s29 + $0xdb] sm:$0xff] }
 0x112   : > { %v3847_v25 = vadd.f32 %v1589_v47, %v1377_v10  ;;  %3107 = vmatmul.msk.f32.gmra.mxu1 %vm213_vm0, %v506_v19  ;;  %3145 = vmatmul.msk.f32.gmra.mxu2 %vm213_vm0, %v1120_v31  ;;  %v455_v31 = vadd.f32 %v3766_v20, %v3748_v7 }
 0x113   : > { %3183 = vmatmul.msk.f32.gmra.mxu3 %vm213_vm0, %v1122_v6  ;;  %3221 = vmatmul.msk.f32.gmra.mxu0 %vm213_vm0, %v1430_v18 }
 0x115   : > { %v976_v40 = vpop.f32.mrf.mxu2 }
 0x116   : > { %v1070_v32 = vadd.f32 %v976_v40, %v762_v27  ;;  %v1284_v8 = vpop.f32.mrf.mxu3  ;;  %v509_v40 = vld [vmem:[%s3466_s29 + $0xd1] sm:$0xff] }
 0x117   : > { %v671_v38 = vpop.f32.mrf.mxu1 }
 0x118   : > { %v1378_v41 = vadd.f32 %v1284_v8, %v1070_v32  ;;  %v1595_v61 = vpop.f32.mrf.mxu0  ;;  %v763_v12 = vadd.f32 %v671_v38, %v455_v31  ;;  %v1125_v8 = vld [vmem:[%s3466_s29 + $0xe2] sm:$0xff] }
 0x119   : > { %v1433_v38 = vld [vmem:[%s3466_s29 + $0xe3] sm:$0xff] }
 0x11a   : > { %v3858_v52 = vadd.f32 %v1592_v54, %v1378_v41  ;;  %3108 = vmatmul.msk.f32.gmra.mxu1 %vm213_vm0, %v507_v26  ;;  %3146 = vmatmul.msk.f32.gmra.mxu2 %vm213_vm0, %v1121_v53  ;;  %v456_v53 = vadd.f32 %v3766_v20, %v3615_v9 }
 0x11b   : > { %3184 = vmatmul.msk.f32.gmra.mxu3 %vm213_vm0, %v1123_v24  ;;  %3222 = vmatmul.msk.f32.gmra.mxu0 %vm213_vm0, %v1431_v46 }
 0x11d   : > { %v979_v47 = vpop.f32.mrf.mxu2 }
 0x11e   : > { %v1071_v59 = vadd.f32 %v979_v47, %v763_v12  ;;  %v1287_v39 = vpop.f32.mrf.mxu3  ;;  %v510_v47 = vld [vmem:[%s3466_s29 + $0xd9] sm:$0xff] }
 0x11f   : > { %v674_v62 = vpop.f32.mrf.mxu1 }
 0x120   : > { %v1379_v0 = vadd.f32 %v1287_v39, %v1071_v59  ;;  %v1598_v7 = vpop.f32.mrf.mxu0  ;;  %v764_v10 = vadd.f32 %v674_v62, %v456_v53  ;;  %v1126_v39 = vld [vmem:[%s3466_s29 + $0xea] sm:$0xff] }
 0x121   : > { %v1434_v62 = vld [vmem:[%s3466_s29 + $0xeb] sm:$0xff] }
 0x122   : > { %v3869_v19 = vadd.f32 %v1595_v61, %v1379_v0  ;;  %3109 = vmatmul.msk.f32.gmra.mxu1 %vm213_vm0, %v508_v33  ;;  %3147 = vmatmul.msk.f32.gmra.mxu2 %vm213_vm0, %v1122_v6  ;;  %v457_v6 = vadd.f32 %v3766_v20, %v3630_v16 }
 0x123   : > { %3185 = vmatmul.msk.f32.gmra.mxu3 %vm213_vm0, %v1124_v48  ;;  %3223 = vmatmul.msk.f32.gmra.mxu0 %vm213_vm0, %v1432_v5 }
 0x125   : > { %v982_v54 = vpop.f32.mrf.mxu2 }
 0x126   : > { %v1072_v18 = vadd.f32 %v982_v54, %v764_v10  ;;  %v1290_v63 = vpop.f32.mrf.mxu3  ;;  %v511_v54 = vld [vmem:[%s3466_s29 + $0xe1] sm:$0xff] }
 0x127   : > { %v677_v27 = vpop.f32.mrf.mxu1 }
 0x128   : > { %v1380_v32 = vadd.f32 %v1290_v63, %v1072_v18  ;;  %v1601_v9 = vpop.f32.mrf.mxu0  ;;  %v765_v41 = vadd.f32 %v677_v27, %v457_v6  ;;  %v1127_v63 = vld [vmem:[%s3466_s29 + $0xf2] sm:$0xff] }
 0x129   : > { %v1435_v27 = vld [vmem:[%s3466_s29 + $0xf3] sm:$0xff] }
 0x12a   : > { %v3880_v26 = vadd.f32 %v1598_v7, %v1380_v32  ;;  %3110 = vmatmul.msk.f32.gmra.mxu1 %vm213_vm0, %v509_v40  ;;  %3148 = vmatmul.msk.f32.gmra.mxu2 %vm213_vm0, %v1123_v24  ;;  %v458_v24 = vadd.f32 %v3766_v20, %v3645_v23 }
 0x12b   : > { %3186 = vmatmul.msk.f32.gmra.mxu3 %vm213_vm0, %v1125_v8  ;;  %3224 = vmatmul.msk.f32.gmra.mxu0 %vm213_vm0, %v1433_v38 }
 0x12d   : > { %v985_v61 = vpop.f32.mrf.mxu2 }
 0x12e   : > { %v1073_v46 = vadd.f32 %v985_v61, %v765_v41  ;;  %v1293_v31 = vpop.f32.mrf.mxu3  ;;  %v512_v61 = vld [vmem:[%s3466_s29 + $0xe9] sm:$0xff] }
 0x12f   : > { %v680_v12 = vpop.f32.mrf.mxu1 }
 0x130   : > { %v1381_v59 = vadd.f32 %v1293_v31, %v1073_v46  ;;  %v1604_v16 = vpop.f32.mrf.mxu0  ;;  %v766_v0 = vadd.f32 %v680_v12, %v458_v24  ;;  %v1128_v31 = vld [vmem:[%s3466_s29 + $0xfa] sm:$0xff] }
 0x131   : > { %v1436_v12 = vld [vmem:[%s3466_s29 + $0xfb] sm:$0xff] }
 0x132   : > { %v3891_v33 = vadd.f32 %v1601_v9, %v1381_v59  ;;  %3111 = vmatmul.msk.f32.gmra.mxu1 %vm213_vm0, %v510_v47  ;;  %3149 = vmatmul.msk.f32.gmra.mxu2 %vm213_vm0, %v1124_v48  ;;  %v459_v48 = vadd.f32 %v3766_v20, %v3660_v30 }
 0x133   : > { %3187 = vmatmul.msk.f32.gmra.mxu3 %vm213_vm0, %v1126_v39  ;;  %3225 = vmatmul.msk.f32.gmra.mxu0 %vm213_vm0, %v1434_v62 }
 0x135   : > { %v988_v7 = vpop.f32.mrf.mxu2 }
 0x136   : > { %v1074_v5 = vadd.f32 %v988_v7, %v766_v0  ;;  %v1296_v53 = vpop.f32.mrf.mxu3  ;;  %v513_v7 = vld [vmem:[%s3466_s29 + $0xf1] sm:$0xff] }
 0x137   : > { %v683_v10 = vpop.f32.mrf.mxu1 }
 0x138   : > { %v1382_v18 = vadd.f32 %v1296_v53, %v1074_v5  ;;  %v1607_v23 = vpop.f32.mrf.mxu0  ;;  %v767_v32 = vadd.f32 %v683_v10, %v459_v48  ;;  %v1129_v53 = vld [vmem:[%s3466_s29 + $0x102] sm:$0xff] }
 0x139   : > { %v1437_v10 = vld [vmem:[%s3466_s29 + $0x103] sm:$0xff] }
 0x13a   : > { %v3902_v40 = vadd.f32 %v1604_v16, %v1382_v18  ;;  %3112 = vmatmul.msk.f32.gmra.mxu1 %vm213_vm0, %v511_v54  ;;  %3150 = vmatmul.msk.f32.gmra.mxu2 %vm213_vm0, %v1125_v8  ;;  %v460_v8 = vadd.f32 %v3766_v20, %v3675_v37 }
 0x13b   : > { %3188 = vmatmul.msk.f32.gmra.mxu3 %vm213_vm0, %v1127_v63  ;;  %3226 = vmatmul.msk.f32.gmra.mxu0 %vm213_vm0, %v1435_v27 }
 0x13d   : > { %v991_v9 = vpop.f32.mrf.mxu2 }
 0x13e   : > { %v1075_v38 = vadd.f32 %v991_v9, %v767_v32  ;;  %v1299_v6 = vpop.f32.mrf.mxu3  ;;  %v514_v9 = vld [vmem:[%s3466_s29 + $0xf9] sm:$0xff] }
 0x13f   : > { %v686_v41 = vpop.f32.mrf.mxu1 }
 0x140   : > { %v1383_v46 = vadd.f32 %v1299_v6, %v1075_v38  ;;  %v1610_v30 = vpop.f32.mrf.mxu0  ;;  %v768_v59 = vadd.f32 %v686_v41, %v460_v8  ;;  %v1130_v6 = vld [vmem:[%s3466_s29 + $0x10a] sm:$0xff] }
 0x141   : > { %v1438_v41 = vld [vmem:[%s3466_s29 + $0x10b] sm:$0xff] }
 0x142   : > { %v3913_v47 = vadd.f32 %v1607_v23, %v1383_v46  ;;  %3113 = vmatmul.msk.f32.gmra.mxu1 %vm213_vm0, %v512_v61  ;;  %3151 = vmatmul.msk.f32.gmra.mxu2 %vm213_vm0, %v1126_v39  ;;  %v461_v39 = vadd.f32 %v3766_v20, %v3690_v44 }
 0x143   : > { %3189 = vmatmul.msk.f32.gmra.mxu3 %vm213_vm0, %v1128_v31  ;;  %3227 = vmatmul.msk.f32.gmra.mxu0 %vm213_vm0, %v1436_v12 }
 0x145   : > { %v994_v16 = vpop.f32.mrf.mxu2 }
 0x146   : > { %v1076_v62 = vadd.f32 %v994_v16, %v768_v59  ;;  %v1302_v24 = vpop.f32.mrf.mxu3  ;;  %v515_v16 = vld [vmem:[%s3466_s29 + $0x101] sm:$0xff] }
 0x147   : > { %v689_v0 = vpop.f32.mrf.mxu1 }
 0x148   : > { %v1384_v5 = vadd.f32 %v1302_v24, %v1076_v62  ;;  %v1613_v37 = vpop.f32.mrf.mxu0  ;;  %v769_v18 = vadd.f32 %v689_v0, %v461_v39  ;;  %v1131_v24 = vld [vmem:[%s3466_s29 + $0x112] sm:$0xff] }
 0x149   : > { %v1439_v0 = vld [vmem:[%s3466_s29 + $0x113] sm:$0xff] }
 0x14a   : > { %v3924_v54 = vadd.f32 %v1610_v30, %v1384_v5  ;;  %3114 = vmatmul.msk.f32.gmra.mxu1 %vm213_vm0, %v513_v7  ;;  %3152 = vmatmul.msk.f32.gmra.mxu2 %vm213_vm0, %v1127_v63  ;;  %v462_v63 = vadd.f32 %v3766_v20, %v3705_v51 }
 0x14b   : > { %3190 = vmatmul.msk.f32.gmra.mxu3 %vm213_vm0, %v1129_v53  ;;  %3228 = vmatmul.msk.f32.gmra.mxu0 %vm213_vm0, %v1437_v10 }
 0x14d   : > { %v997_v23 = vpop.f32.mrf.mxu2 }
 0x14e   : > { %v1077_v27 = vadd.f32 %v997_v23, %v769_v18  ;;  %v1305_v48 = vpop.f32.mrf.mxu3  ;;  %v516_v23 = vld [vmem:[%s3466_s29 + $0x109] sm:$0xff] }
 0x14f   : > { %v692_v32 = vpop.f32.mrf.mxu1 }
 0x150   : > { %v1385_v38 = vadd.f32 %v1305_v48, %v1077_v27  ;;  %v1616_v44 = vpop.f32.mrf.mxu0  ;;  %v770_v46 = vadd.f32 %v692_v32, %v462_v63  ;;  %v1132_v48 = vld [vmem:[%s3466_s29 + $0x11a] sm:$0xff] }
 0x151   : > { %v1440_v32 = vld [vmem:[%s3466_s29 + $0x11b] sm:$0xff] }
 0x152   : > { %v3935_v61 = vadd.f32 %v1613_v37, %v1385_v38  ;;  %3115 = vmatmul.msk.f32.gmra.mxu1 %vm213_vm0, %v514_v9  ;;  %3153 = vmatmul.msk.f32.gmra.mxu2 %vm213_vm0, %v1128_v31  ;;  %v463_v31 = vadd.f32 %v3766_v20, %v3720_v58 }
 0x153   : > { %3191 = vmatmul.msk.f32.gmra.mxu3 %vm213_vm0, %v1130_v6  ;;  %3229 = vmatmul.msk.f32.gmra.mxu0 %vm213_vm0, %v1438_v41 }
 0x155   : > { %v1000_v30 = vpop.f32.mrf.mxu2 }
 0x156   : > { %v1078_v12 = vadd.f32 %v1000_v30, %v770_v46  ;;  %v1308_v8 = vpop.f32.mrf.mxu3  ;;  %v517_v30 = vld [vmem:[%s3466_s29 + $0x111] sm:$0xff] }
 0x157   : > { %v695_v59 = vpop.f32.mrf.mxu1 }
 0x158   : > { %v1386_v62 = vadd.f32 %v1308_v8, %v1078_v12  ;;  %v1619_v51 = vpop.f32.mrf.mxu0  ;;  %v771_v5 = vadd.f32 %v695_v59, %v463_v31  ;;  %v1133_v8 = vld [vmem:[%s3466_s29 + $0x122] sm:$0xff] }
 0x159   : > { %v1441_v59 = vld [vmem:[%s3466_s29 + $0x123] sm:$0xff] }
 0x15a   : > { %v3946_v7 = vadd.f32 %v1616_v44, %v1386_v62  ;;  %3116 = vmatmul.msk.f32.gmra.mxu1 %vm213_vm0, %v515_v16  ;;  %3154 = vmatmul.msk.f32.gmra.mxu2 %vm213_vm0, %v1129_v53  ;;  %v464_v53 = vadd.f32 %v3766_v20, %v3744_v4 }
 0x15b   : > { %3192 = vmatmul.msk.f32.gmra.mxu3 %vm213_vm0, %v1131_v24  ;;  %3230 = vmatmul.msk.f32.gmra.mxu0 %vm213_vm0, %v1439_v0 }
 0x15d   : > { %v1003_v37 = vpop.f32.mrf.mxu2 }
 0x15e   : > { %v1079_v10 = vadd.f32 %v1003_v37, %v771_v5  ;;  %v1311_v39 = vpop.f32.mrf.mxu3  ;;  %v518_v37 = vld [vmem:[%s3466_s29 + $0x119] sm:$0xff] }
 0x15f   : > { %v698_v18 = vpop.f32.mrf.mxu1 }
 0x160   : > { %v1387_v27 = vadd.f32 %v1311_v39, %v1079_v10  ;;  %v1622_v58 = vpop.f32.mrf.mxu0  ;;  %v772_v38 = vadd.f32 %v698_v18, %v464_v53  ;;  %v1442_v18 = vld [vmem:[%s3466_s29 + $0x12b] sm:$0xff] }
 0x162   : > { %v3957_v9 = vadd.f32 %v1619_v51, %v1387_v27  ;;  %3117 = vmatmul.msk.f32.gmra.mxu1 %vm213_vm0, %v516_v23  ;;  %3155 = vmatmul.msk.f32.gmra.mxu2 %vm213_vm0, %v1130_v6  ;;  %v465_v6 = vadd.f32 %v3766_v20, %v3626_v14  ;;  %v1134_v14 = vld [vmem:[%s3466_s29 + $0x12a] sm:$0xff] }
 0x163   : > { %3193 = vmatmul.msk.f32.gmra.mxu3 %vm213_vm0, %v1132_v48  ;;  %3231 = vmatmul.msk.f32.gmra.mxu0 %vm213_vm0, %v1440_v32 }
 0x165   : > { %v1006_v44 = vpop.f32.mrf.mxu2 }
 0x166   : > { %v1080_v41 = vadd.f32 %v1006_v44, %v772_v38  ;;  %v1314_v63 = vpop.f32.mrf.mxu3  ;;  %v1715_v44 = vld [vmem:[%s3466_s29 + $0x14] sm:$0xff] }
 0x167   : > { %v701_v46 = vpop.f32.mrf.mxu1 }
 0x168   : > { %v1388_v12 = vadd.f32 %v1314_v63, %v1080_v41  ;;  %v1625_v4 = vpop.f32.mrf.mxu0  ;;  %v773_v62 = vadd.f32 %v701_v46, %v465_v6  ;;  %v2023_v41 = vld [vmem:[%s3466_s29 + $0x24] sm:$0xff] }
 0x169   : > { %v2331_v63 = vld [vmem:[%s3466_s29 + $0x25] sm:$0xff] }
 0x16a   : > { %v3968_v16 = vadd.f32 %v1622_v58, %v1388_v12  ;;  %3118 = vmatmul.msk.f32.gmra.mxu1 %vm213_vm0, %v517_v30  ;;  %3156 = vmatmul.msk.f32.gmra.mxu2 %vm213_vm0, %v1131_v24  ;;  %v466_v24 = vadd.f32 %v3766_v20, %v3641_v21  ;;  %v2639_v30 = vld [vmem:[%s3466_s29 + $0x26] sm:$0xff] }
 0x16b   : > { %3194 = vmatmul.msk.f32.gmra.mxu3 %vm213_vm0, %v1133_v8  ;;  %3232 = vmatmul.msk.f32.gmra.mxu0 %vm213_vm0, %v1441_v59 }
 0x16d   : > { %v1009_v51 = vpop.f32.mrf.mxu2 }
 0x16e   : > { %v1081_v0 = vadd.f32 %v1009_v51, %v773_v62  ;;  %v1317_v31 = vpop.f32.mrf.mxu3  ;;  %v1716_v51 = vld [vmem:[%s3466_s29 + $0x1c] sm:$0xff] }
 0x16f   : > { %v704_v5 = vpop.f32.mrf.mxu1 }
 0x170   : > { %v1389_v10 = vadd.f32 %v1317_v31, %v1081_v0  ;;  %v1628_v39 = vpop.f32.mrf.mxu0  ;;  %v774_v27 = vadd.f32 %v704_v5, %v466_v24  ;;  %v2024_v0 = vld [vmem:[%s3466_s29 + $0x2c] sm:$0xff] }
 0x171   : > { %v2332_v31 = vld [vmem:[%s3466_s29 + $0x2d] sm:$0xff] }
 0x172   : > { %v3979_v23 = vadd.f32 %v1625_v4, %v1389_v10  ;;  %3119 = vmatmul.msk.f32.gmra.mxu1 %vm213_vm0, %v518_v37  ;;  %3157 = vmatmul.msk.f32.gmra.mxu2 %vm213_vm0, %v1132_v48  ;;  %v467_v48 = vadd.f32 %v3766_v20, %v3656_v28  ;;  %v2640_v37 = vld [vmem:[%s3466_s29 + $0x2e] sm:$0xff]  ;;  %v468_v10 = vadd.f32 %v3766_v20, %v3671_v35 }
 0x173   : > { %3195 = vmatmul.msk.f32.gmra.mxu3 %vm213_vm0, %v1134_v14  ;;  %3233 = vmatmul.msk.f32.gmra.mxu0 %vm213_vm0, %v1442_v18 }
 0x175   : > { %v1012_v58 = vpop.f32.mrf.mxu2 }
 0x176   : > { %v1082_v32 = vadd.f32 %v1012_v58, %v774_v27  ;;  %v1320_v53 = vpop.f32.mrf.mxu3 }
 0x177   : > { %v707_v38 = vpop.f32.mrf.mxu1 }
 0x178   : > { %v1390_v21 = vadd.f32 %v1320_v53, %v1082_v32  ;;  %v1631_v46 = vpop.f32.mrf.mxu0  ;;  %v775_v8 = vadd.f32 %v707_v38, %v467_v48  ;;  %v2025_v32 = vld [vmem:[%s3466_s29 + $0x34] sm:$0xff] }
 0x179   : > { %v2333_v38 = vld [vmem:[%s3466_s29 + $0x35] sm:$0xff] }
 0x17a   : > { %v3991_v12 = vadd.f32 %v1628_v39, %v1390_v21  ;;  %3236 = vmatmul.msk.f32.vlgmr.msra.gmra.mxu1 %vm213_vm0, %v1715_v44  ;;  %3274 = vmatmul.msk.f32.vlgmr.msra.gmra.mxu2 %vm213_vm0, %v2023_v41  ;;  %v2641_v44 = vld [vmem:[%s3466_s29 + $0x36] sm:$0xff]  ;;  %v469_v21 = vadd.f32 %v3766_v20, %v3686_v42 }
 0x17b   : > { %3312 = vmatmul.msk.f32.vlgmr.msra.gmra.mxu3 %vm213_vm0, %v2331_v63  ;;  %3350 = vmatmul.msk.f32.vlgmr.msra.gmra.mxu0 %vm213_vm0, %v2639_v30 }
 0x17d   : > { %v1015_v4 = vpop.f32.mrf.mxu2 }
 0x17e   : > { %v1083_v59 = vadd.f32 %v1015_v4, %v775_v8  ;;  %v1323_v6 = vpop.f32.mrf.mxu3 }
 0x17f   : > { %v710_v62 = vpop.f32.mrf.mxu1 }
 0x180   : > { %v1391_v28 = vadd.f32 %v1323_v6, %v1083_v59  ;;  %v1634_v5 = vpop.f32.mrf.mxu0  ;;  %v776_v39 = vadd.f32 %v710_v62, %v468_v10  ;;  %v2026_v59 = vld [vmem:[%s3466_s29 + $0x3c] sm:$0xff] }
 0x181   : > { %v2334_v62 = vld [vmem:[%s3466_s29 + $0x3d] sm:$0xff] }
 0x182   : > { %v4003_v14 = vadd.f32 %v1631_v46, %v1391_v28  ;;  %3237 = vmatmul.msk.f32.gmra.mxu1 %vm213_vm0, %v1716_v51  ;;  %3275 = vmatmul.msk.f32.gmra.mxu2 %vm213_vm0, %v2024_v0  ;;  %v2642_v51 = vld [vmem:[%s3466_s29 + $0x3e] sm:$0xff] }
 0x183   : > { %3313 = vmatmul.msk.f32.gmra.mxu3 %vm213_vm0, %v2332_v31  ;;  %3351 = vmatmul.msk.f32.gmra.mxu0 %vm213_vm0, %v2640_v37 }
 0x185   : > { %v1018_v18 = vpop.f32.mrf.mxu2 }
 0x186   : > { %v1084_v24 = vadd.f32 %v1018_v18, %v776_v39  ;;  %v1326_v27 = vpop.f32.mrf.mxu3  ;;  %v2027_v18 = vld [vmem:[%s3466_s29 + $0x44] sm:$0xff] }
 0x187   : > { %v713_v58 = vpop.f32.mrf.mxu1 }
 0x188   : > { %v1392_v53 = vadd.f32 %v1326_v27, %v1084_v24  ;;  %v1637_v35 = vpop.f32.mrf.mxu0  ;;  %v777_v46 = vadd.f32 %v713_v58, %v469_v21  ;;  %v2335_v27 = vld [vmem:[%s3466_s29 + $0x45] sm:$0xff] }
 0x189   : > { %v2643_v58 = vld [vmem:[%s3466_s29 + $0x46] sm:$0xff] }
 0x18a   : > { %v4014_v63 = vadd.f32 %v1634_v5, %v1392_v53  ;;  %3238 = vmatmul.msk.f32.gmra.mxu1 %vm213_vm0, %v2023_v41  ;;  %3276 = vmatmul.msk.f32.gmra.mxu2 %vm213_vm0, %v2025_v32  ;;  %v470_v41 = vadd.f32 %v3766_v20, %v3701_v49 }
 0x18b   : > { %3314 = vmatmul.msk.f32.gmra.mxu3 %vm213_vm0, %v2333_v38  ;;  %3352 = vmatmul.msk.f32.gmra.mxu0 %vm213_vm0, %v2641_v44 }
 0x18d   : > { %v1021_v30 = vpop.f32.mrf.mxu2 }
 0x18e   : > { %v1085_v48 = vadd.f32 %v1021_v30, %v777_v46  ;;  %v1329_v8 = vpop.f32.mrf.mxu3  ;;  %v2028_v30 = vld [vmem:[%s3466_s29 + $0x4c] sm:$0xff] }
 0x18f   : > { %v716_v4 = vpop.f32.mrf.mxu1 }
 0x190   : > { %v1393_v6 = vadd.f32 %v1329_v8, %v1085_v48  ;;  %v1640_v42 = vpop.f32.mrf.mxu0  ;;  %v778_v31 = vadd.f32 %v716_v4, %v470_v41  ;;  %v2336_v8 = vld [vmem:[%s3466_s29 + $0x4d] sm:$0xff] }
 0x191   : > { %v2644_v4 = vld [vmem:[%s3466_s29 + $0x4e] sm:$0xff] }
 0x192   : > { %v4025_v28 = vadd.f32 %v1637_v35, %v1393_v6  ;;  %3239 = vmatmul.msk.f32.gmra.mxu1 %vm213_vm0, %v2024_v0  ;;  %3277 = vmatmul.msk.f32.gmra.mxu2 %vm213_vm0, %v2026_v59  ;;  %v471_v0 = vadd.f32 %v3766_v20, %v3716_v56 }
 0x193   : > { %3315 = vmatmul.msk.f32.gmra.mxu3 %vm213_vm0, %v2334_v62  ;;  %3353 = vmatmul.msk.f32.gmra.mxu0 %vm213_vm0, %v2642_v51 }
 0x195   : > { %v1024_v5 = vpop.f32.mrf.mxu2 }
 0x196   : > { %v1086_v37 = vadd.f32 %v1024_v5, %v778_v31  ;;  %v1332_v10 = vpop.f32.mrf.mxu3  ;;  %v2029_v5 = vld [vmem:[%s3466_s29 + $0x54] sm:$0xff] }
 0x197   : > { %v719_v39 = vpop.f32.mrf.mxu1 }
 0x198   : > { %v1394_v24 = vadd.f32 %v1332_v10, %v1086_v37  ;;  %v1643_v49 = vpop.f32.mrf.mxu0  ;;  %v779_v38 = vadd.f32 %v719_v39, %v471_v0  ;;  %v2337_v10 = vld [vmem:[%s3466_s29 + $0x55] sm:$0xff] }
 0x199   : > { %v2645_v39 = vld [vmem:[%s3466_s29 + $0x56] sm:$0xff] }
 0x19a   : > { %v4036_v53 = vadd.f32 %v1640_v42, %v1394_v24  ;;  %3240 = vmatmul.msk.f32.gmra.mxu1 %vm213_vm0, %v2025_v32  ;;  %3278 = vmatmul.msk.f32.gmra.mxu2 %vm213_vm0, %v2027_v18  ;;  %v472_v32 = vadd.f32 %v3766_v20, %v3737_v1 }
 0x19b   : > { %3316 = vmatmul.msk.f32.gmra.mxu3 %vm213_vm0, %v2335_v27  ;;  %3354 = vmatmul.msk.f32.gmra.mxu0 %vm213_vm0, %v2643_v58 }
 0x19d   : > { %v1027_v35 = vpop.f32.mrf.mxu2 }
 0x19e   : > { %v1087_v44 = vadd.f32 %v1027_v35, %v779_v38  ;;  %v1335_v21 = vpop.f32.mrf.mxu3  ;;  %v2030_v35 = vld [vmem:[%s3466_s29 + $0x5c] sm:$0xff] }
 0x19f   : > { %v722_v46 = vpop.f32.mrf.mxu1 }
 0x1a0   : > { %v1395_v48 = vadd.f32 %v1335_v21, %v1087_v44  ;;  %v1646_v56 = vpop.f32.mrf.mxu0  ;;  %v780_v62 = vadd.f32 %v722_v46, %v472_v32  ;;  %v2338_v21 = vld [vmem:[%s3466_s29 + $0x5d] sm:$0xff] }
 0x1a1   : > { %v2646_v46 = vld [vmem:[%s3466_s29 + $0x5e] sm:$0xff] }
 0x1a2   : > { %v4047_v6 = vadd.f32 %v1643_v49, %v1395_v48  ;;  %3241 = vmatmul.msk.f32.gmra.mxu1 %vm213_vm0, %v2026_v59  ;;  %3279 = vmatmul.msk.f32.gmra.mxu2 %vm213_vm0, %v2028_v30  ;;  %v473_v59 = vadd.f32 %v3766_v20, %v3758_v11 }
 0x1a3   : > { %3317 = vmatmul.msk.f32.gmra.mxu3 %vm213_vm0, %v2336_v8  ;;  %3355 = vmatmul.msk.f32.gmra.mxu0 %vm213_vm0, %v2644_v4 }
 0x1a5   : > { %v1030_v42 = vpop.f32.mrf.mxu2 }
 0x1a6   : > { %v1088_v51 = vadd.f32 %v1030_v42, %v780_v62  ;;  %v1338_v41 = vpop.f32.mrf.mxu3  ;;  %v2031_v42 = vld [vmem:[%s3466_s29 + $0x64] sm:$0xff] }
 0x1a7   : > { %v725_v31 = vpop.f32.mrf.mxu1 }
 0x1a8   : > { %v1396_v37 = vadd.f32 %v1338_v41, %v1088_v51  ;;  %v1649_v1 = vpop.f32.mrf.mxu0  ;;  %v781_v27 = vadd.f32 %v725_v31, %v473_v59  ;;  %v2339_v41 = vld [vmem:[%s3466_s29 + $0x65] sm:$0xff] }
 0x1a9   : > { %v2647_v31 = vld [vmem:[%s3466_s29 + $0x66] sm:$0xff] }
 0x1aa   : > { %v4058_v24 = vadd.f32 %v1646_v56, %v1396_v37  ;;  %3242 = vmatmul.msk.f32.gmra.mxu1 %vm213_vm0, %v2027_v18  ;;  %3280 = vmatmul.msk.f32.gmra.mxu2 %vm213_vm0, %v2029_v5  ;;  %v474_v18 = vadd.f32 %v3766_v20, %v3628_v15 }
 0x1ab   : > { %3318 = vmatmul.msk.f32.gmra.mxu3 %vm213_vm0, %v2337_v10  ;;  %3356 = vmatmul.msk.f32.gmra.mxu0 %vm213_vm0, %v2645_v39 }
 0x1ad   : > { %v1033_v49 = vpop.f32.mrf.mxu2 }
 0x1ae   : > { %v1089_v58 = vadd.f32 %v1033_v49, %v781_v27  ;;  %v1341_v0 = vpop.f32.mrf.mxu3  ;;  %v2032_v49 = vld [vmem:[%s3466_s29 + $0x6c] sm:$0xff] }
 0x1af   : > { %v728_v38 = vpop.f32.mrf.mxu1 }
 0x1b0   : > { %v1397_v44 = vadd.f32 %v1341_v0, %v1089_v58  ;;  %v1652_v11 = vpop.f32.mrf.mxu0  ;;  %v782_v8 = vadd.f32 %v728_v38, %v474_v18  ;;  %v2340_v0 = vld [vmem:[%s3466_s29 + $0x6d] sm:$0xff] }
 0x1b1   : > { %v2648_v38 = vld [vmem:[%s3466_s29 + $0x6e] sm:$0xff] }
 0x1b2   : > { %v4069_v48 = vadd.f32 %v1649_v1, %v1397_v44  ;;  %3243 = vmatmul.msk.f32.gmra.mxu1 %vm213_vm0, %v2028_v30  ;;  %3281 = vmatmul.msk.f32.gmra.mxu2 %vm213_vm0, %v2030_v35  ;;  %v475_v30 = vadd.f32 %v3766_v20, %v3643_v22 }
 0x1b3   : > { %3319 = vmatmul.msk.f32.gmra.mxu3 %vm213_vm0, %v2338_v21  ;;  %3357 = vmatmul.msk.f32.gmra.mxu0 %vm213_vm0, %v2646_v46 }
 0x1b5   : > { %v1036_v56 = vpop.f32.mrf.mxu2 }
 0x1b6   : > { %v1090_v4 = vadd.f32 %v1036_v56, %v782_v8  ;;  %v1344_v32 = vpop.f32.mrf.mxu3  ;;  %v2033_v56 = vld [vmem:[%s3466_s29 + $0x74] sm:$0xff] }
 0x1b7   : > { %v731_v62 = vpop.f32.mrf.mxu1 }
 0x1b8   : > { %v1398_v51 = vadd.f32 %v1344_v32, %v1090_v4  ;;  %v1655_v15 = vpop.f32.mrf.mxu0  ;;  %v783_v10 = vadd.f32 %v731_v62, %v475_v30  ;;  %v2341_v32 = vld [vmem:[%s3466_s29 + $0x75] sm:$0xff] }
 0x1b9   : > { %v2649_v62 = vld [vmem:[%s3466_s29 + $0x76] sm:$0xff] }
 0x1ba   : > { %v4080_v37 = vadd.f32 %v1652_v11, %v1398_v51  ;;  %3244 = vmatmul.msk.f32.gmra.mxu1 %vm213_vm0, %v2029_v5  ;;  %3282 = vmatmul.msk.f32.gmra.mxu2 %vm213_vm0, %v2031_v42  ;;  %v476_v5 = vadd.f32 %v3766_v20, %v3658_v29 }
 0x1bb   : > { %3320 = vmatmul.msk.f32.gmra.mxu3 %vm213_vm0, %v2339_v41  ;;  %3358 = vmatmul.msk.f32.gmra.mxu0 %vm213_vm0, %v2647_v31 }
 0x1bd   : > { %v1039_v1 = vpop.f32.mrf.mxu2 }
 0x1be   : > { %v1091_v39 = vadd.f32 %v1039_v1, %v783_v10  ;;  %v1347_v59 = vpop.f32.mrf.mxu3  ;;  %v2034_v1 = vld [vmem:[%s3466_s29 + $0x7c] sm:$0xff] }
 0x1bf   : > { %v734_v27 = vpop.f32.mrf.mxu1 }
 0x1c0   : > { %v1399_v58 = vadd.f32 %v1347_v59, %v1091_v39  ;;  %v1658_v22 = vpop.f32.mrf.mxu0  ;;  %v784_v21 = vadd.f32 %v734_v27, %v476_v5  ;;  %v2342_v59 = vld [vmem:[%s3466_s29 + $0x7d] sm:$0xff] }
 0x1c1   : > { %v2650_v27 = vld [vmem:[%s3466_s29 + $0x7e] sm:$0xff] }
 0x1c2   : > { %v4091_v44 = vadd.f32 %v1655_v15, %v1399_v58  ;;  %3245 = vmatmul.msk.f32.gmra.mxu1 %vm213_vm0, %v2030_v35  ;;  %3283 = vmatmul.msk.f32.gmra.mxu2 %vm213_vm0, %v2032_v49  ;;  %v477_v35 = vadd.f32 %v3766_v20, %v3673_v36 }
 0x1c3   : > { %3321 = vmatmul.msk.f32.gmra.mxu3 %vm213_vm0, %v2340_v0  ;;  %3359 = vmatmul.msk.f32.gmra.mxu0 %vm213_vm0, %v2648_v38 }
 0x1c5   : > { %v1042_v11 = vpop.f32.mrf.mxu2 }
 0x1c6   : > { %v1092_v46 = vadd.f32 %v1042_v11, %v784_v21  ;;  %v1350_v18 = vpop.f32.mrf.mxu3  ;;  %v2035_v11 = vld [vmem:[%s3466_s29 + $0x84] sm:$0xff] }
 0x1c7   : > { %v737_v8 = vpop.f32.mrf.mxu1 }
 0x1c8   : > { %v1400_v4 = vadd.f32 %v1350_v18, %v1092_v46  ;;  %v1661_v29 = vpop.f32.mrf.mxu0  ;;  %v785_v41 = vadd.f32 %v737_v8, %v477_v35  ;;  %v2343_v18 = vld [vmem:[%s3466_s29 + $0x85] sm:$0xff] }
 0x1ca   : > { %v4102_v51 = vadd.f32 %v1658_v22, %v1400_v4  ;;  %3246 = vmatmul.msk.f32.gmra.mxu1 %vm213_vm0, %v2031_v42  ;;  %3284 = vmatmul.msk.f32.gmra.mxu2 %vm213_vm0, %v2033_v56  ;;  %v478_v42 = vadd.f32 %v3766_v20, %v3688_v43  ;;  %v2651_v20 = vld [vmem:[%s3466_s29 + $0x86] sm:$0xff] }
 0x1cb   : > { %3322 = vmatmul.msk.f32.gmra.mxu3 %vm213_vm0, %v2341_v32  ;;  %3360 = vmatmul.msk.f32.gmra.mxu0 %vm213_vm0, %v2649_v62 }
 0x1cd   : > { %v1045_v15 = vpop.f32.mrf.mxu2 }
 0x1ce   : > { %v1093_v31 = vadd.f32 %v1045_v15, %v785_v41  ;;  %v1353_v30 = vpop.f32.mrf.mxu3  ;;  %v2036_v15 = vld [vmem:[%s3466_s29 + $0x8c] sm:$0xff] }
 0x1cf   : > { %v740_v10 = vpop.f32.mrf.mxu1 }
 0x1d0   : > { %v1401_v39 = vadd.f32 %v1353_v30, %v1093_v31  ;;  %v1664_v36 = vpop.f32.mrf.mxu0  ;;  %v786_v0 = vadd.f32 %v740_v10, %v478_v42  ;;  %v2344_v30 = vld [vmem:[%s3466_s29 + $0x8d] sm:$0xff] }
 0x1d1   : > { %v2652_v10 = vld [vmem:[%s3466_s29 + $0x8e] sm:$0xff] }
 0x1d2   : > { %v4113_v58 = vadd.f32 %v1661_v29, %v1401_v39  ;;  %3247 = vmatmul.msk.f32.gmra.mxu1 %vm213_vm0, %v2032_v49  ;;  %3285 = vmatmul.msk.f32.gmra.mxu2 %vm213_vm0, %v2034_v1  ;;  %v3405_v49 = vld [vmem:[%s4423_s2] ss:$0 sm:$0xff] }
 0x1d3   : > { %3323 = vmatmul.msk.f32.gmra.mxu3 %vm213_vm0, %v2342_v59  ;;  %3361 = vmatmul.msk.f32.gmra.mxu0 %vm213_vm0, %v2650_v27  ;;  %v479_v8 = vadd.f32 %v3405_v49, %v3703_v50 }
 0x1d5   : > { %v1048_v22 = vpop.f32.mrf.mxu2 }
 0x1d6   : > { %v1094_v38 = vadd.f32 %v1048_v22, %v786_v0  ;;  %v1356_v5 = vpop.f32.mrf.mxu3  ;;  %v2037_v22 = vld [vmem:[%s3466_s29 + $0x94] sm:$0xff] }
 0x1d7   : > { %v743_v21 = vpop.f32.mrf.mxu1 }
 0x1d8   : > { %v1402_v46 = vadd.f32 %v1356_v5, %v1094_v38  ;;  %v1667_v43 = vpop.f32.mrf.mxu0  ;;  %v787_v32 = vadd.f32 %v743_v21, %v479_v8  ;;  %v2345_v5 = vld [vmem:[%s3466_s29 + $0x95] sm:$0xff] }
 0x1d9   : > { %v2653_v21 = vld [vmem:[%s3466_s29 + $0x96] sm:$0xff] }
 0x1da   : > { %v4126_v4 = vadd.f32 %v1664_v36, %v1402_v46  ;;  %3248 = vmatmul.msk.f32.gmra.mxu1 %vm213_vm0, %v2033_v56  ;;  %3286 = vmatmul.msk.f32.gmra.mxu2 %vm213_vm0, %v2035_v11  ;;  %v480_v56 = vadd.f32 %v3405_v49, %v3718_v57 }
 0x1db   : > { %3324 = vmatmul.msk.f32.gmra.mxu3 %vm213_vm0, %v2343_v18  ;;  %3362 = vmatmul.msk.f32.gmra.mxu0 %vm213_vm0, %v2651_v20 }
 0x1dd   : > { %v1051_v29 = vpop.f32.mrf.mxu2 }
 0x1de   : > { %v1095_v62 = vadd.f32 %v1051_v29, %v787_v32  ;;  %v1359_v35 = vpop.f32.mrf.mxu3  ;;  %v2038_v29 = vld [vmem:[%s3466_s29 + $0x9c] sm:$0xff] }
 0x1df   : > { %v746_v41 = vpop.f32.mrf.mxu1 }
 0x1e0   : > { %v1403_v31 = vadd.f32 %v1359_v35, %v1095_v62  ;;  %v1670_v50 = vpop.f32.mrf.mxu0  ;;  %v788_v59 = vadd.f32 %v746_v41, %v480_v56  ;;  %v2346_v35 = vld [vmem:[%s3466_s29 + $0x9d] sm:$0xff] }
 0x1e1   : > { %v2654_v41 = vld [vmem:[%s3466_s29 + $0x9e] sm:$0xff] }
 0x1e2   : > { %v4136_v39 = vadd.f32 %v1667_v43, %v1403_v31  ;;  %3249 = vmatmul.msk.f32.gmra.mxu1 %vm213_vm0, %v2034_v1  ;;  %3287 = vmatmul.msk.f32.gmra.mxu2 %vm213_vm0, %v2036_v15  ;;  %v481_v1 = vadd.f32 %v3405_v49, %v3739_v2 }
 0x1e3   : > { %3325 = vmatmul.msk.f32.gmra.mxu3 %vm213_vm0, %v2344_v30  ;;  %3363 = vmatmul.msk.f32.gmra.mxu0 %vm213_vm0, %v2652_v10 }
 0x1e5   : > { %v1054_v36 = vpop.f32.mrf.mxu2 }
 0x1e6   : > { %v1096_v27 = vadd.f32 %v1054_v36, %v788_v59  ;;  %v1362_v42 = vpop.f32.mrf.mxu3  ;;  %v2039_v36 = vld [vmem:[%s3466_s29 + $0xa4] sm:$0xff] }
 0x1e7   : > { %v749_v0 = vpop.f32.mrf.mxu1 }
 0x1e8   : > { %v1404_v38 = vadd.f32 %v1362_v42, %v1096_v27  ;;  %v1673_v57 = vpop.f32.mrf.mxu0  ;;  %v789_v18 = vadd.f32 %v749_v0, %v481_v1  ;;  %v2655_v42 = vld [vmem:[%s3466_s29 + $0xa6] sm:$0xff] }
 0x1e9   : > { %v2040_v1 = vld [vmem:[%s3466_s29 + $0xac] sm:$0xff] }
 0x1ea   : > { %v4146_v46 = vadd.f32 %v1670_v50, %v1404_v38  ;;  %3250 = vmatmul.msk.f32.gmra.mxu1 %vm213_vm0, %v2035_v11  ;;  %3288 = vmatmul.msk.f32.gmra.mxu2 %vm213_vm0, %v2037_v22  ;;  %v482_v11 = vadd.f32 %v3405_v49, %v3760_v13  ;;  %v2347_v13 = vld [vmem:[%s3466_s29 + $0xa5] sm:$0xff] }
 0x1eb   : > { %3326 = vmatmul.msk.f32.gmra.mxu3 %vm213_vm0, %v2345_v5  ;;  %3364 = vmatmul.msk.f32.gmra.mxu0 %vm213_vm0, %v2653_v21 }
 0x1ed   : > { %v1057_v43 = vpop.f32.mrf.mxu2 }
 0x1ee   : > { %v1097_v20 = vadd.f32 %v1057_v43, %v789_v18  ;;  %v1365_v8 = vpop.f32.mrf.mxu3  ;;  %v2348_v43 = vld [vmem:[%s3466_s29 + $0xad] sm:$0xff] }
 0x1ef   : > { %v752_v32 = vpop.f32.mrf.mxu1 }
 0x1f0   : > { %v1405_v62 = vadd.f32 %v1365_v8, %v1097_v20  ;;  %v1676_v2 = vpop.f32.mrf.mxu0  ;;  %v790_v30 = vadd.f32 %v752_v32, %v482_v11  ;;  %v2656_v8 = vld [vmem:[%s3466_s29 + $0xae] sm:$0xff] }
 0x1f2   : > { %v4156_v31 = vadd.f32 %v1673_v57, %v1405_v62  ;;  %3251 = vmatmul.msk.f32.gmra.mxu1 %vm213_vm0, %v2036_v15  ;;  %3289 = vmatmul.msk.f32.gmra.mxu2 %vm213_vm0, %v2038_v29 }
 0x1f3   : > { %3327 = vmatmul.msk.f32.gmra.mxu3 %vm213_vm0, %v2346_v35  ;;  %3365 = vmatmul.msk.f32.gmra.mxu0 %vm213_vm0, %v2654_v41  ;;  %v2041_v41 = vld [vmem:[%s3466_s29 + $0xb4] sm:$0xff] }
 0x1f5   : > { %v1060_v50 = vpop.f32.mrf.mxu2 }
 0x1f6   : > { %v1098_v10 = vadd.f32 %v1060_v50, %v790_v30  ;;  %v1368_v56 = vpop.f32.mrf.mxu3  ;;  %v2349_v30 = vld [vmem:[%s3466_s29 + $0xb5] sm:$0xff] }
 0x1f7   : > { %v1879_v59 = vpop.f32.mrf.mxu1  ;;  %v2657_v50 = vld [vmem:[%s3466_s29 + $0xb6] sm:$0xff] }
 0x1f8   : > { %v1406_v27 = vadd.f32 %v1368_v56, %v1098_v10  ;;  %v2803_v49 = vpop.f32.mrf.mxu0  ;;  %v1987_v0 = vadd.f32 %v1879_v59, %v3781_v55 }
 0x1fa   : > { %v4165_v15 = vadd.f32 %v1676_v2, %v1406_v27  ;;  %3252 = vmatmul.msk.f32.gmra.mxu1 %vm213_vm0, %v2037_v22  ;;  %3290 = vmatmul.msk.f32.gmra.mxu2 %vm213_vm0, %v2039_v36 }
 0x1fb   : > { %3328 = vmatmul.msk.f32.gmra.mxu3 %vm213_vm0, %v2347_v13  ;;  %3366 = vmatmul.msk.f32.gmra.mxu0 %vm213_vm0, %v2655_v42 }
 0x1fd   : > { %v2187_v38 = vpop.f32.mrf.mxu2 }
 0x1fe   : > { %v2295_v5 = vadd.f32 %v2187_v38, %v1987_v0  ;;  %v2495_v57 = vpop.f32.mrf.mxu3  ;;  %v2350_v0 = vld [vmem:[%s3466_s29 + $0xbd] sm:$0xff] }
 0x1ff   : > { %v1882_v21 = vpop.f32.mrf.mxu1  ;;  %v2658_v38 = vld [vmem:[%s3466_s29 + $0xbe] sm:$0xff] }
 0x200   : > { %v2603_v18 = vadd.f32 %v2495_v57, %v2295_v5  ;;  %v2806_v20 = vpop.f32.mrf.mxu0  ;;  %v1988_v22 = vadd.f32 %v1882_v21, %v3792_v17 }
 0x202   : > { %v2911_v55 = vadd.f32 %v2803_v49, %v2603_v18  ;;  %3253 = vmatmul.msk.f32.gmra.mxu1 %vm213_vm0, %v2038_v29  ;;  %3291 = vmatmul.msk.f32.gmra.mxu2 %vm213_vm0, %v2040_v1  ;;  %v2042_v49 = vld [vmem:[%s3466_s29 + $0xbc] sm:$0xff] }
 0x203   : > { %3329 = vmatmul.msk.f32.gmra.mxu3 %vm213_vm0, %v2348_v43  ;;  %3367 = vmatmul.msk.f32.gmra.mxu0 %vm213_vm0, %v2656_v8 }
 0x204   : > { %2948 = vst.msk [vmem:[%s4179_s10] sm:$0xff] %vm2947_vm1, %v2911_v55  ;;  %v2351_v55 = vld [vmem:[%s3466_s29 + $0xc5] sm:$0xff] }
 0x205   : > { %v2190_v32 = vpop.f32.mrf.mxu2 }
 0x206   : > { %v2296_v62 = vadd.f32 %v2190_v32, %v1988_v22  ;;  %v2498_v35 = vpop.f32.mrf.mxu3  ;;  %v2659_v22 = vld [vmem:[%s3466_s29 + $0xc6] sm:$0xff] }
 0x207   : > { %v1885_v2 = vpop.f32.mrf.mxu1 }
 0x208   : > { %v2604_v11 = vadd.f32 %v2498_v35, %v2296_v62  ;;  %v2809_v29 = vpop.f32.mrf.mxu0  ;;  %v1989_v17 = vadd.f32 %v1885_v2, %v3803_v45 }
 0x20a   : > { %v2912_v10 = vadd.f32 %v2806_v20, %v2604_v11  ;;  %3254 = vmatmul.msk.f32.gmra.mxu1 %vm213_vm0, %v2039_v36  ;;  %3292 = vmatmul.msk.f32.gmra.mxu2 %vm213_vm0, %v2041_v41  ;;  %v2043_v20 = vld [vmem:[%s3466_s29 + $0xc4] sm:$0xff] }
 0x20b   : > { %3330 = vmatmul.msk.f32.gmra.mxu3 %vm213_vm0, %v2349_v30  ;;  %3368 = vmatmul.msk.f32.gmra.mxu0 %vm213_vm0, %v2657_v50  ;;  %v2044_v30 = vld [vmem:[%s3466_s29 + $0xcc] sm:$0xff] }
 0x20c   : > { %2949 = vst.msk [vmem:[%s4179_s10 + $0x8] sm:$0xff] %vm2947_vm1, %v2912_v10  ;;  %v2352_v50 = vld [vmem:[%s3466_s29 + $0xcd] sm:$0xff] }
 0x20d   : > { %v2193_v56 = vpop.f32.mrf.mxu2  ;;  %v2660_v10 = vld [vmem:[%s3466_s29 + $0xce] sm:$0xff] }
 0x20e   : > { %v2297_v59 = vadd.f32 %v2193_v56, %v1989_v17  ;;  %v2501_v27 = vpop.f32.mrf.mxu3 }
 0x20f   : > { %v1888_v13 = vpop.f32.mrf.mxu1 }
 0x210   : > { %v2605_v42 = vadd.f32 %v2501_v27, %v2297_v59  ;;  %v2812_v36 = vpop.f32.mrf.mxu0  ;;  %v1990_v45 = vadd.f32 %v1888_v13, %v3814_v3 }
 0x212   : > { %v2913_v5 = vadd.f32 %v2809_v29, %v2605_v42  ;;  %3255 = vmatmul.msk.f32.gmra.mxu1 %vm213_vm0, %v2040_v1  ;;  %3293 = vmatmul.msk.f32.gmra.mxu2 %vm213_vm0, %v2042_v49  ;;  %v2045_v42 = vld [vmem:[%s3466_s29 + $0xd4] sm:$0xff] }
 0x213   : > { %3331 = vmatmul.msk.f32.gmra.mxu3 %vm213_vm0, %v2350_v0  ;;  %3369 = vmatmul.msk.f32.gmra.mxu0 %vm213_vm0, %v2658_v38  ;;  %v2661_v38 = vld [vmem:[%s3466_s29 + $0xd6] sm:$0xff] }
 0x214   : > { %2950 = vst.msk [vmem:[%s4179_s10 + $0x10] sm:$0xff] %vm2947_vm1, %v2913_v5 }
 0x215   : > { %v2196_v57 = vpop.f32.mrf.mxu2 }
 0x216   : > { %v2298_v21 = vadd.f32 %v2196_v57, %v1990_v45  ;;  %v2504_v18 = vpop.f32.mrf.mxu3 }
 0x217   : > { %v1891_v43 = vpop.f32.mrf.mxu1 }
 0x218   : > { %v2606_v8 = vadd.f32 %v2504_v18, %v2298_v21  ;;  %v2815_v1 = vpop.f32.mrf.mxu0  ;;  %v1991_v3 = vadd.f32 %v1891_v43, %v3825_v34  ;;  %v2046_v43 = vld [vmem:[%s3466_s29 + $0xdc] sm:$0xff] }
 0x21a   : > { %v2914_v32 = vadd.f32 %v2812_v36, %v2606_v8  ;;  %3256 = vmatmul.msk.f32.gmra.mxu1 %vm213_vm0, %v2041_v41  ;;  %3294 = vmatmul.msk.f32.gmra.mxu2 %vm213_vm0, %v2043_v20  ;;  %v2353_v36 = vld [vmem:[%s3466_s29 + $0xd5] sm:$0xff] }
 0x21b   : > { %3332 = vmatmul.msk.f32.gmra.mxu3 %vm213_vm0, %v2351_v55  ;;  %3370 = vmatmul.msk.f32.gmra.mxu0 %vm213_vm0, %v2659_v22  ;;  %v2354_v55 = vld [vmem:[%s3466_s29 + $0xdd] sm:$0xff] }
 0x21c   : > { %2951 = vst.msk [vmem:[%s4179_s10 + $0x18] sm:$0xff] %vm2947_vm1, %v2914_v32 }
 0x21d   : > { %v2199_v62 = vpop.f32.mrf.mxu2 }
 0x21e   : > { %v2299_v35 = vadd.f32 %v2199_v62, %v1991_v3  ;;  %v2507_v2 = vpop.f32.mrf.mxu3 }
 0x21f   : > { %v1894_v11 = vpop.f32.mrf.mxu1 }
 0x220   : > { %v2607_v29 = vadd.f32 %v2507_v2, %v2299_v35  ;;  %v2818_v41 = vpop.f32.mrf.mxu0  ;;  %v1992_v34 = vadd.f32 %v1894_v11, %v3836_v60  ;;  %v2047_v2 = vld [vmem:[%s3466_s29 + $0xe4] sm:$0xff] }
 0x222   : > { %v2915_v17 = vadd.f32 %v2815_v1, %v2607_v29  ;;  %3257 = vmatmul.msk.f32.gmra.mxu1 %vm213_vm0, %v2042_v49  ;;  %3295 = vmatmul.msk.f32.gmra.mxu2 %vm213_vm0, %v2044_v30  ;;  %v2662_v1 = vld [vmem:[%s3466_s29 + $0xde] sm:$0xff] }
 0x223   : > { %3333 = vmatmul.msk.f32.gmra.mxu3 %vm213_vm0, %v2352_v50  ;;  %3371 = vmatmul.msk.f32.gmra.mxu0 %vm213_vm0, %v2660_v10  ;;  %v2355_v29 = vld [vmem:[%s3466_s29 + $0xe5] sm:$0xff] }
 0x224   : > { %2952 = vst.msk [vmem:[%s4179_s10 + $0x20] sm:$0xff] %vm2947_vm1, %v2915_v17  ;;  %v2663_v50 = vld [vmem:[%s3466_s29 + $0xe6] sm:$0xff] }
 0x225   : > { %v2202_v56 = vpop.f32.mrf.mxu2 }
 0x226   : > { %v2300_v59 = vadd.f32 %v2202_v56, %v1992_v34  ;;  %v2510_v27 = vpop.f32.mrf.mxu3 }
 0x227   : > { %v1897_v13 = vpop.f32.mrf.mxu1 }
 0x228   : > { %v2608_v0 = vadd.f32 %v2510_v27, %v2300_v59  ;;  %v2821_v49 = vpop.f32.mrf.mxu0  ;;  %v1993_v60 = vadd.f32 %v1897_v13, %v3847_v25  ;;  %v2048_v59 = vld [vmem:[%s3466_s29 + $0xec] sm:$0xff] }
 0x229   : > { %v2356_v13 = vld [vmem:[%s3466_s29 + $0xed] sm:$0xff] }
 0x22a   : > { %v2916_v5 = vadd.f32 %v2818_v41, %v2608_v0  ;;  %3258 = vmatmul.msk.f32.gmra.mxu1 %vm213_vm0, %v2043_v20  ;;  %3296 = vmatmul.msk.f32.gmra.mxu2 %vm213_vm0, %v2045_v42  ;;  %v2664_v0 = vld [vmem:[%s3466_s29 + $0xee] sm:$0xff] }
 0x22b   : > { %3334 = vmatmul.msk.f32.gmra.mxu3 %vm213_vm0, %v2353_v36  ;;  %3372 = vmatmul.msk.f32.gmra.mxu0 %vm213_vm0, %v2661_v38 }
 0x22c   : > { %2953 = vst.msk [vmem:[%s4179_s10 + $0x28] sm:$0xff] %vm2947_vm1, %v2916_v5 }
 0x22d   : > { %v2205_v45 = vpop.f32.mrf.mxu2 }
 0x22e   : > { %v2301_v57 = vadd.f32 %v2205_v45, %v1993_v60  ;;  %v2513_v21 = vpop.f32.mrf.mxu3  ;;  %v2049_v45 = vld [vmem:[%s3466_s29 + $0xf4] sm:$0xff] }
 0x22f   : > { %v1900_v18 = vpop.f32.mrf.mxu1 }
 0x230   : > { %v2609_v8 = vadd.f32 %v2513_v21, %v2301_v57  ;;  %v2824_v20 = vpop.f32.mrf.mxu0  ;;  %v1994_v25 = vadd.f32 %v1900_v18, %v3858_v52  ;;  %v2357_v21 = vld [vmem:[%s3466_s29 + $0xf5] sm:$0xff] }
 0x232   : > { %v2917_v22 = vadd.f32 %v2821_v49, %v2609_v8  ;;  %3259 = vmatmul.msk.f32.gmra.mxu1 %vm213_vm0, %v2044_v30  ;;  %3297 = vmatmul.msk.f32.gmra.mxu2 %vm213_vm0, %v2046_v43 }
 0x233   : > { %3335 = vmatmul.msk.f32.gmra.mxu3 %vm213_vm0, %v2354_v55  ;;  %3373 = vmatmul.msk.f32.gmra.mxu0 %vm213_vm0, %v2662_v1 }
 0x234   : > { %2954 = vst.msk [vmem:[%s4179_s10 + $0x30] sm:$0xff] %vm2947_vm1, %v2917_v22 }
 0x235   : > { %v2208_v32 = vpop.f32.mrf.mxu2 }
 0x236   : > { %v2302_v3 = vadd.f32 %v2208_v32, %v1994_v25  ;;  %v2516_v62 = vpop.f32.mrf.mxu3  ;;  %v2050_v25 = vld [vmem:[%s3466_s29 + $0xfc] sm:$0xff] }
 0x237   : > { %v1903_v35 = vpop.f32.mrf.mxu1 }
 0x238   : > { %v2610_v11 = vadd.f32 %v2516_v62, %v2302_v3  ;;  %v2827_v30 = vpop.f32.mrf.mxu0  ;;  %v1995_v52 = vadd.f32 %v1903_v35, %v3869_v19  ;;  %v2358_v3 = vld [vmem:[%s3466_s29 + $0xfd] sm:$0xff] }
 0x239   : > { %v2666_v35 = vld [vmem:[%s3466_s29 + $0xfe] sm:$0xff] }
 0x23a   : > { %v2918_v41 = vadd.f32 %v2824_v20, %v2610_v11  ;;  %3260 = vmatmul.msk.f32.gmra.mxu1 %vm213_vm0, %v2045_v42  ;;  %3298 = vmatmul.msk.f32.gmra.mxu2 %vm213_vm0, %v2047_v2 }
 0x23b   : > { %3336 = vmatmul.msk.f32.gmra.mxu3 %vm213_vm0, %v2355_v29  ;;  %3374 = vmatmul.msk.f32.gmra.mxu0 %vm213_vm0, %v2663_v50 }
 0x23c   : > { %2955 = vst.msk [vmem:[%s4179_s10 + $0x38] sm:$0xff] %vm2947_vm1, %v2918_v41  ;;  %v2051_v41 = vld [vmem:[%s3466_s29 + $0x104] sm:$0xff] }
 0x23d   : > { %v2211_v10 = vpop.f32.mrf.mxu2 }
 0x23e   : > { %v2303_v17 = vadd.f32 %v2211_v10, %v1995_v52  ;;  %v2519_v34 = vpop.f32.mrf.mxu3  ;;  %v2359_v10 = vld [vmem:[%s3466_s29 + $0x105] sm:$0xff] }
 0x23f   : > { %v1906_v56 = vpop.f32.mrf.mxu1 }
 0x240   : > { %v2611_v27 = vadd.f32 %v2519_v34, %v2303_v17  ;;  %v2830_v42 = vpop.f32.mrf.mxu0  ;;  %v1996_v19 = vadd.f32 %v1906_v56, %v3880_v26  ;;  %v2667_v34 = vld [vmem:[%s3466_s29 + $0x106] sm:$0xff] }
 0x242   : > { %v2919_v36 = vadd.f32 %v2827_v30, %v2611_v27  ;;  %3261 = vmatmul.msk.f32.gmra.mxu1 %vm213_vm0, %v2046_v43  ;;  %3299 = vmatmul.msk.f32.gmra.mxu2 %vm213_vm0, %v2048_v59  ;;  %v2665_v43 = vld [vmem:[%s3466_s29 + $0xf6] sm:$0xff] }
 0x243   : > { %3337 = vmatmul.msk.f32.gmra.mxu3 %vm213_vm0, %v2356_v13  ;;  %3375 = vmatmul.msk.f32.gmra.mxu0 %vm213_vm0, %v2664_v0  ;;  %v2052_v0 = vld [vmem:[%s3466_s29 + $0x10c] sm:$0xff] }
 0x244   : > { %2956 = vst.msk [vmem:[%s4179_s10 + $0x40] sm:$0xff] %vm2947_vm1, %v2919_v36 }
 0x245   : > { %v2214_v49 = vpop.f32.mrf.mxu2 }
 0x246   : > { %v2304_v38 = vadd.f32 %v2214_v49, %v1996_v19  ;;  %v2522_v5 = vpop.f32.mrf.mxu3  ;;  %v2360_v19 = vld [vmem:[%s3466_s29 + $0x10d] sm:$0xff] }
 0x247   : > { %v1909_v60 = vpop.f32.mrf.mxu1 }
 0x248   : > { %v2612_v57 = vadd.f32 %v2522_v5, %v2304_v38  ;;  %v2833_v18 = vpop.f32.mrf.mxu0  ;;  %v1997_v26 = vadd.f32 %v1909_v60, %v3891_v33  ;;  %v2668_v38 = vld [vmem:[%s3466_s29 + $0x10e] sm:$0xff] }
 0x24a   : > { %v2920_v8 = vadd.f32 %v2830_v42, %v2612_v57  ;;  %3262 = vmatmul.msk.f32.gmra.mxu1 %vm213_vm0, %v2047_v2  ;;  %3300 = vmatmul.msk.f32.gmra.mxu2 %vm213_vm0, %v2049_v45 }
 0x24b   : > { %3338 = vmatmul.msk.f32.gmra.mxu3 %vm213_vm0, %v2357_v21  ;;  %3376 = vmatmul.msk.f32.gmra.mxu0 %vm213_vm0, %v2665_v43 }
 0x24c   : > { %2957 = vst.msk [vmem:[%s4179_s10 + $0x48] sm:$0xff] %vm2947_vm1, %v2920_v8  ;;  %v2361_v8 = vld [vmem:[%s3466_s29 + $0x115] sm:$0xff] }
 0x24d   : > { %v2217_v55 = vpop.f32.mrf.mxu2 }
 0x24e   : > { %v2305_v20 = vadd.f32 %v2217_v55, %v1997_v26  ;;  %v2525_v1 = vpop.f32.mrf.mxu3  ;;  %v2669_v55 = vld [vmem:[%s3466_s29 + $0x116] sm:$0xff] }
 0x24f   : > { %v1912_v22 = vpop.f32.mrf.mxu1 }
 0x250   : > { %v2613_v32 = vadd.f32 %v2525_v1, %v2305_v20  ;;  %v2836_v62 = vpop.f32.mrf.mxu0  ;;  %v1998_v33 = vadd.f32 %v1912_v22, %v3902_v40 }
 0x252   : > { %v2921_v2 = vadd.f32 %v2833_v18, %v2613_v32  ;;  %3263 = vmatmul.msk.f32.gmra.mxu1 %vm213_vm0, %v2048_v59  ;;  %3301 = vmatmul.msk.f32.gmra.mxu2 %vm213_vm0, %v2050_v25  ;;  %v2053_v18 = vld [vmem:[%s3466_s29 + $0x114] sm:$0xff] }
 0x253   : > { %3339 = vmatmul.msk.f32.gmra.mxu3 %vm213_vm0, %v2358_v3  ;;  %3377 = vmatmul.msk.f32.gmra.mxu0 %vm213_vm0, %v2666_v35  ;;  %v2054_v3 = vld [vmem:[%s3466_s29 + $0x11c] sm:$0xff] }
 0x254   : > { %2958 = vst.msk [vmem:[%s4179_s10 + $0x50] sm:$0xff] %vm2947_vm1, %v2921_v2  ;;  %v2362_v35 = vld [vmem:[%s3466_s29 + $0x11d] sm:$0xff] }
 0x255   : > { %v2220_v11 = vpop.f32.mrf.mxu2 }
 0x256   : > { %v2306_v29 = vadd.f32 %v2220_v11, %v1998_v33  ;;  %v2528_v30 = vpop.f32.mrf.mxu3  ;;  %v2670_v33 = vld [vmem:[%s3466_s29 + $0x11e] sm:$0xff] }
 0x257   : > { %v1915_v50 = vpop.f32.mrf.mxu1 }
 0x258   : > { %v2614_v52 = vadd.f32 %v2528_v30, %v2306_v29  ;;  %v2839_v17 = vpop.f32.mrf.mxu0  ;;  %v1999_v40 = vadd.f32 %v1915_v50, %v3913_v47 }
 0x25a   : > { %v2922_v56 = vadd.f32 %v2836_v62, %v2614_v52  ;;  %3264 = vmatmul.msk.f32.gmra.mxu1 %vm213_vm0, %v2049_v45  ;;  %3302 = vmatmul.msk.f32.gmra.mxu2 %vm213_vm0, %v2051_v41  ;;  %v2055_v52 = vld [vmem:[%s3466_s29 + $0x124] sm:$0xff] }
 0x25b   : > { %3340 = vmatmul.msk.f32.gmra.mxu3 %vm213_vm0, %v2359_v10  ;;  %3378 = vmatmul.msk.f32.gmra.mxu0 %vm213_vm0, %v2667_v34 }
 0x25c   : > { %2959 = vst.msk [vmem:[%s4179_s10 + $0x58] sm:$0xff] %vm2947_vm1, %v2922_v56  ;;  %v2671_v56 = vld [vmem:[%s3466_s29 + $0x126] sm:$0xff] }
 0x25d   : > { %v2223_v59 = vpop.f32.mrf.mxu2 }
 0x25e   : > { %v2307_v27 = vadd.f32 %v2223_v59, %v1999_v40  ;;  %v2531_v13 = vpop.f32.mrf.mxu3 }
 0x25f   : > { %v1918_v42 = vpop.f32.mrf.mxu1 }
 0x260   : > { %v2615_v36 = vadd.f32 %v2531_v13, %v2307_v27  ;;  %v2842_v49 = vpop.f32.mrf.mxu0  ;;  %v2000_v47 = vadd.f32 %v1918_v42, %v3924_v54 }
 0x262   : > { %v2923_v5 = vadd.f32 %v2839_v17, %v2615_v36  ;;  %3265 = vmatmul.msk.f32.gmra.mxu1 %vm213_vm0, %v2050_v25  ;;  %3303 = vmatmul.msk.f32.gmra.mxu2 %vm213_vm0, %v2052_v0  ;;  %v2363_v17 = vld [vmem:[%s3466_s29 + $0x125] sm:$0xff] }
 0x263   : > { %3341 = vmatmul.msk.f32.gmra.mxu3 %vm213_vm0, %v2360_v19  ;;  %3379 = vmatmul.msk.f32.gmra.mxu0 %vm213_vm0, %v2668_v38  ;;  %v2364_v19 = vld [vmem:[%s3466_s29 + $0x12d] sm:$0xff] }
 0x264   : > { %2960 = vst.msk [vmem:[%s4179_s10 + $0x60] sm:$0xff] %vm2947_vm1, %v2923_v5  ;;  %v2672_v38 = vld [vmem:[%s3466_s29 + $0x12e] sm:$0xff] }
 0x265   : > { %v2226_v60 = vpop.f32.mrf.mxu2 }
 0x266   : > { %v2308_v45 = vadd.f32 %v2226_v60, %v2000_v47  ;;  %v2534_v57 = vpop.f32.mrf.mxu3 }
 0x267   : > { %v1921_v21 = vpop.f32.mrf.mxu1 }
 0x268   : > { %v2616_v43 = vadd.f32 %v2534_v57, %v2308_v45  ;;  %v2845_v26 = vpop.f32.mrf.mxu0  ;;  %v2001_v54 = vadd.f32 %v1921_v21, %v3935_v61  ;;  %v2057_v21 = vld [vmem:[%s3466_s29 + $0x134] sm:$0xff] }
 0x26a   : > { %v2924_v20 = vadd.f32 %v2842_v49, %v2616_v43  ;;  %3266 = vmatmul.msk.f32.gmra.mxu1 %vm213_vm0, %v2051_v41  ;;  %3304 = vmatmul.msk.f32.gmra.mxu2 %vm213_vm0, %v2053_v18  ;;  %v2365_v43 = vld [vmem:[%s3466_s29 + $0x135] sm:$0xff] }
 0x26b   : > { %3342 = vmatmul.msk.f32.gmra.mxu3 %vm213_vm0, %v2361_v8  ;;  %3380 = vmatmul.msk.f32.gmra.mxu0 %vm213_vm0, %v2669_v55 }
 0x26c   : > { %2961 = vst.msk [vmem:[%s4179_s10 + $0x68] sm:$0xff] %vm2947_vm1, %v2924_v20 }
 0x26d   : > { %v2229_v1 = vpop.f32.mrf.mxu2 }
 0x26e   : > { %v2309_v22 = vadd.f32 %v2229_v1, %v2001_v54  ;;  %v2537_v25 = vpop.f32.mrf.mxu3 }
 0x26f   : > { %v1924_v32 = vpop.f32.mrf.mxu1 }
 0x270   : > { %v2617_v62 = vadd.f32 %v2537_v25, %v2309_v22  ;;  %v2848_v2 = vpop.f32.mrf.mxu0  ;;  %v2002_v61 = vadd.f32 %v1924_v32, %v3946_v7  ;;  %v2058_v25 = vld [vmem:[%s3466_s29 + $0x13c] sm:$0xff] }
 0x272   : > { %v2925_v11 = vadd.f32 %v2845_v26, %v2617_v62  ;;  %3267 = vmatmul.msk.f32.gmra.mxu1 %vm213_vm0, %v2052_v0  ;;  %3305 = vmatmul.msk.f32.gmra.mxu2 %vm213_vm0, %v2054_v3  ;;  %v2056_v0 = vld [vmem:[%s3466_s29 + $0x12c] sm:$0xff]  ;;  %v2673_v26 = vld [vmem:[%s3466_s29 + $0x136] sm:$0xff] }
 0x273   : > { %3343 = vmatmul.msk.f32.gmra.mxu3 %vm213_vm0, %v2362_v35  ;;  %3381 = vmatmul.msk.f32.gmra.mxu0 %vm213_vm0, %v2670_v33  ;;  %v2674_v35 = vld [vmem:[%s3466_s29 + $0x13e] sm:$0xff] }
 0x274   : > { %2962 = vst.msk [vmem:[%s4179_s10 + $0x70] sm:$0xff] %vm2947_vm1, %v2925_v11 }
 0x275   : > { %v2232_v29 = vpop.f32.mrf.mxu2 }
 0x276   : > { %v2310_v30 = vadd.f32 %v2232_v29, %v2002_v61  ;;  %v2540_v50 = vpop.f32.mrf.mxu3 }
 0x277   : > { %v1927_v41 = vpop.f32.mrf.mxu1 }
 0x278   : > { %v2618_v10 = vadd.f32 %v2540_v50, %v2310_v30  ;;  %v2851_v34 = vpop.f32.mrf.mxu0  ;;  %v2003_v7 = vadd.f32 %v1927_v41, %v3957_v9 }
 0x27a   : > { %v2926_v40 = vadd.f32 %v2848_v2, %v2618_v10  ;;  %3268 = vmatmul.msk.f32.gmra.mxu1 %vm213_vm0, %v2053_v18  ;;  %3306 = vmatmul.msk.f32.gmra.mxu2 %vm213_vm0, %v2055_v52 }
 0x27b   : > { %3344 = vmatmul.msk.f32.gmra.mxu3 %vm213_vm0, %v2363_v17  ;;  %3382 = vmatmul.msk.f32.gmra.mxu0 %vm213_vm0, %v2671_v56 }
 0x27c   : > { %2963 = vst.msk [vmem:[%s4179_s10 + $0x78] sm:$0xff] %vm2947_vm1, %v2926_v40 }
 0x27d   : > { %v2235_v59 = vpop.f32.mrf.mxu2 }
 0x27e   : > { %v2311_v27 = vadd.f32 %v2235_v59, %v2003_v7  ;;  %v2543_v13 = vpop.f32.mrf.mxu3 }
 0x27f   : > { %v1930_v42 = vpop.f32.mrf.mxu1 }
 0x280   : > { %v2619_v36 = vadd.f32 %v2543_v13, %v2311_v27  ;;  %v2854_v49 = vpop.f32.mrf.mxu0  ;;  %v2004_v9 = vadd.f32 %v1930_v42, %v3968_v16 }
 0x282   : > { %v2927_v5 = vadd.f32 %v2851_v34, %v2619_v36  ;;  %3269 = vmatmul.msk.f32.gmra.mxu1 %vm213_vm0, %v2054_v3  ;;  %3307 = vmatmul.msk.f32.gmra.mxu2 %vm213_vm0, %v2056_v0  ;;  %v2366_v3 = vld [vmem:[%s3466_s29 + $0x13d] sm:$0xff] }
 0x283   : > { %3345 = vmatmul.msk.f32.gmra.mxu3 %vm213_vm0, %v2364_v19  ;;  %3383 = vmatmul.msk.f32.gmra.mxu0 %vm213_vm0, %v2672_v38 }
 0x284   : > { %2964 = vst.msk [vmem:[%s4179_s10 + $0x80] sm:$0xff] %vm2947_vm1, %v2927_v5 }
 0x285   : > { %v2238_v47 = vpop.f32.mrf.mxu2 }
 0x286   : > { %v2312_v60 = vadd.f32 %v2238_v47, %v2004_v9  ;;  %v2546_v45 = vpop.f32.mrf.mxu3 }
 0x287   : > { %v1933_v57 = vpop.f32.mrf.mxu1 }
 0x288   : > { %v2620_v18 = vadd.f32 %v2546_v45, %v2312_v60  ;;  %v2857_v8 = vpop.f32.mrf.mxu0  ;;  %v2005_v16 = vadd.f32 %v1933_v57, %v3979_v23 }
 0x28a   : > { %v2928_v55 = vadd.f32 %v2854_v49, %v2620_v18  ;;  %3270 = vmatmul.msk.f32.gmra.mxu1 %vm213_vm0, %v2055_v52  ;;  %3308 = vmatmul.msk.f32.gmra.mxu2 %vm213_vm0, %v2057_v21 }
 0x28b   : > { %3346 = vmatmul.msk.f32.gmra.mxu3 %vm213_vm0, %v2365_v43  ;;  %3384 = vmatmul.msk.f32.gmra.mxu0 %vm213_vm0, %v2673_v26 }
 0x28c   : > { %2965 = vst.msk [vmem:[%s4179_s10 + $0x88] sm:$0xff] %vm2947_vm1, %v2928_v55 }
 0x28d   : > { %v2241_v20 = vpop.f32.mrf.mxu2 }
 0x28e   : > { %v2313_v54 = vadd.f32 %v2241_v20, %v2005_v16  ;;  %v2549_v1 = vpop.f32.mrf.mxu3 }
 0x28f   : > { %v1936_v22 = vpop.f32.mrf.mxu1 }
 0x290   : > { %v2621_v32 = vadd.f32 %v2549_v1, %v2313_v54  ;;  %v2860_v62 = vpop.f32.mrf.mxu0  ;;  %v2006_v23 = vadd.f32 %v1936_v22, %v3991_v12 }
 0x292   : > { %v2929_v2 = vadd.f32 %v2857_v8, %v2621_v32  ;;  %3271 = vmatmul.msk.f32.gmra.mxu1 %vm213_vm0, %v2056_v0  ;;  %3309 = vmatmul.msk.f32.gmra.mxu2 %vm213_vm0, %v2058_v25 }
 0x293   : > { %3347 = vmatmul.msk.f32.gmra.mxu3 %vm213_vm0, %v2366_v3  ;;  %3385 = vmatmul.msk.f32.gmra.mxu0 %vm213_vm0, %v2674_v35 }
 0x294   : > { %2966 = vst.msk [vmem:[%s4179_s10 + $0x90] sm:$0xff] %vm2947_vm1, %v2929_v2 }
 0x295   : > { %v2244_v33 = vpop.f32.mrf.mxu2 }
 0x296   : > { %v2314_v11 = vadd.f32 %v2244_v33, %v2006_v23  ;;  %v2552_v61 = vpop.f32.mrf.mxu3 }
 0x297   : > { %v1939_v29 = vpop.f32.mrf.mxu1 }
 0x298   : > { %v2622_v30 = vadd.f32 %v2552_v61, %v2314_v11  ;;  %v2863_v50 = vpop.f32.mrf.mxu0  ;;  %v2007_v52 = vadd.f32 %v1939_v29, %v4003_v14 }
 0x29a   : > { %v2930_v41 = vadd.f32 %v2860_v62, %v2622_v30 }
 0x29c   : > { %2967 = vst.msk [vmem:[%s4179_s10 + $0x98] sm:$0xff] %vm2947_vm1, %v2930_v41 }
 0x29d   : > { %v2247_v10 = vpop.f32.mrf.mxu2 }
 0x29e   : > { %v2315_v17 = vadd.f32 %v2247_v10, %v2007_v52  ;;  %v2555_v34 = vpop.f32.mrf.mxu3 }
 0x29f   : > { %v1942_v56 = vpop.f32.mrf.mxu1 }
 0x2a0   : > { %v2623_v12 = vadd.f32 %v2555_v34, %v2315_v17  ;;  %v2866_v40 = vpop.f32.mrf.mxu0  ;;  %v2008_v59 = vadd.f32 %v1942_v56, %v4014_v63 }
 0x2a2   : > { %v2931_v7 = vadd.f32 %v2863_v50, %v2623_v12 }
 0x2a4   : > { %2968 = vst.msk [vmem:[%s4179_s10 + $0xa0] sm:$0xff] %vm2947_vm1, %v2931_v7 }
 0x2a5   : > { %v2250_v27 = vpop.f32.mrf.mxu2 }
 0x2a6   : > { %v2316_v13 = vadd.f32 %v2250_v27, %v2008_v59  ;;  %v2558_v42 = vpop.f32.mrf.mxu3 }
 0x2a7   : > { %v1945_v0 = vpop.f32.mrf.mxu1 }
 0x2a8   : > { %v2624_v14 = vadd.f32 %v2558_v42, %v2316_v13  ;;  %v2869_v36 = vpop.f32.mrf.mxu0  ;;  %v2009_v49 = vadd.f32 %v1945_v0, %v4025_v28 }
 0x2aa   : > { %v2932_v19 = vadd.f32 %v2866_v40, %v2624_v14 }
 0x2ac   : > { %2969 = vst.msk [vmem:[%s4179_s10 + $0xa8] sm:$0xff] %vm2947_vm1, %v2932_v19 }
 0x2ad   : > { %v2253_v38 = vpop.f32.mrf.mxu2 }
 0x2ae   : > { %v2317_v5 = vadd.f32 %v2253_v38, %v2009_v49  ;;  %v2561_v9 = vpop.f32.mrf.mxu3 }
 0x2af   : > { %v1948_v47 = vpop.f32.mrf.mxu1 }
 0x2b0   : > { %v2625_v63 = vadd.f32 %v2561_v9, %v2317_v5  ;;  %v2872_v60 = vpop.f32.mrf.mxu0  ;;  %v2010_v57 = vadd.f32 %v1948_v47, %v4036_v53 }
 0x2b2   : > { %v2933_v45 = vadd.f32 %v2869_v36, %v2625_v63 }
 0x2b4   : > { %2970 = vst.msk [vmem:[%s4179_s10 + $0xb0] sm:$0xff] %vm2947_vm1, %v2933_v45 }
 0x2b5   : > { %v2256_v21 = vpop.f32.mrf.mxu2 }
 0x2b6   : > { %v2318_v18 = vadd.f32 %v2256_v21, %v2010_v57  ;;  %v2564_v43 = vpop.f32.mrf.mxu3 }
 0x2b7   : > { %v1951_v8 = vpop.f32.mrf.mxu1 }
 0x2b8   : > { %v2626_v28 = vadd.f32 %v2564_v43, %v2318_v18  ;;  %v2875_v26 = vpop.f32.mrf.mxu0  ;;  %v2011_v16 = vadd.f32 %v1951_v8, %v4047_v6 }
 0x2ba   : > { %v2934_v55 = vadd.f32 %v2872_v60, %v2626_v28 }
 0x2bc   : > { %2971 = vst.msk [vmem:[%s4179_s10 + $0xb8] sm:$0xff] %vm2947_vm1, %v2934_v55 }
 0x2bd   : > { %v2259_v20 = vpop.f32.mrf.mxu2 }
 0x2be   : > { %v2319_v54 = vadd.f32 %v2259_v20, %v2011_v16  ;;  %v2567_v1 = vpop.f32.mrf.mxu3 }
 0x2bf   : > { %v1954_v22 = vpop.f32.mrf.mxu1 }
 0x2c0   : > { %v2627_v53 = vadd.f32 %v2567_v1, %v2319_v54  ;;  %v2878_v25 = vpop.f32.mrf.mxu0  ;;  %v2012_v3 = vadd.f32 %v1954_v22, %v4058_v24 }
 0x2c2   : > { %v2935_v32 = vadd.f32 %v2875_v26, %v2627_v53 }
 0x2c4   : > { %2972 = vst.msk [vmem:[%s4179_s10 + $0xc0] sm:$0xff] %vm2947_vm1, %v2935_v32 }
 0x2c5   : > { %v2262_v62 = vpop.f32.mrf.mxu2 }
 0x2c6   : > { %v2320_v35 = vadd.f32 %v2262_v62, %v2012_v3  ;;  %v2570_v2 = vpop.f32.mrf.mxu3 }
 0x2c7   : > { %v1957_v23 = vpop.f32.mrf.mxu1 }
 0x2c8   : > { %v2628_v6 = vadd.f32 %v2570_v2, %v2320_v35  ;;  %v2881_v33 = vpop.f32.mrf.mxu0  ;;  %v2013_v61 = vadd.f32 %v1957_v23, %v4069_v48 }
 0x2ca   : > { %v2936_v11 = vadd.f32 %v2878_v25, %v2628_v6 }
 0x2cc   : > { %2973 = vst.msk [vmem:[%s4179_s10 + $0xc8] sm:$0xff] %vm2947_vm1, %v2936_v11 }
 0x2cd   : > { %v2265_v29 = vpop.f32.mrf.mxu2 }
 0x2ce   : > { %v2321_v30 = vadd.f32 %v2265_v29, %v2013_v61  ;;  %v2573_v50 = vpop.f32.mrf.mxu3 }
 0x2cf   : > { %v1960_v41 = vpop.f32.mrf.mxu1 }
 0x2d0   : > { %v2629_v24 = vadd.f32 %v2573_v50, %v2321_v30  ;;  %v2884_v52 = vpop.f32.mrf.mxu0  ;;  %v2014_v17 = vadd.f32 %v1960_v41, %v4080_v37 }
 0x2d2   : > { %v2937_v10 = vadd.f32 %v2881_v33, %v2629_v24 }
 0x2d4   : > { %2974 = vst.msk [vmem:[%s4179_s10 + $0xd0] sm:$0xff] %vm2947_vm1, %v2937_v10 }
 0x2d5   : > { %v2268_v34 = vpop.f32.mrf.mxu2 }
 0x2d6   : > { %v2322_v56 = vadd.f32 %v2268_v34, %v2014_v17  ;;  %v2576_v12 = vpop.f32.mrf.mxu3 }
 0x2d7   : > { %v1963_v40 = vpop.f32.mrf.mxu1 }
 0x2d8   : > { %v2630_v48 = vadd.f32 %v2576_v12, %v2322_v56  ;;  %v2887_v7 = vpop.f32.mrf.mxu0  ;;  %v2015_v27 = vadd.f32 %v1963_v40, %v4091_v44 }
 0x2da   : > { %v2938_v59 = vadd.f32 %v2884_v52, %v2630_v48 }
 0x2dc   : > { %2975 = vst.msk [vmem:[%s4179_s10 + $0xd8] sm:$0xff] %vm2947_vm1, %v2938_v59 }
 0x2dd   : > { %v2271_v13 = vpop.f32.mrf.mxu2 }
 0x2de   : > { %v2323_v42 = vadd.f32 %v2271_v13, %v2015_v27  ;;  %v2579_v0 = vpop.f32.mrf.mxu3 }
 0x2df   : > { %v1966_v14 = vpop.f32.mrf.mxu1 }
 0x2e0   : > { %v2631_v37 = vadd.f32 %v2579_v0, %v2323_v42  ;;  %v2890_v36 = vpop.f32.mrf.mxu0  ;;  %v2016_v49 = vadd.f32 %v1966_v14, %v4102_v51 }
 0x2e2   : > { %v2939_v19 = vadd.f32 %v2887_v7, %v2631_v37 }
 0x2e4   : > { %2976 = vst.msk [vmem:[%s4179_s10 + $0xe0] sm:$0xff] %vm2947_vm1, %v2939_v19 }
 0x2e5   : > { %v2274_v38 = vpop.f32.mrf.mxu2 }
 0x2e6   : > { %v2324_v5 = vadd.f32 %v2274_v38, %v2016_v49  ;;  %v2582_v9 = vpop.f32.mrf.mxu3 }
 0x2e7   : > { %v1969_v47 = vpop.f32.mrf.mxu1 }
 0x2e8   : > { %v2632_v44 = vadd.f32 %v2582_v9, %v2324_v5  ;;  %v2893_v63 = vpop.f32.mrf.mxu0  ;;  %v2017_v45 = vadd.f32 %v1969_v47, %v4113_v58 }
 0x2ea   : > { %v2940_v60 = vadd.f32 %v2890_v36, %v2632_v44 }
 0x2ec   : > { %2977 = vst.msk [vmem:[%s4179_s10 + $0xe8] sm:$0xff] %vm2947_vm1, %v2940_v60 }
 0x2ed   : > { %v2277_v57 = vpop.f32.mrf.mxu2 }
 0x2ee   : > { %v2325_v21 = vadd.f32 %v2277_v57, %v2017_v45  ;;  %v2585_v18 = vpop.f32.mrf.mxu3 }
 0x2ef   : > { %v1972_v43 = vpop.f32.mrf.mxu1 }
 0x2f0   : > { %v2633_v51 = vadd.f32 %v2585_v18, %v2325_v21  ;;  %v2896_v8 = vpop.f32.mrf.mxu0  ;;  %v2018_v26 = vadd.f32 %v1972_v43, %v4126_v4 }
 0x2f2   : > { %v2941_v28 = vadd.f32 %v2893_v63, %v2633_v51 }
 0x2f4   : > { %2978 = vst.msk [vmem:[%s4179_s10 + $0xf0] sm:$0xff] %vm2947_vm1, %v2941_v28 }
 0x2f5   : > { %v2280_v55 = vpop.f32.mrf.mxu2 }
 0x2f6   : > { %v2326_v16 = vadd.f32 %v2280_v55, %v2018_v26  ;;  %v2588_v20 = vpop.f32.mrf.mxu3 }
 0x2f7   : > { %v1975_v54 = vpop.f32.mrf.mxu1 }
 0x2f8   : > { %v2634_v58 = vadd.f32 %v2588_v20, %v2326_v16  ;;  %v2899_v1 = vpop.f32.mrf.mxu0  ;;  %v2019_v53 = vadd.f32 %v1975_v54, %v4136_v39 }
 0x2fa   : > { %v2942_v22 = vadd.f32 %v2896_v8, %v2634_v58 }
 0x2fc   : > { %2979 = vst.msk [vmem:[%s4179_s10 + $0xf8] sm:$0xff] %vm2947_vm1, %v2942_v22 }
 0x2fd   : > { %v2283_v25 = vpop.f32.mrf.mxu2 }
 0x2fe   : > { %v2327_v32 = vadd.f32 %v2283_v25, %v2019_v53  ;;  %v2591_v3 = vpop.f32.mrf.mxu3 }
 0x2ff   : > { %v1978_v62 = vpop.f32.mrf.mxu1 }
 0x300   : > { %v2635_v4 = vadd.f32 %v2591_v3, %v2327_v32  ;;  %v2902_v2 = vpop.f32.mrf.mxu0  ;;  %v2020_v23 = vadd.f32 %v1978_v62, %v4146_v46 }
 0x302   : > { %v2943_v35 = vadd.f32 %v2899_v1, %v2635_v4 }
 0x304   : > { %2980 = vst.msk [vmem:[%s4179_s10 + $0x100] sm:$0xff] %vm2947_vm1, %v2943_v35 }
 0x305   : > { %v2286_v6 = vpop.f32.mrf.mxu2 }
 0x306   : > { %v2328_v33 = vadd.f32 %v2286_v6, %v2020_v23  ;;  %v2594_v11 = vpop.f32.mrf.mxu3 }
 0x307   : > { %v1981_v61 = vpop.f32.mrf.mxu1 }
 0x308   : > { %v2636_v39 = vadd.f32 %v2594_v11, %v2328_v33  ;;  %v2021_v30 = vadd.f32 %v1981_v61, %v4156_v31  ;;  %v2905_v41 = vpop.f32.mrf.mxu0 }
 0x30a   : > { %v2944_v29 = vadd.f32 %v2902_v2, %v2636_v39 }
 0x30c   : > { %2981 = vst.msk [vmem:[%s4179_s10 + $0x108] sm:$0xff] %vm2947_vm1, %v2944_v29 }
 0x30d   : > { %v2289_v50 = vpop.f32.mrf.mxu2 }
 0x30e   : > { %v2329_v24 = vadd.f32 %v2289_v50, %v2021_v30  ;;  %v2597_v52 = vpop.f32.mrf.mxu3 }
 0x30f   : > { %v1984_v46 = vpop.f32.mrf.mxu1 }
 0x310   : > { %v2637_v10 = vadd.f32 %v2597_v52, %v2329_v24  ;;  %v2022_v34 = vadd.f32 %v1984_v46, %v4165_v15  ;;  %v2908_v48 = vpop.f32.mrf.mxu0 }
 0x312   : > { %v2945_v17 = vadd.f32 %v2905_v41, %v2637_v10 }
 0x314   : > { %2982 = vst.msk [vmem:[%s4179_s10 + $0x110] sm:$0xff] %vm2947_vm1, %v2945_v17 }
 0x315   : > { %v2292_v56 = vpop.f32.mrf.mxu2 }
 0x316   : > { %v2330_v12 = vadd.f32 %v2292_v56, %v2022_v34  ;;  %v2600_v40 = vpop.f32.mrf.mxu3 }
 0x318   : > { %v2638_v7 = vadd.f32 %v2600_v40, %v2330_v12 }
 0x31a   : > { %v2946_v31 = vadd.f32 %v2908_v48, %v2638_v7 }
 0x31c   : > { %2983 = vst.msk [vmem:[%s4179_s10 + $0x118] sm:$0xff] %vm2947_vm1, %v2946_v31 }
 0x31d PF: > { %s13_s12 = sadd.s32 1, %s3412_s12  }
 0x31e   : > { %p10_p4 = scmp.ge.s32.totalorder %s13_s12, 4  }
 0x320   :  { %12 = sbr.rel (!%p10_p4) target bundleno = 1 (0x1), region = 70 }

</bundles_post_ra>
